<compile_context>
chip_gen: v6e
topology: v6e:2x2x1
jax: 0.10.0
libtpu: 0.0.40
codegen_flags: <defaults>
</compile_context>

<pallas_src>
import functools

import numpy as np

import jax
import jax.numpy as jnp
from jax.experimental import pallas as pl
from jax.experimental.pallas import tpu as pltpu


def _gat_fused_kernel(x_ref, neg_ref, e2_ref, sel_ref, bdh_ref, bdc_ref, g_ref,
                      w1_ref, b1_ref, w2_ref, b2_ref, w3_ref, b3_ref,
                      w4_ref, b4_ref, w5_ref, b5_ref, out_ref,
                      *, heads, hidden, num_classes):
    f32 = jnp.float32
    bf16 = jnp.bfloat16

    neg_lw = neg_ref[...]   # (N, N*heads)  additive -1e30 mask, lanewise layout (col = i*heads+h)
    e2 = e2_ref[...]        # (heads, N*heads)   e2[h, c] = 1 iff c % heads == h
    sel = sel_ref[...]      # (N, N*heads)       sel[i, c] = 1 iff c // heads == i
    bdh = bdh_ref[...]      # (N*heads, heads*hidden)       block-diag head mask
    bdc = bdc_ref[...]      # (N*heads, heads*num_classes)  block-diag head mask (final layer)
    gmat = g_ref[...]       # (heads*num_classes, num_classes)  folds the head mean

    def gat_layer(x_in, w_aug, out_dim, bd_mask, exact_softmax):
        # One wide bf16 MXU matmul: per-head features + both attention logit vectors.
        ha = jnp.dot(x_in.astype(bf16), w_aug, preferred_element_type=f32)
        hw = heads * out_dim
        h_all = ha[:, :hw]                         # (N, heads*out_dim), head-major column blocks
        a_src = ha[:, hw:hw + heads]               # (N, heads)
        a_dst = ha[:, hw + heads:hw + 2 * heads]   # (N, heads)

        # Attention logits for ALL heads in one lane-dense slab:
        #   e[j, i*heads+h] = a_dst[i, h] + a_src[j, h]       (softmax runs over j = sublanes)
        s_src = jnp.dot(a_src, e2, preferred_element_type=f32)      # (N, N*heads): a_src[j, h(c)]
        s_dst = jnp.dot(a_dst, e2, preferred_element_type=f32)      # (N, N*heads): a_dst[i, h(c)]
        adst_row = jnp.sum(s_dst * sel, axis=0, keepdims=True)      # (1, N*heads): a_dst[i(c), h(c)]
        e = s_src + adst_row
        e = jnp.where(e > 0, e, 0.2 * e)           # leaky_relu(0.2) on logits
        e = e + neg_lw                             # masked softmax over incoming edges

        # Batched masked softmax over the source-node (sublane) axis — all heads at once.
        m = jnp.max(e, axis=0, keepdims=True)
        p = jnp.exp(e - m)
        denom = jnp.sum(p, axis=0, keepdims=True)  # >= 1 thanks to self-loops
        if exact_softmax:
            p = p / denom
        else:
            p = p * pl.reciprocal(denom, approx=True)

        # Aggregation: one MXU matmul over all heads, then block-diag extraction via a constant
        # 0/1 matmul.  Result is the lane-dense (N, heads*out_dim) slab directly.
        pt = jnp.transpose(p)                                        # (N*heads, N) f32, XLU
        z = jnp.dot(pt.astype(bf16), h_all.astype(bf16),
                    preferred_element_type=f32)                      # (N*heads, heads*out_dim)
        z = z * bd_mask                                              # keep own-head columns only
        return jnp.dot(sel, z, preferred_element_type=f32)           # (N, heads*out_dim)

    h = x_ref[...]
    for w_ref, b_ref in ((w1_ref, b1_ref), (w2_ref, b2_ref),
                         (w3_ref, b3_ref), (w4_ref, b4_ref)):
        h = gat_layer(h, w_ref[...], hidden, bdh, exact_softmax=False) + b_ref[...]
        h = jnp.where(h > 0, h, 0.2 * h)           # inter-layer leaky_relu(0.2)
        # TODO(synk): inter-layer dropout omitted (module evaluated in inference mode).

    agg = gat_layer(h, w5_ref[...], num_classes, bdc, exact_softmax=True)
    logits = jnp.dot(agg, gmat, preferred_element_type=f32) + b5_ref[...]   # head mean + bias

    # Fused log_softmax.  (6-wide output store is a masked vst; negligible at this size.)
    mx = jnp.max(logits, axis=-1, keepdims=True)
    s = logits - mx
    lse = jnp.log(jnp.sum(jnp.exp(s), axis=-1, keepdims=True))
    out_ref[...] = s - lse


def gat_forward(x, adj, packed_params, *, heads, hidden, num_classes):
    n = x.shape[0]
    nh = n * heads

    # Constant selection / masking matrices (built once in numpy, DMA'd once, reused all layers).
    col = np.arange(nh)
    e2 = jnp.asarray(((col[None, :] % heads) ==
                      np.arange(heads)[:, None]).astype(np.float32))                  # (heads, nh)
    sel = jnp.asarray(((col[None, :] // heads) ==
                       np.arange(n)[:, None]).astype(np.float32))                     # (n, nh)
    bdh = jnp.asarray(((col[:, None] % heads) ==
                       (np.arange(heads * hidden)[None, :] // hidden)).astype(np.float32))
    bdc = jnp.asarray(((col[:, None] % heads) ==
                       (np.arange(heads * num_classes)[None, :] // num_classes)).astype(np.float32))
    gmat = jnp.asarray(((np.arange(heads * num_classes)[:, None] % num_classes) ==
                        np.arange(num_classes)[None, :]).astype(np.float32) / heads)

    # Additive -1e30 mask in the kernel's lanewise layout: neg_lw[j, i*heads+h] = mask(adj[i, j]).
    # TODO(synk): at large N pass adj as int8 and expand the mask per row-tile inside the kernel.
    neg_lw = jnp.repeat(jnp.where(adj > 0, 0.0, -1e30).T, heads, axis=1)               # (n, nh)

    flat = []
    for w_aug, b in packed_params:
        flat += [w_aug, b]
    in_arrays = [x, neg_lw, e2, sel, bdh, bdc, gmat] + flat        # all 2D, whole-array blocks
    in_specs = [pl.BlockSpec(a.shape, lambda i: (0, 0)) for a in in_arrays]

    kernel = functools.partial(_gat_fused_kernel, heads=heads, hidden=hidden,
                               num_classes=num_classes)
    return pl.pallas_call(
        kernel,
        out_shape=jax.ShapeDtypeStruct((n, num_classes), jnp.float32),
        grid_spec=pltpu.PrefetchScalarGridSpec(
            num_scalar_prefetch=0,
            grid=(1,),
            in_specs=in_specs,
            out_specs=pl.BlockSpec((n, num_classes), lambda i: (0, 0)),
        ),
    )(*in_arrays)


def init_gat_layer(key, f_in, f_out, heads, shared_bias=False):
    k1, k2, k3, k4 = jax.random.split(key, 4)
    W = jax.random.normal(k1, (heads, f_in, f_out), jnp.float32) / jnp.sqrt(jnp.float32(f_in))
    a_src = jax.random.normal(k2, (heads, f_out, 1), jnp.float32) * 0.1
    a_dst = jax.random.normal(k3, (heads, f_out, 1), jnp.float32) * 0.1
    if shared_bias:   # concat=False layer: single bias of size f_out
        b = jax.random.normal(k4, (1, f_out), jnp.float32) * 0.1
    else:             # concat=True layer: bias of size heads*f_out
        b = jax.random.normal(k4, (1, heads * f_out), jnp.float32) * 0.1
    return W, a_src, a_dst, b


def pack_gat_layer(W, a_src, a_dst, b):
    """Fold per-head weights + attention vectors into one augmented (bf16) weight matrix."""
    heads, f_in, f_out = W.shape
    w_fused = jnp.transpose(W, (1, 0, 2)).reshape(f_in, heads * f_out)   # head-major column blocks
    wa_src = jnp.einsum('hfd,hdo->fh', W, a_src)     # alpha_src_h = x @ (W_h @ a_src_h)
    wa_dst = jnp.einsum('hfd,hdo->fh', W, a_dst)
    w_aug = jnp.concatenate([w_fused, wa_src, wa_dst], axis=1).astype(jnp.bfloat16)
    return w_aug, b


def gat_reference(x, adj, raw_params, *, heads, hidden, num_classes):
    """Pure-JAX f32 reference of the PyTorch module's forward (eval mode)."""
    neg = jnp.where(adj > 0, 0.0, -1e30)
    h = x
    n_layers = len(raw_params)
    for li, (W, a_s, a_d, b) in enumerate(raw_params):
        concat = li < n_layers - 1
        outs = []
        for hd in range(heads):
            feat = h @ W[hd]
            asrc = (feat @ a_s[hd])[:, 0]
            adst = (feat @ a_d[hd])[:, 0]
            e = adst[:, None] + asrc[None, :]
            e = jnp.where(e > 0, e, 0.2 * e) + neg
            p = jax.nn.softmax(e, axis=1)
            outs.append(p @ feat)
        if concat:
            out = jnp.concatenate(outs, axis=1) + b
            h = jnp.where(out > 0, out, 0.2 * out)
        else:
            h = sum(outs) / heads + b
    return jax.nn.log_softmax(h, axis=1)


if __name__ == "__main__":
    N = 32                 # nodes
    F_IN = 16              # dataset.num_node_features (small synthetic)
    HIDDEN = 8
    HEADS = 8
    NUM_CLASSES = 6        # Citeseer has 6 classes

    root = jax.random.PRNGKey(0)
    k_x, k_e, k_p = jax.random.split(root, 3)

    # node features
    x = jax.random.normal(k_x, (N, F_IN), jnp.float32)

    # deterministic graph: bidirectional ring + a few extra random edges, self-loops added
    src_ring = jnp.arange(N)
    dst_ring = (jnp.arange(N) + 1) % N
    extra_src = jax.random.randint(k_e, (2 * N,), 0, N)
    extra_dst = jax.random.randint(jax.random.fold_in(k_e, 1), (2 * N,), 0, N)
    src = jnp.concatenate([src_ring, dst_ring, extra_src])
    dst = jnp.concatenate([dst_ring, src_ring, extra_dst])
    adj = jnp.zeros((N, N), jnp.float32).at[dst, src].set(1.0)
    adj = adj.at[jnp.arange(N), jnp.arange(N)].set(1.0)   # add_self_loops=True

    # parameters for the 5 GATConv layers, packed into augmented bf16 weight matrices
    keys = jax.random.split(k_p, 5)
    raw_params = [
        init_gat_layer(keys[0], F_IN, HIDDEN, HEADS),
        init_gat_layer(keys[1], HEADS * HIDDEN, HIDDEN, HEADS),
        init_gat_layer(keys[2], HEADS * HIDDEN, HIDDEN, HEADS),
        init_gat_layer(keys[3], HEADS * HIDDEN, HIDDEN, HEADS),
        init_gat_layer(keys[4], HEADS * HIDDEN, NUM_CLASSES, HEADS, shared_bias=True),
    ]
    packed = [pack_gat_layer(*p) for p in raw_params]

    fwd = jax.jit(functools.partial(gat_forward, heads=HEADS, hidden=HIDDEN,
                                    num_classes=NUM_CLASSES))
    out = jax.block_until_ready(fwd(x, adj, packed))
    assert out.shape == (N, NUM_CLASSES)
    assert bool(jnp.all(jnp.isfinite(out)))

    # self-check against the f32 pure-JAX reference (bf16 MXU operands => loose tolerance)
    ref = gat_reference(x, adj, raw_params, heads=HEADS, hidden=HIDDEN,
                        num_classes=NUM_CLASSES)
    np.testing.assert_allclose(np.asarray(out), np.asarray(ref), rtol=5e-2, atol=2.5e-1)

    print("KERNEL_OK")
</pallas_src>

<mosaic_0001>
module attributes {stable_mosaic.version = 11 : i64} {
  func.func @_gat_fused_kernel(%arg0: i32, %arg1: memref<32x16xf32, #tpu.memory_space<vmem>>, %arg2: memref<32x256xf32, #tpu.memory_space<vmem>>, %arg3: memref<8x256xf32, #tpu.memory_space<vmem>>, %arg4: memref<32x256xf32, #tpu.memory_space<vmem>>, %arg5: memref<256x64xf32, #tpu.memory_space<vmem>>, %arg6: memref<256x48xf32, #tpu.memory_space<vmem>>, %arg7: memref<48x6xf32, #tpu.memory_space<vmem>>, %arg8: memref<16x80xbf16, #tpu.memory_space<vmem>>, %arg9: memref<1x64xf32, #tpu.memory_space<vmem>>, %arg10: memref<64x80xbf16, #tpu.memory_space<vmem>>, %arg11: memref<1x64xf32, #tpu.memory_space<vmem>>, %arg12: memref<64x80xbf16, #tpu.memory_space<vmem>>, %arg13: memref<1x64xf32, #tpu.memory_space<vmem>>, %arg14: memref<64x80xbf16, #tpu.memory_space<vmem>>, %arg15: memref<1x64xf32, #tpu.memory_space<vmem>>, %arg16: memref<64x64xbf16, #tpu.memory_space<vmem>>, %arg17: memref<1x6xf32, #tpu.memory_space<vmem>>, %arg18: memref<32x6xf32, #tpu.memory_space<vmem>>) attributes {dimension_semantics = [#tpu.dimension_semantics<arbitrary>], iteration_bounds = array<i64: 1>, scalar_prefetch = 0 : i64, scratch_operands = 0 : i64, tpu.core_type = #tpu.core_type<tc>, window_params = [{pipeline_mode = #tpu.pipeline_mode<synchronous>, transform_indices = @transform_0, window_bounds = array<i64: 32, 16>}, {pipeline_mode = #tpu.pipeline_mode<synchronous>, transform_indices = @transform_1, window_bounds = array<i64: 32, 256>}, {pipeline_mode = #tpu.pipeline_mode<synchronous>, transform_indices = @transform_2, window_bounds = array<i64: 8, 256>}, {pipeline_mode = #tpu.pipeline_mode<synchronous>, transform_indices = @transform_3, window_bounds = array<i64: 32, 256>}, {pipeline_mode = #tpu.pipeline_mode<synchronous>, transform_indices = @transform_4, window_bounds = array<i64: 256, 64>}, {pipeline_mode = #tpu.pipeline_mode<synchronous>, transform_indices = @transform_5, window_bounds = array<i64: 256, 48>}, {pipeline_mode = #tpu.pipeline_mode<synchronous>, transform_indices = @transform_6, window_bounds = array<i64: 48, 6>}, {pipeline_mode = #tpu.pipeline_mode<synchronous>, transform_indices = @transform_7, window_bounds = array<i64: 16, 80>}, {pipeline_mode = #tpu.pipeline_mode<synchronous>, transform_indices = @transform_8, window_bounds = array<i64: 1, 64>}, {pipeline_mode = #tpu.pipeline_mode<synchronous>, transform_indices = @transform_9, window_bounds = array<i64: 64, 80>}, {pipeline_mode = #tpu.pipeline_mode<synchronous>, transform_indices = @transform_10, window_bounds = array<i64: 1, 64>}, {pipeline_mode = #tpu.pipeline_mode<synchronous>, transform_indices = @transform_11, window_bounds = array<i64: 64, 80>}, {pipeline_mode = #tpu.pipeline_mode<synchronous>, transform_indices = @transform_12, window_bounds = array<i64: 1, 64>}, {pipeline_mode = #tpu.pipeline_mode<synchronous>, transform_indices = @transform_13, window_bounds = array<i64: 64, 80>}, {pipeline_mode = #tpu.pipeline_mode<synchronous>, transform_indices = @transform_14, window_bounds = array<i64: 1, 64>}, {pipeline_mode = #tpu.pipeline_mode<synchronous>, transform_indices = @transform_15, window_bounds = array<i64: 64, 64>}, {pipeline_mode = #tpu.pipeline_mode<synchronous>, transform_indices = @transform_16, window_bounds = array<i64: 1, 6>}, {pipeline_mode = #tpu.pipeline_mode<synchronous>, transform_indices = @transform_17, window_bounds = array<i64: 32, 6>}]} {
    %c0 = arith.constant 0 : index
    %c0_0 = arith.constant 0 : index
    %0 = vector.load %arg2[%c0, %c0_0] : memref<32x256xf32, #tpu.memory_space<vmem>>, vector<32x256xf32>
    %1 = vector.shape_cast %0 : vector<32x256xf32> to vector<32x256xf32>
    %c0_1 = arith.constant 0 : index
    %c0_2 = arith.constant 0 : index
    %2 = vector.load %arg3[%c0_1, %c0_2] : memref<8x256xf32, #tpu.memory_space<vmem>>, vector<8x256xf32>
    %c0_3 = arith.constant 0 : index
    %c0_4 = arith.constant 0 : index
    %3 = vector.load %arg4[%c0_3, %c0_4] : memref<32x256xf32, #tpu.memory_space<vmem>>, vector<32x256xf32>
    %c0_5 = arith.constant 0 : index
    %c0_6 = arith.constant 0 : index
    %4 = vector.load %arg5[%c0_5, %c0_6] : memref<256x64xf32, #tpu.memory_space<vmem>>, vector<256x64xf32>
    %c0_7 = arith.constant 0 : index
    %c0_8 = arith.constant 0 : index
    %5 = vector.load %arg6[%c0_7, %c0_8] : memref<256x48xf32, #tpu.memory_space<vmem>>, vector<256x48xf32>
    %c0_9 = arith.constant 0 : index
    %c0_10 = arith.constant 0 : index
    %6 = vector.load %arg7[%c0_9, %c0_10] : memref<48x6xf32, #tpu.memory_space<vmem>>, vector<48x6xf32>
    %c0_11 = arith.constant 0 : index
    %c0_12 = arith.constant 0 : index
    %7 = vector.load %arg1[%c0_11, %c0_12] : memref<32x16xf32, #tpu.memory_space<vmem>>, vector<32x16xf32>
    %c0_13 = arith.constant 0 : index
    %c0_14 = arith.constant 0 : index
    %8 = vector.load %arg8[%c0_13, %c0_14] : memref<16x80xbf16, #tpu.memory_space<vmem>>, vector<16x80xbf16>
    %9 = arith.truncf %7 : vector<32x16xf32> to vector<32x16xbf16>
    %cst = arith.constant dense<0.000000e+00> : vector<32x80xf32>
    %10 = tpu.matmul %9, %8, %cst {dimension_numbers = #tpu.dot_dimension_numbers<[1], [0], [0], [1], [0, 0, 1, 1], [], []>} : vector<32x16xbf16>, vector<16x80xbf16>, vector<32x80xf32> -> vector<32x80xf32>
    %11 = vector.extract_strided_slice %10 {offsets = [0, 0], sizes = [32, 64], strides = [1, 1]} : vector<32x80xf32> to vector<32x64xf32>
    %12 = vector.extract_strided_slice %10 {offsets = [0, 64], sizes = [32, 8], strides = [1, 1]} : vector<32x80xf32> to vector<32x8xf32>
    %13 = vector.extract_strided_slice %10 {offsets = [0, 72], sizes = [32, 8], strides = [1, 1]} : vector<32x80xf32> to vector<32x8xf32>
    %cst_15 = arith.constant dense<0.000000e+00> : vector<32x256xf32>
    %14 = tpu.matmul %12, %2, %cst_15 {dimension_numbers = #tpu.dot_dimension_numbers<[1], [0], [0], [1], [0, 0, 1, 1], [], []>} : vector<32x8xf32>, vector<8x256xf32>, vector<32x256xf32> -> vector<32x256xf32>
    %cst_16 = arith.constant dense<0.000000e+00> : vector<32x256xf32>
    %15 = tpu.matmul %13, %2, %cst_16 {dimension_numbers = #tpu.dot_dimension_numbers<[1], [0], [0], [1], [0, 0, 1, 1], [], []>} : vector<32x8xf32>, vector<8x256xf32>, vector<32x256xf32> -> vector<32x256xf32>
    %16 = arith.mulf %15, %3 : vector<32x256xf32>
    %cst_17 = arith.constant dense<0.000000e+00> : vector<256xf32>
    %17 = vector.multi_reduction <add>, %16, %cst_17 [0] : vector<32x256xf32> to vector<256xf32>
    %18 = vector.shape_cast %17 : vector<256xf32> to vector<1x256xf32>
    %19 = vector.broadcast %18 : vector<1x256xf32> to vector<32x256xf32>
    %20 = arith.addf %14, %19 : vector<32x256xf32>
    %cst_18 = arith.constant 0.000000e+00 : f32
    %21 = vector.broadcast %cst_18 : f32 to vector<32x256xf32>
    %22 = arith.cmpf ogt, %20, %21 : vector<32x256xf32>
    %cst_19 = arith.constant 2.000000e-01 : f32
    %23 = vector.broadcast %cst_19 : f32 to vector<32x256xf32>
    %24 = arith.mulf %23, %20 : vector<32x256xf32>
    %25 = arith.select %22, %20, %24 : vector<32x256xi1>, vector<32x256xf32>
    %26 = arith.addf %25, %1 : vector<32x256xf32>
    %cst_20 = arith.constant dense<0xFF800000> : vector<256xf32>
    %27 = vector.multi_reduction <maximumf>, %26, %cst_20 [0] : vector<32x256xf32> to vector<256xf32>
    %28 = vector.shape_cast %27 : vector<256xf32> to vector<1x256xf32>
    %29 = vector.broadcast %28 : vector<1x256xf32> to vector<32x256xf32>
    %30 = arith.subf %26, %29 : vector<32x256xf32>
    %31 = math.exp %30 : vector<32x256xf32>
    %cst_21 = arith.constant dense<0.000000e+00> : vector<256xf32>
    %32 = vector.multi_reduction <add>, %31, %cst_21 [0] : vector<32x256xf32> to vector<256xf32>
    %33 = vector.shape_cast %32 : vector<256xf32> to vector<1x256xf32>
    %34 = tpu.reciprocal %33 {approx = true} : vector<1x256xf32> -> vector<1x256xf32>
    %35 = vector.broadcast %34 : vector<1x256xf32> to vector<32x256xf32>
    %36 = arith.mulf %31, %35 : vector<32x256xf32>
    %37 = tpu.transpose %36, [1, 0] : vector<32x256xf32> -> vector<256x32xf32>
    %38 = arith.truncf %37 : vector<256x32xf32> to vector<256x32xbf16>
    %39 = arith.truncf %11 : vector<32x64xf32> to vector<32x64xbf16>
    %cst_22 = arith.constant dense<0.000000e+00> : vector<256x64xf32>
    %40 = tpu.matmul %38, %39, %cst_22 {dimension_numbers = #tpu.dot_dimension_numbers<[1], [0], [0], [1], [0, 0, 1, 1], [], []>} : vector<256x32xbf16>, vector<32x64xbf16>, vector<256x64xf32> -> vector<256x64xf32>
    %41 = arith.mulf %40, %4 : vector<256x64xf32>
    %cst_23 = arith.constant dense<0.000000e+00> : vector<32x64xf32>
    %42 = tpu.matmul %3, %41, %cst_23 {dimension_numbers = #tpu.dot_dimension_numbers<[1], [0], [0], [1], [0, 0, 1, 1], [], []>} : vector<32x256xf32>, vector<256x64xf32>, vector<32x64xf32> -> vector<32x64xf32>
    %c0_24 = arith.constant 0 : index
    %c0_25 = arith.constant 0 : index
    %43 = vector.load %arg9[%c0_24, %c0_25] : memref<1x64xf32, #tpu.memory_space<vmem>>, vector<1x64xf32>
    %44 = vector.broadcast %43 : vector<1x64xf32> to vector<32x64xf32>
    %45 = arith.addf %42, %44 : vector<32x64xf32>
    %cst_26 = arith.constant 0.000000e+00 : f32
    %46 = vector.broadcast %cst_26 : f32 to vector<32x64xf32>
    %47 = arith.cmpf ogt, %45, %46 : vector<32x64xf32>
    %cst_27 = arith.constant 2.000000e-01 : f32
    %48 = vector.broadcast %cst_27 : f32 to vector<32x64xf32>
    %49 = arith.mulf %48, %45 : vector<32x64xf32>
    %50 = arith.select %47, %45, %49 : vector<32x64xi1>, vector<32x64xf32>
    %c0_28 = arith.constant 0 : index
    %c0_29 = arith.constant 0 : index
    %51 = vector.load %arg10[%c0_28, %c0_29] : memref<64x80xbf16, #tpu.memory_space<vmem>>, vector<64x80xbf16>
    %52 = arith.truncf %50 : vector<32x64xf32> to vector<32x64xbf16>
    %cst_30 = arith.constant dense<0.000000e+00> : vector<32x80xf32>
    %53 = tpu.matmul %52, %51, %cst_30 {dimension_numbers = #tpu.dot_dimension_numbers<[1], [0], [0], [1], [0, 0, 1, 1], [], []>} : vector<32x64xbf16>, vector<64x80xbf16>, vector<32x80xf32> -> vector<32x80xf32>
    %54 = vector.extract_strided_slice %53 {offsets = [0, 0], sizes = [32, 64], strides = [1, 1]} : vector<32x80xf32> to vector<32x64xf32>
    %55 = vector.extract_strided_slice %53 {offsets = [0, 64], sizes = [32, 8], strides = [1, 1]} : vector<32x80xf32> to vector<32x8xf32>
    %56 = vector.extract_strided_slice %53 {offsets = [0, 72], sizes = [32, 8], strides = [1, 1]} : vector<32x80xf32> to vector<32x8xf32>
    %cst_31 = arith.constant dense<0.000000e+00> : vector<32x256xf32>
    %57 = tpu.matmul %55, %2, %cst_31 {dimension_numbers = #tpu.dot_dimension_numbers<[1], [0], [0], [1], [0, 0, 1, 1], [], []>} : vector<32x8xf32>, vector<8x256xf32>, vector<32x256xf32> -> vector<32x256xf32>
    %cst_32 = arith.constant dense<0.000000e+00> : vector<32x256xf32>
    %58 = tpu.matmul %56, %2, %cst_32 {dimension_numbers = #tpu.dot_dimension_numbers<[1], [0], [0], [1], [0, 0, 1, 1], [], []>} : vector<32x8xf32>, vector<8x256xf32>, vector<32x256xf32> -> vector<32x256xf32>
    %59 = arith.mulf %58, %3 : vector<32x256xf32>
    %cst_33 = arith.constant dense<0.000000e+00> : vector<256xf32>
    %60 = vector.multi_reduction <add>, %59, %cst_33 [0] : vector<32x256xf32> to vector<256xf32>
    %61 = vector.shape_cast %60 : vector<256xf32> to vector<1x256xf32>
    %62 = vector.broadcast %61 : vector<1x256xf32> to vector<32x256xf32>
    %63 = arith.addf %57, %62 : vector<32x256xf32>
    %cst_34 = arith.constant 0.000000e+00 : f32
    %64 = vector.broadcast %cst_34 : f32 to vector<32x256xf32>
    %65 = arith.cmpf ogt, %63, %64 : vector<32x256xf32>
    %cst_35 = arith.constant 2.000000e-01 : f32
    %66 = vector.broadcast %cst_35 : f32 to vector<32x256xf32>
    %67 = arith.mulf %66, %63 : vector<32x256xf32>
    %68 = arith.select %65, %63, %67 : vector<32x256xi1>, vector<32x256xf32>
    %69 = arith.addf %68, %1 : vector<32x256xf32>
    %cst_36 = arith.constant dense<0xFF800000> : vector<256xf32>
    %70 = vector.multi_reduction <maximumf>, %69, %cst_36 [0] : vector<32x256xf32> to vector<256xf32>
    %71 = vector.shape_cast %70 : vector<256xf32> to vector<1x256xf32>
    %72 = vector.broadcast %71 : vector<1x256xf32> to vector<32x256xf32>
    %73 = arith.subf %69, %72 : vector<32x256xf32>
    %74 = math.exp %73 : vector<32x256xf32>
    %cst_37 = arith.constant dense<0.000000e+00> : vector<256xf32>
    %75 = vector.multi_reduction <add>, %74, %cst_37 [0] : vector<32x256xf32> to vector<256xf32>
    %76 = vector.shape_cast %75 : vector<256xf32> to vector<1x256xf32>
    %77 = tpu.reciprocal %76 {approx = true} : vector<1x256xf32> -> vector<1x256xf32>
    %78 = vector.broadcast %77 : vector<1x256xf32> to vector<32x256xf32>
    %79 = arith.mulf %74, %78 : vector<32x256xf32>
    %80 = tpu.transpose %79, [1, 0] : vector<32x256xf32> -> vector<256x32xf32>
    %81 = arith.truncf %80 : vector<256x32xf32> to vector<256x32xbf16>
    %82 = arith.truncf %54 : vector<32x64xf32> to vector<32x64xbf16>
    %cst_38 = arith.constant dense<0.000000e+00> : vector<256x64xf32>
    %83 = tpu.matmul %81, %82, %cst_38 {dimension_numbers = #tpu.dot_dimension_numbers<[1], [0], [0], [1], [0, 0, 1, 1], [], []>} : vector<256x32xbf16>, vector<32x64xbf16>, vector<256x64xf32> -> vector<256x64xf32>
    %84 = arith.mulf %83, %4 : vector<256x64xf32>
    %cst_39 = arith.constant dense<0.000000e+00> : vector<32x64xf32>
    %85 = tpu.matmul %3, %84, %cst_39 {dimension_numbers = #tpu.dot_dimension_numbers<[1], [0], [0], [1], [0, 0, 1, 1], [], []>} : vector<32x256xf32>, vector<256x64xf32>, vector<32x64xf32> -> vector<32x64xf32>
    %c0_40 = arith.constant 0 : index
    %c0_41 = arith.constant 0 : index
    %86 = vector.load %arg11[%c0_40, %c0_41] : memref<1x64xf32, #tpu.memory_space<vmem>>, vector<1x64xf32>
    %87 = vector.broadcast %86 : vector<1x64xf32> to vector<32x64xf32>
    %88 = arith.addf %85, %87 : vector<32x64xf32>
    %cst_42 = arith.constant 0.000000e+00 : f32
    %89 = vector.broadcast %cst_42 : f32 to vector<32x64xf32>
    %90 = arith.cmpf ogt, %88, %89 : vector<32x64xf32>
    %cst_43 = arith.constant 2.000000e-01 : f32
    %91 = vector.broadcast %cst_43 : f32 to vector<32x64xf32>
    %92 = arith.mulf %91, %88 : vector<32x64xf32>
    %93 = arith.select %90, %88, %92 : vector<32x64xi1>, vector<32x64xf32>
    %c0_44 = arith.constant 0 : index
    %c0_45 = arith.constant 0 : index
    %94 = vector.load %arg12[%c0_44, %c0_45] : memref<64x80xbf16, #tpu.memory_space<vmem>>, vector<64x80xbf16>
    %95 = arith.truncf %93 : vector<32x64xf32> to vector<32x64xbf16>
    %cst_46 = arith.constant dense<0.000000e+00> : vector<32x80xf32>
    %96 = tpu.matmul %95, %94, %cst_46 {dimension_numbers = #tpu.dot_dimension_numbers<[1], [0], [0], [1], [0, 0, 1, 1], [], []>} : vector<32x64xbf16>, vector<64x80xbf16>, vector<32x80xf32> -> vector<32x80xf32>
    %97 = vector.extract_strided_slice %96 {offsets = [0, 0], sizes = [32, 64], strides = [1, 1]} : vector<32x80xf32> to vector<32x64xf32>
    %98 = vector.extract_strided_slice %96 {offsets = [0, 64], sizes = [32, 8], strides = [1, 1]} : vector<32x80xf32> to vector<32x8xf32>
    %99 = vector.extract_strided_slice %96 {offsets = [0, 72], sizes = [32, 8], strides = [1, 1]} : vector<32x80xf32> to vector<32x8xf32>
    %cst_47 = arith.constant dense<0.000000e+00> : vector<32x256xf32>
    %100 = tpu.matmul %98, %2, %cst_47 {dimension_numbers = #tpu.dot_dimension_numbers<[1], [0], [0], [1], [0, 0, 1, 1], [], []>} : vector<32x8xf32>, vector<8x256xf32>, vector<32x256xf32> -> vector<32x256xf32>
    %cst_48 = arith.constant dense<0.000000e+00> : vector<32x256xf32>
    %101 = tpu.matmul %99, %2, %cst_48 {dimension_numbers = #tpu.dot_dimension_numbers<[1], [0], [0], [1], [0, 0, 1, 1], [], []>} : vector<32x8xf32>, vector<8x256xf32>, vector<32x256xf32> -> vector<32x256xf32>
    %102 = arith.mulf %101, %3 : vector<32x256xf32>
    %cst_49 = arith.constant dense<0.000000e+00> : vector<256xf32>
    %103 = vector.multi_reduction <add>, %102, %cst_49 [0] : vector<32x256xf32> to vector<256xf32>
    %104 = vector.shape_cast %103 : vector<256xf32> to vector<1x256xf32>
    %105 = vector.broadcast %104 : vector<1x256xf32> to vector<32x256xf32>
    %106 = arith.addf %100, %105 : vector<32x256xf32>
    %cst_50 = arith.constant 0.000000e+00 : f32
    %107 = vector.broadcast %cst_50 : f32 to vector<32x256xf32>
    %108 = arith.cmpf ogt, %106, %107 : vector<32x256xf32>
    %cst_51 = arith.constant 2.000000e-01 : f32
    %109 = vector.broadcast %cst_51 : f32 to vector<32x256xf32>
    %110 = arith.mulf %109, %106 : vector<32x256xf32>
    %111 = arith.select %108, %106, %110 : vector<32x256xi1>, vector<32x256xf32>
    %112 = arith.addf %111, %1 : vector<32x256xf32>
    %cst_52 = arith.constant dense<0xFF800000> : vector<256xf32>
    %113 = vector.multi_reduction <maximumf>, %112, %cst_52 [0] : vector<32x256xf32> to vector<256xf32>
    %114 = vector.shape_cast %113 : vector<256xf32> to vector<1x256xf32>
    %115 = vector.broadcast %114 : vector<1x256xf32> to vector<32x256xf32>
    %116 = arith.subf %112, %115 : vector<32x256xf32>
    %117 = math.exp %116 : vector<32x256xf32>
    %cst_53 = arith.constant dense<0.000000e+00> : vector<256xf32>
    %118 = vector.multi_reduction <add>, %117, %cst_53 [0] : vector<32x256xf32> to vector<256xf32>
    %119 = vector.shape_cast %118 : vector<256xf32> to vector<1x256xf32>
    %120 = tpu.reciprocal %119 {approx = true} : vector<1x256xf32> -> vector<1x256xf32>
    %121 = vector.broadcast %120 : vector<1x256xf32> to vector<32x256xf32>
    %122 = arith.mulf %117, %121 : vector<32x256xf32>
    %123 = tpu.transpose %122, [1, 0] : vector<32x256xf32> -> vector<256x32xf32>
    %124 = arith.truncf %123 : vector<256x32xf32> to vector<256x32xbf16>
    %125 = arith.truncf %97 : vector<32x64xf32> to vector<32x64xbf16>
    %cst_54 = arith.constant dense<0.000000e+00> : vector<256x64xf32>
    %126 = tpu.matmul %124, %125, %cst_54 {dimension_numbers = #tpu.dot_dimension_numbers<[1], [0], [0], [1], [0, 0, 1, 1], [], []>} : vector<256x32xbf16>, vector<32x64xbf16>, vector<256x64xf32> -> vector<256x64xf32>
    %127 = arith.mulf %126, %4 : vector<256x64xf32>
    %cst_55 = arith.constant dense<0.000000e+00> : vector<32x64xf32>
    %128 = tpu.matmul %3, %127, %cst_55 {dimension_numbers = #tpu.dot_dimension_numbers<[1], [0], [0], [1], [0, 0, 1, 1], [], []>} : vector<32x256xf32>, vector<256x64xf32>, vector<32x64xf32> -> vector<32x64xf32>
    %c0_56 = arith.constant 0 : index
    %c0_57 = arith.constant 0 : index
    %129 = vector.load %arg13[%c0_56, %c0_57] : memref<1x64xf32, #tpu.memory_space<vmem>>, vector<1x64xf32>
    %130 = vector.broadcast %129 : vector<1x64xf32> to vector<32x64xf32>
    %131 = arith.addf %128, %130 : vector<32x64xf32>
    %cst_58 = arith.constant 0.000000e+00 : f32
    %132 = vector.broadcast %cst_58 : f32 to vector<32x64xf32>
    %133 = arith.cmpf ogt, %131, %132 : vector<32x64xf32>
    %cst_59 = arith.constant 2.000000e-01 : f32
    %134 = vector.broadcast %cst_59 : f32 to vector<32x64xf32>
    %135 = arith.mulf %134, %131 : vector<32x64xf32>
    %136 = arith.select %133, %131, %135 : vector<32x64xi1>, vector<32x64xf32>
    %c0_60 = arith.constant 0 : index
    %c0_61 = arith.constant 0 : index
    %137 = vector.load %arg14[%c0_60, %c0_61] : memref<64x80xbf16, #tpu.memory_space<vmem>>, vector<64x80xbf16>
    %138 = arith.truncf %136 : vector<32x64xf32> to vector<32x64xbf16>
    %cst_62 = arith.constant dense<0.000000e+00> : vector<32x80xf32>
    %139 = tpu.matmul %138, %137, %cst_62 {dimension_numbers = #tpu.dot_dimension_numbers<[1], [0], [0], [1], [0, 0, 1, 1], [], []>} : vector<32x64xbf16>, vector<64x80xbf16>, vector<32x80xf32> -> vector<32x80xf32>
    %140 = vector.extract_strided_slice %139 {offsets = [0, 0], sizes = [32, 64], strides = [1, 1]} : vector<32x80xf32> to vector<32x64xf32>
    %141 = vector.extract_strided_slice %139 {offsets = [0, 64], sizes = [32, 8], strides = [1, 1]} : vector<32x80xf32> to vector<32x8xf32>
    %142 = vector.extract_strided_slice %139 {offsets = [0, 72], sizes = [32, 8], strides = [1, 1]} : vector<32x80xf32> to vector<32x8xf32>
    %cst_63 = arith.constant dense<0.000000e+00> : vector<32x256xf32>
    %143 = tpu.matmul %141, %2, %cst_63 {dimension_numbers = #tpu.dot_dimension_numbers<[1], [0], [0], [1], [0, 0, 1, 1], [], []>} : vector<32x8xf32>, vector<8x256xf32>, vector<32x256xf32> -> vector<32x256xf32>
    %cst_64 = arith.constant dense<0.000000e+00> : vector<32x256xf32>
    %144 = tpu.matmul %142, %2, %cst_64 {dimension_numbers = #tpu.dot_dimension_numbers<[1], [0], [0], [1], [0, 0, 1, 1], [], []>} : vector<32x8xf32>, vector<8x256xf32>, vector<32x256xf32> -> vector<32x256xf32>
    %145 = arith.mulf %144, %3 : vector<32x256xf32>
    %cst_65 = arith.constant dense<0.000000e+00> : vector<256xf32>
    %146 = vector.multi_reduction <add>, %145, %cst_65 [0] : vector<32x256xf32> to vector<256xf32>
    %147 = vector.shape_cast %146 : vector<256xf32> to vector<1x256xf32>
    %148 = vector.broadcast %147 : vector<1x256xf32> to vector<32x256xf32>
    %149 = arith.addf %143, %148 : vector<32x256xf32>
    %cst_66 = arith.constant 0.000000e+00 : f32
    %150 = vector.broadcast %cst_66 : f32 to vector<32x256xf32>
    %151 = arith.cmpf ogt, %149, %150 : vector<32x256xf32>
    %cst_67 = arith.constant 2.000000e-01 : f32
    %152 = vector.broadcast %cst_67 : f32 to vector<32x256xf32>
    %153 = arith.mulf %152, %149 : vector<32x256xf32>
    %154 = arith.select %151, %149, %153 : vector<32x256xi1>, vector<32x256xf32>
    %155 = arith.addf %154, %1 : vector<32x256xf32>
    %cst_68 = arith.constant dense<0xFF800000> : vector<256xf32>
    %156 = vector.multi_reduction <maximumf>, %155, %cst_68 [0] : vector<32x256xf32> to vector<256xf32>
    %157 = vector.shape_cast %156 : vector<256xf32> to vector<1x256xf32>
    %158 = vector.broadcast %157 : vector<1x256xf32> to vector<32x256xf32>
    %159 = arith.subf %155, %158 : vector<32x256xf32>
    %160 = math.exp %159 : vector<32x256xf32>
    %cst_69 = arith.constant dense<0.000000e+00> : vector<256xf32>
    %161 = vector.multi_reduction <add>, %160, %cst_69 [0] : vector<32x256xf32> to vector<256xf32>
    %162 = vector.shape_cast %161 : vector<256xf32> to vector<1x256xf32>
    %163 = tpu.reciprocal %162 {approx = true} : vector<1x256xf32> -> vector<1x256xf32>
    %164 = vector.broadcast %163 : vector<1x256xf32> to vector<32x256xf32>
    %165 = arith.mulf %160, %164 : vector<32x256xf32>
    %166 = tpu.transpose %165, [1, 0] : vector<32x256xf32> -> vector<256x32xf32>
    %167 = arith.truncf %166 : vector<256x32xf32> to vector<256x32xbf16>
    %168 = arith.truncf %140 : vector<32x64xf32> to vector<32x64xbf16>
    %cst_70 = arith.constant dense<0.000000e+00> : vector<256x64xf32>
    %169 = tpu.matmul %167, %168, %cst_70 {dimension_numbers = #tpu.dot_dimension_numbers<[1], [0], [0], [1], [0, 0, 1, 1], [], []>} : vector<256x32xbf16>, vector<32x64xbf16>, vector<256x64xf32> -> vector<256x64xf32>
    %170 = arith.mulf %169, %4 : vector<256x64xf32>
    %cst_71 = arith.constant dense<0.000000e+00> : vector<32x64xf32>
    %171 = tpu.matmul %3, %170, %cst_71 {dimension_numbers = #tpu.dot_dimension_numbers<[1], [0], [0], [1], [0, 0, 1, 1], [], []>} : vector<32x256xf32>, vector<256x64xf32>, vector<32x64xf32> -> vector<32x64xf32>
    %c0_72 = arith.constant 0 : index
    %c0_73 = arith.constant 0 : index
    %172 = vector.load %arg15[%c0_72, %c0_73] : memref<1x64xf32, #tpu.memory_space<vmem>>, vector<1x64xf32>
    %173 = vector.broadcast %172 : vector<1x64xf32> to vector<32x64xf32>
    %174 = arith.addf %171, %173 : vector<32x64xf32>
    %cst_74 = arith.constant 0.000000e+00 : f32
    %175 = vector.broadcast %cst_74 : f32 to vector<32x64xf32>
    %176 = arith.cmpf ogt, %174, %175 : vector<32x64xf32>
    %cst_75 = arith.constant 2.000000e-01 : f32
    %177 = vector.broadcast %cst_75 : f32 to vector<32x64xf32>
    %178 = arith.mulf %177, %174 : vector<32x64xf32>
    %179 = arith.select %176, %174, %178 : vector<32x64xi1>, vector<32x64xf32>
    %c0_76 = arith.constant 0 : index
    %c0_77 = arith.constant 0 : index
    %180 = vector.load %arg16[%c0_76, %c0_77] : memref<64x64xbf16, #tpu.memory_space<vmem>>, vector<64x64xbf16>
    %181 = arith.truncf %179 : vector<32x64xf32> to vector<32x64xbf16>
    %cst_78 = arith.constant dense<0.000000e+00> : vector<32x64xf32>
    %182 = tpu.matmul %181, %180, %cst_78 {dimension_numbers = #tpu.dot_dimension_numbers<[1], [0], [0], [1], [0, 0, 1, 1], [], []>} : vector<32x64xbf16>, vector<64x64xbf16>, vector<32x64xf32> -> vector<32x64xf32>
    %183 = vector.extract_strided_slice %182 {offsets = [0, 0], sizes = [32, 48], strides = [1, 1]} : vector<32x64xf32> to vector<32x48xf32>
    %184 = vector.extract_strided_slice %182 {offsets = [0, 48], sizes = [32, 8], strides = [1, 1]} : vector<32x64xf32> to vector<32x8xf32>
    %185 = vector.extract_strided_slice %182 {offsets = [0, 56], sizes = [32, 8], strides = [1, 1]} : vector<32x64xf32> to vector<32x8xf32>
    %cst_79 = arith.constant dense<0.000000e+00> : vector<32x256xf32>
    %186 = tpu.matmul %184, %2, %cst_79 {dimension_numbers = #tpu.dot_dimension_numbers<[1], [0], [0], [1], [0, 0, 1, 1], [], []>} : vector<32x8xf32>, vector<8x256xf32>, vector<32x256xf32> -> vector<32x256xf32>
    %cst_80 = arith.constant dense<0.000000e+00> : vector<32x256xf32>
    %187 = tpu.matmul %185, %2, %cst_80 {dimension_numbers = #tpu.dot_dimension_numbers<[1], [0], [0], [1], [0, 0, 1, 1], [], []>} : vector<32x8xf32>, vector<8x256xf32>, vector<32x256xf32> -> vector<32x256xf32>
    %188 = arith.mulf %187, %3 : vector<32x256xf32>
    %cst_81 = arith.constant dense<0.000000e+00> : vector<256xf32>
    %189 = vector.multi_reduction <add>, %188, %cst_81 [0] : vector<32x256xf32> to vector<256xf32>
    %190 = vector.shape_cast %189 : vector<256xf32> to vector<1x256xf32>
    %191 = vector.broadcast %190 : vector<1x256xf32> to vector<32x256xf32>
    %192 = arith.addf %186, %191 : vector<32x256xf32>
    %cst_82 = arith.constant 0.000000e+00 : f32
    %193 = vector.broadcast %cst_82 : f32 to vector<32x256xf32>
    %194 = arith.cmpf ogt, %192, %193 : vector<32x256xf32>
    %cst_83 = arith.constant 2.000000e-01 : f32
    %195 = vector.broadcast %cst_83 : f32 to vector<32x256xf32>
    %196 = arith.mulf %195, %192 : vector<32x256xf32>
    %197 = arith.select %194, %192, %196 : vector<32x256xi1>, vector<32x256xf32>
    %198 = arith.addf %197, %1 : vector<32x256xf32>
    %cst_84 = arith.constant dense<0xFF800000> : vector<256xf32>
    %199 = vector.multi_reduction <maximumf>, %198, %cst_84 [0] : vector<32x256xf32> to vector<256xf32>
    %200 = vector.shape_cast %199 : vector<256xf32> to vector<1x256xf32>
    %201 = vector.broadcast %200 : vector<1x256xf32> to vector<32x256xf32>
    %202 = arith.subf %198, %201 : vector<32x256xf32>
    %203 = math.exp %202 : vector<32x256xf32>
    %cst_85 = arith.constant dense<0.000000e+00> : vector<256xf32>
    %204 = vector.multi_reduction <add>, %203, %cst_85 [0] : vector<32x256xf32> to vector<256xf32>
    %205 = vector.shape_cast %204 : vector<256xf32> to vector<1x256xf32>
    %206 = vector.broadcast %205 : vector<1x256xf32> to vector<32x256xf32>
    %207 = arith.divf %203, %206 : vector<32x256xf32>
    %208 = tpu.transpose %207, [1, 0] : vector<32x256xf32> -> vector<256x32xf32>
    %209 = arith.truncf %208 : vector<256x32xf32> to vector<256x32xbf16>
    %210 = arith.truncf %183 : vector<32x48xf32> to vector<32x48xbf16>
    %cst_86 = arith.constant dense<0.000000e+00> : vector<256x48xf32>
    %211 = tpu.matmul %209, %210, %cst_86 {dimension_numbers = #tpu.dot_dimension_numbers<[1], [0], [0], [1], [0, 0, 1, 1], [], []>} : vector<256x32xbf16>, vector<32x48xbf16>, vector<256x48xf32> -> vector<256x48xf32>
    %212 = arith.mulf %211, %5 : vector<256x48xf32>
    %cst_87 = arith.constant dense<0.000000e+00> : vector<32x48xf32>
    %213 = tpu.matmul %3, %212, %cst_87 {dimension_numbers = #tpu.dot_dimension_numbers<[1], [0], [0], [1], [0, 0, 1, 1], [], []>} : vector<32x256xf32>, vector<256x48xf32>, vector<32x48xf32> -> vector<32x48xf32>
    %cst_88 = arith.constant dense<0.000000e+00> : vector<32x6xf32>
    %214 = tpu.matmul %213, %6, %cst_88 {dimension_numbers = #tpu.dot_dimension_numbers<[1], [0], [0], [1], [0, 0, 1, 1], [], []>} : vector<32x48xf32>, vector<48x6xf32>, vector<32x6xf32> -> vector<32x6xf32>
    %c0_89 = arith.constant 0 : index
    %c0_90 = arith.constant 0 : index
    %215 = vector.load %arg17[%c0_89, %c0_90] : memref<1x6xf32, #tpu.memory_space<vmem>>, vector<1x6xf32>
    %216 = vector.broadcast %215 : vector<1x6xf32> to vector<32x6xf32>
    %217 = arith.addf %214, %216 : vector<32x6xf32>
    %cst_91 = arith.constant dense<0xFF800000> : vector<32xf32>
    %218 = vector.multi_reduction <maximumf>, %217, %cst_91 [1] : vector<32x6xf32> to vector<32xf32>
    %219 = vector.shape_cast %218 : vector<32xf32> to vector<32x1xf32>
    %220 = vector.broadcast %219 : vector<32x1xf32> to vector<32x6xf32>
    %221 = arith.subf %217, %220 : vector<32x6xf32>
    %222 = math.exp %221 : vector<32x6xf32>
    %cst_92 = arith.constant dense<0.000000e+00> : vector<32xf32>
    %223 = vector.multi_reduction <add>, %222, %cst_92 [1] : vector<32x6xf32> to vector<32xf32>
    %224 = vector.shape_cast %223 : vector<32xf32> to vector<32x1xf32>
    %225 = math.log %224 : vector<32x1xf32>
    %226 = vector.broadcast %225 : vector<32x1xf32> to vector<32x6xf32>
    %227 = arith.subf %221, %226 : vector<32x6xf32>
    %c0_93 = arith.constant 0 : index
    %c0_94 = arith.constant 0 : index
    %228 = vector.load %arg18[%c0_93, %c0_94] : memref<32x6xf32, #tpu.memory_space<vmem>>, vector<32x6xf32>
    tpu.vector_store %arg18[%c0_93, %c0_94], %227 {strides = array<i32>} : memref<32x6xf32, #tpu.memory_space<vmem>>, vector<32x6xf32>,
    return
  }
  func.func @transform_0(%arg0: i32) -> (i32, i32) {
    %c0_i32 = arith.constant 0 : i32
    %c0_i32_0 = arith.constant 0 : i32
    %c0_i32_1 = arith.constant 0 : i32
    return %c0_i32, %c0_i32_0 : i32, i32
  }
  func.func @transform_1(%arg0: i32) -> (i32, i32) {
    %c0_i32 = arith.constant 0 : i32
    %c0_i32_0 = arith.constant 0 : i32
    %c0_i32_1 = arith.constant 0 : i32
    return %c0_i32, %c0_i32_0 : i32, i32
  }
  func.func @transform_2(%arg0: i32) -> (i32, i32) {
    %c0_i32 = arith.constant 0 : i32
    %c0_i32_0 = arith.constant 0 : i32
    %c0_i32_1 = arith.constant 0 : i32
    return %c0_i32, %c0_i32_0 : i32, i32
  }
  func.func @transform_3(%arg0: i32) -> (i32, i32) {
    %c0_i32 = arith.constant 0 : i32
    %c0_i32_0 = arith.constant 0 : i32
    %c0_i32_1 = arith.constant 0 : i32
    return %c0_i32, %c0_i32_0 : i32, i32
  }
  func.func @transform_4(%arg0: i32) -> (i32, i32) {
    %c0_i32 = arith.constant 0 : i32
    %c0_i32_0 = arith.constant 0 : i32
    %c0_i32_1 = arith.constant 0 : i32
    return %c0_i32, %c0_i32_0 : i32, i32
  }
  func.func @transform_5(%arg0: i32) -> (i32, i32) {
    %c0_i32 = arith.constant 0 : i32
    %c0_i32_0 = arith.constant 0 : i32
    %c0_i32_1 = arith.constant 0 : i32
    return %c0_i32, %c0_i32_0 : i32, i32
  }
  func.func @transform_6(%arg0: i32) -> (i32, i32) {
    %c0_i32 = arith.constant 0 : i32
    %c0_i32_0 = arith.constant 0 : i32
    %c0_i32_1 = arith.constant 0 : i32
    return %c0_i32, %c0_i32_0 : i32, i32
  }
  func.func @transform_7(%arg0: i32) -> (i32, i32) {
    %c0_i32 = arith.constant 0 : i32
    %c0_i32_0 = arith.constant 0 : i32
    %c0_i32_1 = arith.constant 0 : i32
    return %c0_i32, %c0_i32_0 : i32, i32
  }
  func.func @transform_8(%arg0: i32) -> (i32, i32) {
    %c0_i32 = arith.constant 0 : i32
    %c0_i32_0 = arith.constant 0 : i32
    %c0_i32_1 = arith.constant 0 : i32
    return %c0_i32, %c0_i32_0 : i32, i32
  }
  func.func @transform_9(%arg0: i32) -> (i32, i32) {
    %c0_i32 = arith.constant 0 : i32
    %c0_i32_0 = arith.constant 0 : i32
    %c0_i32_1 = arith.constant 0 : i32
    return %c0_i32, %c0_i32_0 : i32, i32
  }
  func.func @transform_10(%arg0: i32) -> (i32, i32) {
    %c0_i32 = arith.constant 0 : i32
    %c0_i32_0 = arith.constant 0 : i32
    %c0_i32_1 = arith.constant 0 : i32
    return %c0_i32, %c0_i32_0 : i32, i32
  }
  func.func @transform_11(%arg0: i32) -> (i32, i32) {
    %c0_i32 = arith.constant 0 : i32
    %c0_i32_0 = arith.constant 0 : i32
    %c0_i32_1 = arith.constant 0 : i32
    return %c0_i32, %c0_i32_0 : i32, i32
  }
  func.func @transform_12(%arg0: i32) -> (i32, i32) {
    %c0_i32 = arith.constant 0 : i32
    %c0_i32_0 = arith.constant 0 : i32
    %c0_i32_1 = arith.constant 0 : i32
    return %c0_i32, %c0_i32_0 : i32, i32
  }
  func.func @transform_13(%arg0: i32) -> (i32, i32) {
    %c0_i32 = arith.constant 0 : i32
    %c0_i32_0 = arith.constant 0 : i32
    %c0_i32_1 = arith.constant 0 : i32
    return %c0_i32, %c0_i32_0 : i32, i32
  }
  func.func @transform_14(%arg0: i32) -> (i32, i32) {
    %c0_i32 = arith.constant 0 : i32
    %c0_i32_0 = arith.constant 0 : i32
    %c0_i32_1 = arith.constant 0 : i32
    return %c0_i32, %c0_i32_0 : i32, i32
  }
  func.func @transform_15(%arg0: i32) -> (i32, i32) {
    %c0_i32 = arith.constant 0 : i32
    %c0_i32_0 = arith.constant 0 : i32
    %c0_i32_1 = arith.constant 0 : i32
    return %c0_i32, %c0_i32_0 : i32, i32
  }
  func.func @transform_16(%arg0: i32) -> (i32, i32) {
    %c0_i32 = arith.constant 0 : i32
    %c0_i32_0 = arith.constant 0 : i32
    %c0_i32_1 = arith.constant 0 : i32
    return %c0_i32, %c0_i32_0 : i32, i32
  }
  func.func @transform_17(%arg0: i32) -> (i32, i32) {
    %c0_i32 = arith.constant 0 : i32
    %c0_i32_0 = arith.constant 0 : i32
    %c0_i32_1 = arith.constant 0 : i32
    return %c0_i32, %c0_i32_0 : i32, i32
  }
}

</mosaic_0001>

<bundles_post_ra>
// kernel: gat_forward.1
= control target key start
LH: loop header
LB: loop body
LE: loop exit
PB: predicated region body
PF: predicated region fallthrough
CT: control target
= control target key end

     0   :  { %s7272_s0 = inlined_call_operand.vmem [shape: f32[32,16], index: 0, kind: input, shape index: {}]   ;;  %s7273_s1 = inlined_call_operand.vmem [shape: f32[32,256], index: 1, kind: input, shape index: {}]   ;;  %s7274_s2 = inlined_call_operand.vmem [shape: f32[8,256], index: 2, kind: input, shape index: {}]   ;;  %s7275_s3 = inlined_call_operand.vmem [shape: f32[32,256], index: 3, kind: input, shape index: {}]   ;;  %s7276_s4 = inlined_call_operand.vmem [shape: f32[256,64], index: 4, kind: input, shape index: {}]   ;;  %s7277_s5 = inlined_call_operand.vmem [shape: f32[256,48], index: 5, kind: input, shape index: {}]   ;;  %s7278_s6 = inlined_call_operand.vmem [shape: f32[48,6], index: 6, kind: input, shape index: {}]   ;;  %s7279_s7 = inlined_call_operand.hbm [shape: bf16[16,80], index: 7, kind: input, shape index: {}]   ;;  %s7280_s8 = inlined_call_operand.vmem [shape: f32[1,64], index: 8, kind: input, shape index: {}]   ;;  %s7281_s9 = inlined_call_operand.vmem [shape: bf16[64,80], index: 9, kind: input, shape index: {}]   ;;  %s7282_s10 = inlined_call_operand.vmem [shape: f32[1,64], index: 10, kind: input, shape index: {}]   ;;  %s7283_s11 = inlined_call_operand.vmem [shape: bf16[64,80], index: 11, kind: input, shape index: {}]   ;;  %s7284_s12 = inlined_call_operand.hbm [shape: f32[1,64], index: 12, kind: input, shape index: {}]   ;;  %s7285_s13 = inlined_call_operand.vmem [shape: bf16[64,80], index: 13, kind: input, shape index: {}]   ;;  %s7286_s14 = inlined_call_operand.hbm [shape: f32[1,64], index: 14, kind: input, shape index: {}]   ;;  %s7287_s15 = inlined_call_operand.hbm [shape: bf16[64,64], index: 15, kind: input, shape index: {}]   ;;  %s7288_s16 = inlined_call_operand.hbm [shape: f32[1,6], index: 16, kind: input, shape index: {}]   ;;  %s7289_s17 = inlined_call_operand.vmem [shape: f32[32,6], index: 17, kind: output, shape index: {}]  }
   0x1   :  { %7327 = sst [smem:[#allocation29_spill]] %s7272_s0 }
   0x2   :  { %7328 = sst [smem:[#allocation30_spill]] %s7273_s1 }
   0x3   :  { %22 = vsyncpa [#allocation3], 0 }
   0x4   :  { %23 = vsyncpa [#allocation5], 0 }
   0x5   :  { %24 = vsyncpa [#allocation8], 0  ;;  %s5709_s24 = smov [#allocation4]  }
   0x6   :  { %s65_s25 = sshll.u32 %s5709_s24, 4  ;;  %s66_s25 = int_to_ptr.vmem [resolvable:$true] %s65_s25 }
   0x7   :  { %s5611_s26 = scalar_lea.vmem %s66_s25, 16  ;;  %s5615_s27 = scalar_lea.vmem %s66_s25, 32 }
   0x8   :  { %p5612_p0 = scmp.ne.s32.totalorder %s66_s25, %s5611_s26  ;;  %p5616_p1 = scmp.lt.s32.totalorder %s66_s25, %s66_s25 }
   0x9   :  { %p5617_p2 = scmp.lt.s32.totalorder %s5615_s27, %s5611_s26 }
   0xb   :  { %p5618_p3 = por %p5617_p2, %p5616_p1 }
   0xd   :  { %p5619_p4 = pnand %p5618_p3, %p5612_p0 }
   0xf   :  { %5622 = shalt.err (!%p5619_p4)
}
  0x10   :  { %68 = dma.hbm_to_vmem [thread:$0]  %s7284_s12, 16, %s66_s25, [#allocation5]  }
  0x11   :  { %s5710_s0 = smov [#allocation7]   ;;  %s5711_s18 = smov [#allocation2]  }
  0x12   :  { %s86_s30 = sshll.u32 %s5710_s0, 4  ;;  %s44_s19 = sshll.u32 %s5711_s18, 4  ;;  %s87_s30 = int_to_ptr.vmem [resolvable:$true] %s86_s30  ;;  %s45_s19 = int_to_ptr.vmem [resolvable:$true] %s44_s19 }
  0x13   :  { %s5631_s1 = scalar_lea.vmem %s87_s30, 512  ;;  %p5636_p6 = scmp.lt.s32.totalorder %s87_s30, %s87_s30 }
  0x14   :  { %p5632_p5 = scmp.ne.s32.totalorder %s87_s30, %s5631_s1  ;;  %p5637_p7 = scmp.lt.s32.totalorder %s5631_s1, %s5631_s1 }
  0x16   :  { %p5638_p8 = por %p5637_p7, %p5636_p6 }
  0x18   :  { %p5639_p9 = pnand %p5638_p8, %p5632_p5 }
  0x1a   :  { %5642 = shalt.err (!%p5639_p9)
}
  0x1b   :  { %s5712_s20 = smov 64   ;;  %s5713_s21 = smov 4  }
  0x1c   :  { %92 = dma.hbm_to_vmem [thread:$0]  %s7287_s15, 512, %s87_s30, [#allocation8], %s5712_s20, %s5712_s20, %s5713_s21  }
  0x1d   :  { %s5651_s12 = scalar_lea.vmem %s45_s19, 128  ;;  %p5656_p11 = scmp.lt.s32.totalorder %s45_s19, %s45_s19 }
  0x1e   :  { %p5652_p10 = scmp.ne.s32.totalorder %s45_s19, %s5651_s12  ;;  %p5657_p12 = scmp.lt.s32.totalorder %s5651_s12, %s5651_s12 }
  0x20   :  { %p5658_p13 = por %p5657_p12, %p5656_p11 }
  0x22   :  { %p5659_p0 = pnand %p5658_p13, %p5652_p10 }
  0x24   :  { %5662 = shalt.err (!%p5659_p0)
}
  0x25   :  { %50 = dma.hbm_to_vmem [thread:$0]  %s7279_s7, 128, %s45_s19, [#allocation3], %s5712_s20, %s5712_s20, %s5713_s21  }
  0x26   :  { %s5714_s26 = smov [#allocation6]   ;;  %s5715_s28 = smov [#allocation9]  }
  0x27   :  { %s77_s27 = sshll.u32 %s5714_s26, 4  ;;  %s99_s29 = sshll.u32 %s5715_s28, 4  ;;  %s78_s27 = int_to_ptr.vmem [resolvable:$true] %s77_s27  ;;  %s100_s29 = int_to_ptr.vmem [resolvable:$true] %s99_s29 }
  0x28   :  { %s5671_s15 = scalar_lea.vmem %s78_s27, 16  ;;  %s5675_s0 = scalar_lea.vmem %s78_s27, 32 }
  0x29   :  { %p5672_p1 = scmp.ne.s32.totalorder %s78_s27, %s5671_s15  ;;  %p5676_p2 = scmp.lt.s32.totalorder %s78_s27, %s78_s27 }
  0x2a   :  { %p5677_p3 = scmp.lt.s32.totalorder %s5675_s0, %s5671_s15 }
  0x2c   :  { %p5678_p4 = por %p5677_p3, %p5676_p2 }
  0x2e   :  { %p5679_p5 = pnand %p5678_p4, %p5672_p1 }
  0x30   :  { %5682 = shalt.err (!%p5679_p5)
}
  0x31   :  { %80 = dma.hbm_to_vmem [thread:$0]  %s7286_s14, 16, %s78_s27, [#allocation5]  }
  0x32   :  { %s5691_s1 = scalar_lea.vmem %s100_s29, 16  ;;  %s5695_s7 = scalar_lea.vmem %s100_s29, 32 }
  0x33   :  { %p5692_p6 = scmp.ne.s32.totalorder %s100_s29, %s5691_s1  ;;  %p5696_p7 = scmp.lt.s32.totalorder %s100_s29, %s100_s29 }
  0x34   :  { %p5697_p8 = scmp.lt.s32.totalorder %s5695_s7, %s5691_s1 }
  0x36   :  { %p5698_p9 = por %p5697_p8, %p5696_p7 }
  0x38   :  { %p5699_p10 = pnand %p5698_p9, %p5692_p6 }
  0x3a   :  { %5702 = shalt.err (!%p5699_p10)
}
  0x3b   :  { %102 = dma.hbm_to_vmem [thread:$0]  %s7288_s16, 16, %s100_s29, [#allocation8]  }
  0x3c   :  { %5703 = dma.done.wait [#allocation3], 128  }
  0x3d   :  { %5704 = vsyncadd [#allocation3], 4294967168 }
  0x3e   :  { %5705 = dma.done.wait [#allocation5], 32  }
  0x3f   :  { %5706 = vsyncadd [#allocation5], 4294967264 }
  0x40   :  { %5707 = dma.done.wait [#allocation8], 528  }
  0x41   :  { %5708 = vsyncadd [#allocation8], 4294966768  ;;  %v5395_v0 = vld [vmem:[#allocation2] sm:$0xff]   ;;  %s7329_s23 = sld [smem:[#allocation29_spill]]  ;;  %vm221_vm0 = vcmask 130048   ;;  %v5844_v7 = vld [vmem:[%s7274_s2 + $0x8] sm:$0xff] }
  0x42   :  { %5130 = vmatprep.subr.bf16.mxu0 %v5395_v0  ;;  %5382 = vmatprep.subr.mxu1 %v5844_v7  ;;  %v5850_v8 = vld [vmem:[%s7274_s2] sm:$0xff]  ;;  %v7292_v9 = vmov 0.0   ;;  %s5717_s30 = smov 56   ;;  %vm289_vm1 = vcmask 64512   ;;  %v5885_v24 = vld [vmem:[%s7275_s3 + $0x8] sm:$0xff]  ;;  %v5896_v30 = vld [vmem:[%s7275_s3 + $0x10] sm:$0xff] }
  0x43   :  { %5131 = vmatpush3.bf16.msra.mxu0 %v5395_v0  ;;  %5383 = vmatpush1.msra.mxu1 %v5850_v8  ;;  %v5891_v28 = vld [vmem:[%s7275_s3] sm:$0xff]  ;;  %v5906_v34 = vld [vmem:[%s7275_s3 + $0x18] sm:$0xff]  ;;  %v5913_v37 = vld [vmem:[%s7275_s3 + $0x28] sm:$0xff]  ;;  %s7330_s18 = sld [smem:[#allocation30_spill]]  ;;  %vm702_vm10 = vcmask 261120   ;;  %vm1082_vm13 = vcmask 523264  }
  0x44   :  { %328 = vmatprep.subr.mxu0 %v5844_v7  ;;  %374 = vmatprep.mubr.f32.mxu1 %v7292_v9  ;;  %v5901_v31 = vld [vmem:[%s7275_s3 + $0x20] sm:$0xff]  ;;  %v5918_v38 = vld [vmem:[%s7275_s3 + $0x30] sm:$0xff]  ;;  %v5926_v44 = vld [vmem:[%s7275_s3 + $0x38] sm:$0xff]  ;;  %s5719_s24 = smov 80  }
  0x47   :  { %v207_v1 = vld [vmem:[%s7329_s23] sm:$0xff]  ;;  %v208_v2 = vld [vmem:[%s7329_s23 + $0x8] sm:$0xff]  ;;  %v209_v3 = vld [vmem:[%s7329_s23 + $0x10] sm:$0xff] }
  0x48   :  { %v213_v4 = vpack.c.bf16 %v208_v2, %v207_v1  ;;  %v210_v5 = vld [vmem:[%s7329_s23 + $0x18] sm:$0xff] }
  0x49   :  { %v214_v6 = vpack.c.bf16 %v210_v5, %v209_v3 }
  0x4a   :  { %5132 = vmatprep.mubr.msk.bf16.mxu0 %vm221_vm0, %v213_v4 }
  0x4b   :  { %5133 = vmatmul.mubr.msk.bf16.vlgmr.msra.gmra.mxu0 %vm221_vm0, %v214_v6 }
  0x4c   :  { %329 = vmatpush1.msra.mxu0 %v5850_v8  ;;  %362 = vmatprep.mubr.f32.mxu0 %v7292_v9 }
  0x4d   :  { %459 = vmatprep.subr.mxu0 %v5844_v7 }
 0x10b   :  { %v5134_v10 = vpop.f32.mrf.mxu0 }
 0x10c   :  { %285 = vrot.lane.b32.xlu1 %v5134_v10, %s5717_s30 }
 0x10d   :  { %v262_v11 = vpop.f32.mrf.mxu0 }
 0x10e   :  { %281 = vrot.lane.b32.xlu0 %v262_v11, %s5717_s30 }
 0x10f   :  { %v5135_v12 = vpop.f32.mrf.mxu0 }
 0x110   :  { %v701_v13 = vpack.c.bf16 %v5135_v12, %v5134_v10  ;;  %287 = vrot.lane.b32.xlu1 %v5135_v12, %s5717_s30 }
 0x111   :  { %v265_v14 = vpop.f32.mrf.mxu0 }
 0x112   :  { %283 = vrot.lane.b32.xlu0 %v265_v14, %s5717_s30  ;;  %5136 = vmatprep.subr.bf16.mxu1 %v701_v13  ;;  %v700_v16 = vpack.c.bf16 %v265_v14, %v262_v11 }
 0x114   :  { %415 = vrot.lane.b32.xlu1 %v265_v14, %s5712_s20 }
 0x116   :  { %413 = vrot.lane.b32.xlu0 %v262_v11, %s5712_s20 }
 0x118   :  { %419 = vrot.lane.b32.xlu1 %v5135_v12, %s5712_s20 }
 0x11a   :  { %417 = vrot.lane.b32.xlu0 %v5134_v10, %s5712_s20 }
 0x17e   :  { %v286_v15 = vpop.permute.xlu1 %285 }
 0x17f   :  { %4632 = vmatmul.mubr.msk.f32.vlgmr.msra.gmra.mxu1 %vm289_vm1, %v286_v15 }
 0x180   :  { %5137 = vmatpush3.bf16.msra.mxu1 %v701_v13  ;;  %v282_v17 = vpop.permute.xlu0 %281  ;;  %380 = vmatprep.mubr.f32.mxu1 %v7292_v9 }
 0x181   :  { %5138 = vmatprep.subr.bf16.mxu1 %v700_v16  ;;  %4630 = vmatmul.mubr.msk.f32.vlgmr.msra.gmra.mxu0 %vm289_vm1, %v282_v17 }
 0x182   :  { %v288_v18 = vpop.permute.xlu1 %287  ;;  %368 = vmatprep.mubr.f32.mxu0 %v7292_v9  ;;  %460 = vmatpush1.msra.mxu0 %v5850_v8 }
 0x183   :  { %4633 = vmatmul.mubr.msk.f32.gmra.mxu1 %vm289_vm1, %v288_v18 }
 0x184   :  { %5139 = vmatpush3.bf16.msra.mxu1 %v700_v16  ;;  %v284_v19 = vpop.permute.xlu0 %283 }
 0x185   :  { %4631 = vmatmul.mubr.msk.f32.gmra.mxu0 %vm289_vm1, %v284_v19  ;;  %1319 = vmatprep.subr.mxu1 %v5844_v7 }
 0x186   :  { %493 = vmatprep.mubr.f32.mxu0 %v7292_v9  ;;  %v416_v21 = vpop.permute.xlu1 %415 }
 0x188   :  { %v414_v20 = vpop.permute.xlu0 %413 }
 0x189   :  { %4634 = vmatmul.mubr.msk.f32.vlgmr.msra.gmra.mxu0 %vm289_vm1, %v414_v20 }
 0x18a   :  { %499 = vmatprep.mubr.f32.mxu0 %v7292_v9  ;;  %v420_v23 = vpop.permute.xlu1 %419 }
 0x18c   :  { %v418_v22 = vpop.permute.xlu0 %417 }
 0x18d   :  { %4635 = vmatmul.mubr.msk.f32.gmra.mxu0 %vm289_vm1, %v416_v21  ;;  %v5934_v21 = vld [vmem:[%s7330_s18] sm:$0xff] }
 0x18e   :  { %505 = vmatprep.mubr.f32.mxu0 %v7292_v9 }
 0x191   :  { %4636 = vmatmul.mubr.msk.f32.gmra.mxu0 %vm289_vm1, %v418_v22 }
 0x192   :  { %511 = vmatprep.mubr.f32.mxu0 %v7292_v9 }
 0x195   :  { %4637 = vmatmul.mubr.msk.f32.gmra.mxu0 %vm289_vm1, %v420_v23 }
 0x196   :  { %1015 = vmatprep.mubr.f32.mxu0 %v5885_v24 }
 0x23f   :  { %v376_v25 = vpop.f32.mrf.mxu1 }
 0x240   :  { %v391_v40 = vmul.f32 %v376_v25, %v5901_v31  ;;  %v5939_v25 = vld [vmem:[%s7330_s18 + $0x20] sm:$0xff] }
 0x241   :  { %v364_v26 = vpop.f32.mrf.mxu0  ;;  %v378_v27 = vpop.f32.mrf.mxu1 }
 0x242   :  { %v387_v35 = vmul.f32 %v364_v26, %v5891_v28  ;;  %v392_v47 = vmul.f32 %v378_v27, %v5913_v37 }
 0x243   :  { %v366_v29 = vpop.f32.mrf.mxu0  ;;  %v382_v32 = vpop.f32.mrf.mxu1 }
 0x244   :  { %v388_v41 = vmul.f32 %v366_v29, %v5885_v24  ;;  %v393_v48 = vmul.f32 %v382_v32, %v5918_v38  ;;  %v5944_v29 = vld [vmem:[%s7330_s18 + $0x8] sm:$0xff] }
 0x245   :  { %v370_v33 = vpop.f32.mrf.mxu0  ;;  %v384_v45 = vpop.f32.mrf.mxu1 }
 0x246   :  { %v389_v36 = vmul.f32 %v370_v33, %v5896_v30  ;;  %v394_v53 = vmul.f32 %v384_v45, %v5926_v44  ;;  %v5949_v33 = vld [vmem:[%s7330_s18 + $0x10] sm:$0xff]  ;;  %v5962_v45 = vld [vmem:[%s7330_s18 + $0x18] sm:$0xff] }
 0x247   :  { %v372_v39 = vpop.f32.mrf.mxu0 }
 0x248   :  { %v395_v42 = vadd.f32 %v389_v36, %v387_v35  ;;  %v390_v43 = vmul.f32 %v372_v39, %v5906_v34 }
 0x249   :  { %v495_v46 = vpop.f32.mrf.mxu0 }
 0x24a   :  { %v396_v49 = vadd.f32 %v395_v42, %v391_v40  ;;  %v404_v50 = vadd.f32 %v390_v43, %v388_v41  ;;  %v5957_v41 = vld [vmem:[%s7330_s18 + $0x28] sm:$0xff] }
 0x24b   :  { %v497_v51 = vpop.f32.mrf.mxu0 }
 0x24c   :  { %v397_v52 = vadd.f32 %v396_v49, %v393_v48  ;;  %v405_v54 = vadd.f32 %v404_v50, %v392_v47  ;;  %v5967_v47 = vld [vmem:[%s7330_s18 + $0x30] sm:$0xff] }
 0x24d   :  { %v501_v55 = vpop.f32.mrf.mxu0 }
 0x24e   :  { %v398_v56 = vrot.slane %v397_v52, 4  ;;  %v406_v57 = vadd.f32 %v405_v54, %v394_v53 }
 0x24f   :  { %v503_v58 = vpop.f32.mrf.mxu0 }
 0x250   :  { %v399_v59 = vadd.f32 %v398_v56, %v397_v52  ;;  %v407_v60 = vrot.slane %v406_v57, 4 }
 0x251   :  { %v507_v63 = vpop.f32.mrf.mxu0 }
 0x252   :  { %v400_v61 = vrot.slane %v399_v59, 2  ;;  %v408_v62 = vadd.f32 %v407_v60, %v406_v57 }
 0x253   :  { %v509_v4 = vpop.f32.mrf.mxu0 }
 0x254   :  { %v409_v0 = vrot.slane %v408_v62, 2  ;;  %v401_v1 = vadd.f32 %v400_v61, %v399_v59 }
 0x255   :  { %v513_v14 = vpop.f32.mrf.mxu0 }
 0x256   :  { %v402_v2 = vrot.slane %v401_v1, 1  ;;  %v410_v3 = vadd.f32 %v409_v0, %v408_v62 }
 0x257   :  { %v515_v43 = vpop.f32.mrf.mxu0 }
 0x258   :  { %v403_v5 = vadd.f32 %v402_v2, %v401_v1  ;;  %v411_v6 = vrot.slane %v410_v3, 1 }
 0x25a   :  { %v496_v10 = vadd.f32 %v495_v46, %v403_v5  ;;  %v412_v11 = vadd.f32 %v411_v6, %v410_v3  ;;  %v502_v12 = vadd.f32 %v501_v55, %v403_v5  ;;  %v508_v13 = vadd.f32 %v507_v63, %v403_v5  ;;  %v5975_v55 = vld [vmem:[%s7330_s18 + $0x38] sm:$0xff] }
 0x25b   :  { %v514_v15 = vadd.f32 %v513_v14, %v403_v5 }
 0x25c   :  { %vm518_vm2 = vcmp.gt.f32.partialorder %v496_v10, 0.0  ;;  %v526_v16 = vmul.f32 0.2, %v496_v10  ;;  %v498_v17 = vadd.f32 %v497_v51, %v412_v11  ;;  %vm520_vm3 = vcmp.gt.f32.partialorder %v502_v12, 0.0 }
 0x25d   :  { %v528_v18 = vmul.f32 0.2, %v502_v12  ;;  %v504_v19 = vadd.f32 %v503_v58, %v412_v11  ;;  %vm522_vm4 = vcmp.gt.f32.partialorder %v508_v13, 0.0  ;;  %v530_v20 = vmul.f32 0.2, %v508_v13 }
 0x25e   :  { %v534_v22 = vsel %vm518_vm2, %v496_v10, %v526_v16  ;;  %vm519_vm5 = vcmp.gt.f32.partialorder %v498_v17, 0.0  ;;  %v527_v23 = vmul.f32 0.2, %v498_v17  ;;  %v510_v26 = vadd.f32 %v509_v4, %v412_v11 }
 0x25f   :  { %vm521_vm6 = vcmp.gt.f32.partialorder %v504_v19, 0.0  ;;  %v529_v27 = vmul.f32 0.2, %v504_v19  ;;  %v536_v35 = vsel %vm520_vm3, %v502_v12, %v528_v18  ;;  %v538_v36 = vsel %vm522_vm4, %v508_v13, %v530_v20 }
 0x260   :  { %v535_v32 = vsel %vm519_vm5, %v498_v17, %v527_v23  ;;  %vm523_vm7 = vcmp.gt.f32.partialorder %v510_v26, 0.0  ;;  %v542_v39 = vadd.f32 %v534_v22, %v5934_v21  ;;  %v546_v40 = vadd.f32 %v538_v36, %v5939_v25 }
 0x261   :  { %v531_v42 = vmul.f32 0.2, %v510_v26  ;;  %v537_v46 = vsel %vm521_vm6, %v504_v19, %v529_v27  ;;  %vm524_vm8 = vcmp.gt.f32.partialorder %v514_v15, 0.0  ;;  %v532_v48 = vmul.f32 0.2, %v514_v15 }
 0x262   :  { %v516_v49 = vadd.f32 %v515_v43, %v412_v11  ;;  %v543_v50 = vadd.f32 %v535_v32, %v5944_v29  ;;  %v544_v51 = vadd.f32 %v536_v35, %v5949_v33  ;;  %v545_v57 = vadd.f32 %v537_v46, %v5962_v45 }
 0x263   :  { %v539_v52 = vsel %vm523_vm7, %v510_v26, %v531_v42  ;;  %v540_v54 = vsel %vm524_vm8, %v514_v15, %v532_v48  ;;  %v550_v58 = vmax.f32 %v542_v39, %v546_v40 }
 0x264   :  { %v547_v53 = vadd.f32 %v539_v52, %v5957_v41  ;;  %vm525_vm9 = vcmp.gt.f32.partialorder %v516_v49, 0.0  ;;  %v533_v56 = vmul.f32 0.2, %v516_v49  ;;  %v548_v59 = vadd.f32 %v540_v54, %v5967_v47 }
 0x266   :  { %v541_v60 = vsel %vm525_vm9, %v516_v49, %v533_v56  ;;  %v559_v61 = vmax.f32 %v543_v50, %v547_v53  ;;  %v551_v62 = vmax.f32 %v544_v51, %v548_v59 }
 0x267   :  { %v549_v63 = vadd.f32 %v541_v60, %v5975_v55 }
 0x268   :  { %v552_v0 = vmax.f32 %v550_v58, %v551_v62 }
 0x269   :  { %v560_v1 = vmax.f32 %v545_v57, %v549_v63 }
 0x26a   :  { %v553_v2 = vrot.slane %v552_v0, 4 }
 0x26b   :  { %v561_v3 = vmax.f32 %v559_v61, %v560_v1 }
 0x26c   :  { %v554_v4 = vmax.f32 %v552_v0, %v553_v2 }
 0x26d   :  { %v562_v5 = vrot.slane %v561_v3, 4 }
 0x26e   :  { %v555_v6 = vrot.slane %v554_v4, 2 }
 0x26f   :  { %v563_v10 = vmax.f32 %v561_v3, %v562_v5 }
 0x270   :  { %v556_v11 = vmax.f32 %v554_v4, %v555_v6 }
 0x271   :  { %v564_v12 = vrot.slane %v563_v10, 2 }
 0x272   :  { %v557_v13 = vrot.slane %v556_v11, 1 }
 0x273   :  { %v565_v14 = vmax.f32 %v563_v10, %v564_v12 }
 0x274   :  { %v558_v15 = vmax.f32 %v556_v11, %v557_v13 }
 0x275   :  { %v566_v16 = vrot.slane %v565_v14, 1 }
 0x276   :  { %v570_v17 = vsub.f32 %v544_v51, %v558_v15  ;;  %v568_v20 = vsub.f32 %v542_v39, %v558_v15  ;;  %v572_v23 = vsub.f32 %v546_v40, %v558_v15  ;;  %v574_v35 = vsub.f32 %v548_v59, %v558_v15 }
 0x277   :  { %v567_v18 = vmax.f32 %v565_v14, %v566_v16 }
 0x278   :  { %v580_v26 = vmul.f32 1.442695, %v570_v17  ;;  %v576_v36 = vmul.f32 1.442695, %v568_v20  ;;  %v584_v46 = vmul.f32 1.442695, %v572_v23 }
 0x279   :  { %v571_v19 = vsub.f32 %v545_v57, %v567_v18  ;;  %v569_v22 = vsub.f32 %v543_v50, %v567_v18  ;;  %v573_v27 = vsub.f32 %v547_v53, %v567_v18  ;;  %v575_v42 = vsub.f32 %v549_v63, %v567_v18 }
 0x27a   :  { %5412 = vpow2.f32 %v580_v26  ;;  %v588_v49 = vmul.f32 1.442695, %v574_v35 }
 0x27b   :  { %v582_v32 = vmul.f32 1.442695, %v571_v19  ;;  %v578_v43 = vmul.f32 1.442695, %v569_v22  ;;  %v586_v48 = vmul.f32 1.442695, %v573_v27 }
 0x27c   :  { %v590_v52 = vmul.f32 1.442695, %v575_v42 }
 0x27d   :  { %5414 = vpow2.f32 %v582_v32 }
 0x27e   :  { %5416 = vpow2.f32 %v576_v36 }
 0x27f   :  { %5418 = vpow2.f32 %v578_v43 }
 0x280   :  { %5420 = vpow2.f32 %v584_v46 }
 0x281   :  { %5422 = vpow2.f32 %v586_v48 }
 0x282   :  { %5424 = vpow2.f32 %v588_v49 }
 0x283   :  { %5426 = vpow2.f32 %v590_v52 }
 0x287   :  { %v5413_v39 = vpop.eup %5412 }
 0x28a   :  { %v5415_v40 = vpop.eup %5414 }
 0x28b   :  { %v5417_v50 = vpop.eup %5416 }
 0x28c   :  { %v5419_v51 = vpop.eup %5418  ;;  %v592_v53 = vadd.f32 %v5417_v50, %v5413_v39 }
 0x28d   :  { %v5421_v54 = vpop.eup %5420  ;;  %v601_v56 = vadd.f32 %v5419_v51, %v5415_v40 }
 0x28e   :  { %v5423_v57 = vpop.eup %5422  ;;  %v593_v58 = vadd.f32 %v5421_v54, %v592_v53 }
 0x28f   :  { %v5425_v59 = vpop.eup %5424  ;;  %v602_v60 = vadd.f32 %v5423_v57, %v601_v56 }
 0x290   :  { %v5427_v61 = vpop.eup %5426  ;;  %v594_v62 = vadd.f32 %v5425_v59, %v593_v58 }
 0x291   :  { %v603_v63 = vadd.f32 %v5427_v61, %v602_v60 }
 0x292   :  { %v595_v0 = vrot.slane %v594_v62, 4 }
 0x293   :  { %v604_v1 = vrot.slane %v603_v63, 4 }
 0x294   :  { %v596_v2 = vadd.f32 %v595_v0, %v594_v62 }
 0x295   :  { %v605_v3 = vadd.f32 %v604_v1, %v603_v63 }
 0x296   :  { %v597_v4 = vrot.slane %v596_v2, 2 }
 0x297   :  { %v606_v5 = vrot.slane %v605_v3, 2 }
 0x298   :  { %v598_v6 = vadd.f32 %v597_v4, %v596_v2 }
 0x299   :  { %v607_v10 = vadd.f32 %v606_v5, %v605_v3 }
 0x29a   :  { %v599_v11 = vrot.slane %v598_v6, 1 }
 0x29b   :  { %v608_v12 = vrot.slane %v607_v10, 1 }
 0x29c   :  { %v600_v13 = vadd.f32 %v599_v11, %v598_v6 }
 0x29d   :  { %v609_v14 = vadd.f32 %v608_v12, %v607_v10 }
 0x29e   :  { %5428 = vrcp.f32 %v600_v13 }
 0x29f   :  { %5430 = vrcp.f32 %v609_v14 }
 0x2ab   :  { %v5429_v15 = vpop.eup %5428 }
 0x2ac   :  { %v5431_v16 = vpop.eup %5430  ;;  %v612_v17 = vmul.f32 %v5429_v15, %v5417_v50  ;;  %v614_v19 = vmul.f32 %v5429_v15, %v5413_v39  ;;  %v616_v22 = vmul.f32 %v5429_v15, %v5421_v54  ;;  %v618_v26 = vmul.f32 %v5429_v15, %v5425_v59 }
 0x2ad   :  { %v613_v18 = vmul.f32 %v5431_v16, %v5419_v51  ;;  %v615_v20 = vmul.f32 %v5431_v16, %v5415_v40  ;;  %v617_v23 = vmul.f32 %v5431_v16, %v5423_v57  ;;  %v619_v27 = vmul.f32 %v5431_v16, %v5427_v61 }
 0x2ae   :  { %620 = vxpose.xlu0.b32.start [1/4] (short) %v612_v17, 128 }
 0x2af   :  { %652 = vxpose.xlu1.b32.start [1/4] (short) %v613_v18, 128 }
 0x2b2   :  { %621 = vxpose.xlu0.b32.cont [2/4] (short) %v614_v19, 128 }
 0x2b3   :  { %653 = vxpose.xlu1.b32.cont [2/4] (short) %v615_v20, 128 }
 0x2b6   :  { %622 = vxpose.xlu0.b32.cont [3/4] (short) %v616_v22, 128 }
 0x2b7   :  { %654 = vxpose.xlu1.b32.cont [3/4] (short) %v617_v23, 128 }
 0x2ba   :  { %623 = vxpose.xlu0.b32.end [4/4] (short) %v618_v26, 128 }
 0x2bb   :  { %655 = vxpose.xlu1.b32.end [4/4] (short) %v619_v27, 128 }
 0x32a   :  { %v636_v32 = vpop.trf.xlu0 }
 0x32b   :  { %v668_v35 = vpop.trf.xlu1 }
 0x32e   :  { %v637_v36 = vpop.trf.xlu0 }
 0x32f   :  { %v684_v42 = vpack.c.bf16 %v637_v36, %v636_v32  ;;  %v669_v43 = vpop.trf.xlu1 }
 0x330   :  { %v692_v15 = vpack.c.bf16 %v669_v43, %v668_v35 }
 0x331   :  { %5140 = vmatprep.mubr.msk.bf16.mxu1 %vm702_vm10, %v684_v42 }
 0x332   :  { %v638_v46 = vpop.trf.xlu0 }
 0x333   :  { %v670_v49 = vpop.trf.xlu1 }
 0x336   :  { %v639_v48 = vpop.trf.xlu0 }
 0x337   :  { %v685_v52 = vpack.c.bf16 %v639_v48, %v638_v46  ;;  %v671_v40 = vpop.trf.xlu1 }
 0x338   :  { %v693_v17 = vpack.c.bf16 %v671_v40, %v670_v49 }
 0x339   :  { %5141 = vmatmul.mubr.msk.bf16.vlgmr.msra.gmra.mxu1 %vm702_vm10, %v685_v52 }
 0x33a   :  { %v640_v39 = vpop.trf.xlu0  ;;  %1320 = vmatpush1.msra.mxu1 %v5850_v8 }
 0x33b   :  { %v672_v54 = vpop.trf.xlu1 }
 0x33e   :  { %v641_v50 = vpop.trf.xlu0 }
 0x33f   :  { %v686_v51 = vpack.c.bf16 %v641_v50, %v640_v39  ;;  %v673_v58 = vpop.trf.xlu1 }
 0x340   :  { %v694_v18 = vpack.c.bf16 %v673_v58, %v672_v54 }
 0x341   :  { %5144 = vmatprep.mubr.msk.bf16.mxu1 %vm702_vm10, %v686_v51 }
 0x342   :  { %v642_v53 = vpop.trf.xlu0 }
 0x343   :  { %v674_v61 = vpop.trf.xlu1 }
 0x346   :  { %v643_v56 = vpop.trf.xlu0 }
 0x347   :  { %v687_v57 = vpack.c.bf16 %v643_v56, %v642_v53  ;;  %v675_v0 = vpop.trf.xlu1 }
 0x348   :  { %v695_v20 = vpack.c.bf16 %v675_v0, %v674_v61 }
 0x349   :  { %5145 = vmatmul.mubr.msk.bf16.gmra.mxu1 %vm702_vm10, %v687_v57 }
 0x34a   :  { %v644_v59 = vpop.trf.xlu0 }
 0x34b   :  { %v676_v4 = vpop.trf.xlu1 }
 0x34e   :  { %v645_v60 = vpop.trf.xlu0 }
 0x34f   :  { %v688_v62 = vpack.c.bf16 %v645_v60, %v644_v59  ;;  %v677_v10 = vpop.trf.xlu1 }
 0x350   :  { %v696_v22 = vpack.c.bf16 %v677_v10, %v676_v4 }
 0x351   :  { %5148 = vmatprep.mubr.msk.bf16.mxu1 %vm702_vm10, %v688_v62 }
 0x352   :  { %v646_v63 = vpop.trf.xlu0 }
 0x353   :  { %v678_v13 = vpop.trf.xlu1 }
 0x356   :  { %v647_v1 = vpop.trf.xlu0 }
 0x357   :  { %v689_v2 = vpack.c.bf16 %v647_v1, %v646_v63  ;;  %v679_v16 = vpop.trf.xlu1 }
 0x358   :  { %v697_v27 = vpack.c.bf16 %v679_v16, %v678_v13  ;;  %v6033_v13 = vld [vmem:[%s7276_s4 + $0xf8] sm:$0xff] }
 0x359   :  { %5149 = vmatmul.mubr.msk.bf16.gmra.mxu1 %vm702_vm10, %v689_v2 }
 0x35a   :  { %v648_v3 = vpop.trf.xlu0 }
 0x35b   :  { %v680_v19 = vpop.trf.xlu1 }
 0x35e   :  { %v649_v5 = vpop.trf.xlu0 }
 0x35f   :  { %v690_v6 = vpack.c.bf16 %v649_v5, %v648_v3  ;;  %v681_v23 = vpop.trf.xlu1 }
 0x360   :  { %v698_v32 = vpack.c.bf16 %v681_v23, %v680_v19  ;;  %v6060_v23 = vld [vmem:[%s7276_s4 + $0x68] sm:$0xff] }
 0x361   :  { %5152 = vmatprep.mubr.msk.bf16.mxu1 %vm702_vm10, %v690_v6 }
 0x362   :  { %v650_v11 = vpop.trf.xlu0 }
 0x363   :  { %v682_v26 = vpop.trf.xlu1 }
 0x366   :  { %v651_v12 = vpop.trf.xlu0 }
 0x367   :  { %v691_v14 = vpack.c.bf16 %v651_v12, %v650_v11  ;;  %v683_v35 = vpop.trf.xlu1 }
 0x368   :  { %v699_v36 = vpack.c.bf16 %v683_v35, %v682_v26  ;;  %v6072_v35 = vld [vmem:[%s7276_s4 + $0x60] sm:$0xff] }
 0x369   :  { %5153 = vmatmul.mubr.msk.bf16.gmra.mxu1 %vm702_vm10, %v691_v14  ;;  %v6038_v14 = vld [vmem:[%s7276_s4 + $0x78] sm:$0xff] }
 0x36a   :  { %5156 = vmatprep.mubr.msk.bf16.mxu1 %vm702_vm10, %v692_v15  ;;  %v6043_v15 = vld [vmem:[%s7276_s4 + $0xf0] sm:$0xff] }
 0x371   :  { %5157 = vmatmul.mubr.msk.bf16.gmra.mxu1 %vm702_vm10, %v693_v17  ;;  %v6048_v17 = vld [vmem:[%s7276_s4 + $0x70] sm:$0xff] }
 0x372   :  { %5160 = vmatprep.mubr.msk.bf16.mxu1 %vm702_vm10, %v694_v18 }
 0x379   :  { %5161 = vmatmul.mubr.msk.bf16.gmra.mxu1 %vm702_vm10, %v695_v20  ;;  %v6055_v20 = vld [vmem:[%s7276_s4 + $0xe8] sm:$0xff] }
 0x37a   :  { %5164 = vmatprep.mubr.msk.bf16.mxu1 %vm702_vm10, %v696_v22 }
 0x381   :  { %5165 = vmatmul.mubr.msk.bf16.gmra.mxu1 %vm702_vm10, %v697_v27 }
 0x382   :  { %5168 = vmatprep.mubr.msk.bf16.mxu1 %vm702_vm10, %v698_v32  ;;  %v6067_v32 = vld [vmem:[%s7276_s4 + $0xe0] sm:$0xff] }
 0x389   :  { %5169 = vmatmul.mubr.msk.bf16.gmra.mxu1 %vm702_vm10, %v699_v36 }
 0x38a   :  { %1353 = vmatprep.mubr.f32.mxu1 %v7292_v9 }
 0x3f9   :  { %v5998_v42 = vpop.f32.mrf.mxu1 }
 0x3fb   :  { %v6000_v43 = vpop.f32.mrf.mxu1 }
 0x3fd   :  { %v6002_v46 = vpop.f32.mrf.mxu1 }
 0x3ff   :  { %v6004_v48 = vpop.f32.mrf.mxu1 }
 0x409   :  { %v6006_v49 = vpop.f32.mrf.mxu1 }
 0x40b   :  { %v6008_v52 = vpop.f32.mrf.mxu1 }
 0x40d   :  { %v6010_v39 = vpop.f32.mrf.mxu1 }
 0x40f   :  { %v6012_v40 = vpop.f32.mrf.mxu1 }
 0x419   :  { %v5150_v50 = vpop.f32.mrf.mxu1 }
 0x41b   :  { %v6014_v51 = vpop.f32.mrf.mxu1 }
 0x41d   :  { %v5151_v53 = vpop.f32.mrf.mxu1 }
 0x41f   :  { %v820_v54 = vpop.f32.mrf.mxu1 }
 0x429   :  { %v5154_v56 = vpop.f32.mrf.mxu1 }
 0x42a   :  { %v926_v27 = vmul.f32 %v5154_v56, %v6048_v17  ;;  %v6079_v56 = vld [vmem:[%s7276_s4 + $0xd8] sm:$0xff] }
 0x42b   :  { %v833_v57 = vpop.f32.mrf.mxu1 }
 0x42d   :  { %v5155_v58 = vpop.f32.mrf.mxu1 }
 0x42e   :  { %v927_v19 = vmul.f32 %v5155_v58, %v6038_v14 }
 0x42f   :  { %v836_v59 = vpop.f32.mrf.mxu1 }
 0x430   :  { %v925_v58 = vmul.f32 %v836_v59, %v6060_v23  ;;  %v6091_v59 = vld [vmem:[%s7276_s4 + $0xd0] sm:$0xff] }
 0x431   :  { %v6016_v60 = vpop.f32.mrf.mxu1 }
 0x433   :  { %v6018_v61 = vpop.f32.mrf.mxu1 }
 0x435   :  { %v6020_v62 = vpop.f32.mrf.mxu1 }
 0x437   :  { %v6022_v63 = vpop.f32.mrf.mxu1 }
 0x439   :  { %v6024_v0 = vpop.f32.mrf.mxu1 }
 0x43b   :  { %v6026_v1 = vpop.f32.mrf.mxu1 }
 0x43d   :  { %v5163_v2 = vpop.f32.mrf.mxu1 }
 0x43f   :  { %v6028_v3 = vpop.f32.mrf.mxu1 }
 0x441   :  { %v5166_v4 = vpop.f32.mrf.mxu1 }
 0x443   :  { %v881_v5 = vpop.f32.mrf.mxu1 }
 0x445   :  { %v5167_v6 = vpop.f32.mrf.mxu1 }
 0x447   :  { %v884_v10 = vpop.f32.mrf.mxu1 }
 0x449   :  { %v5170_v11 = vpop.f32.mrf.mxu1 }
 0x44a   :  { %v942_v26 = vmul.f32 %v5170_v11, %v6043_v15  ;;  %v6084_v11 = vld [vmem:[%s7276_s4 + $0x58] sm:$0xff] }
 0x44b   :  { %v897_v12 = vpop.f32.mrf.mxu1 }
 0x44d   :  { %v5171_v16 = vpop.f32.mrf.mxu1 }
 0x44e   :  { %v943_v18 = vmul.f32 %v5171_v16, %v6033_v13  ;;  %v940_v16 = vmul.f32 %v897_v12, %v6067_v32  ;;  %v6108_v12 = vld [vmem:[%s7276_s4 + $0x48] sm:$0xff] }
 0x44f   :  { %v900_v22 = vpop.f32.mrf.mxu1 }
 0x450   :  { %4804 = vmatprep.subr.mxu0 %v943_v18  ;;  %v941_v36 = vmul.f32 %v900_v22, %v6055_v20  ;;  %v924_v18 = vmul.f32 %v833_v57, %v6072_v35  ;;  %v939_v22 = vmul.f32 %v5167_v6, %v6079_v56  ;;  %v6103_v57 = vld [vmem:[%s7276_s4 + $0xc8] sm:$0xff]  ;;  %v6120_v6 = vld [vmem:[%s7276_s4 + $0x40] sm:$0xff] }
 0x451   :  { %4805 = vmatpush3.msra.mxu0 %v927_v19  ;;  %v6096_v19 = vld [vmem:[%s7276_s4 + $0x50] sm:$0xff] }
 0x452   :  { %4806 = vmatprep.subr.mxu0 %v942_v26  ;;  %v923_v26 = vmul.f32 %v5151_v53, %v6084_v11  ;;  %v6115_v53 = vld [vmem:[%s7276_s4 + $0xc0] sm:$0xff] }
 0x453   :  { %4807 = vmatpush3.msra.mxu0 %v926_v27  ;;  %v938_v27 = vmul.f32 %v5166_v4, %v6091_v59  ;;  %v6132_v4 = vld [vmem:[%s7276_s4 + $0x38] sm:$0xff] }
 0x454   :  { %4808 = vmatprep.subr.mxu0 %v941_v36  ;;  %v922_v36 = vmul.f32 %v5150_v50, %v6096_v19  ;;  %v6127_v50 = vld [vmem:[%s7276_s4 + $0xb8] sm:$0xff] }
 0x455   :  { %4809 = vmatpush3.msra.mxu0 %v925_v58  ;;  %v937_v58 = vmul.f32 %v884_v10, %v6103_v57  ;;  %v920_v10 = vmul.f32 %v6014_v51, %v6120_v6  ;;  %v6153_v51 = vld [vmem:[%s7276_s4 + $0xa8] sm:$0xff] }
 0x456   :  { %4810 = vmatprep.subr.mxu0 %v940_v16  ;;  %v921_v16 = vmul.f32 %v820_v54, %v6108_v12  ;;  %v6140_v54 = vld [vmem:[%s7276_s4 + $0xb0] sm:$0xff] }
 0x457   :  { %4811 = vmatpush3.msra.mxu0 %v924_v18  ;;  %v936_v18 = vmul.f32 %v881_v5, %v6115_v53  ;;  %v919_v5 = vmul.f32 %v6010_v39, %v6132_v4  ;;  %v6167_v39 = vld [vmem:[%s7276_s4 + $0xa0] sm:$0xff] }
 0x458   :  { %4812 = vmatprep.subr.mxu0 %v939_v22  ;;  %v6145_v22 = vld [vmem:[%s7276_s4 + $0x30] sm:$0xff] }
 0x459   :  { %4813 = vmatpush3.msra.mxu0 %v923_v26  ;;  %v935_v26 = vmul.f32 %v5163_v2, %v6127_v50  ;;  %v918_v2 = vmul.f32 %v6006_v49, %v6145_v22  ;;  %v6181_v49 = vld [vmem:[%s7276_s4 + $0x98] sm:$0xff] }
 0x45a   :  { %4814 = vmatprep.subr.mxu0 %v938_v27  ;;  %v6158_v27 = vld [vmem:[%s7276_s4 + $0x28] sm:$0xff] }
 0x45b   :  { %4815 = vmatpush3.msra.mxu0 %v922_v36  ;;  %v934_v36 = vmul.f32 %v6024_v0, %v6140_v54  ;;  %v917_v0 = vmul.f32 %v6012_v40, %v6158_v27  ;;  %v6195_v40 = vld [vmem:[%s7276_s4 + $0x90] sm:$0xff] }
 0x45c   :  { %4816 = vmatprep.subr.mxu0 %v937_v58  ;;  %v6172_v58 = vld [vmem:[%s7276_s4 + $0x20] sm:$0xff]  ;;  %7331 = vst [vmem:[#allocation13_spill] sm:$0xff] %v6195_v40 }
 0x45d   :  { %4817 = vmatpush3.msra.mxu0 %v921_v16  ;;  %v933_v16 = vmul.f32 %v6028_v3, %v6153_v51  ;;  %v916_v3 = vmul.f32 %v6008_v52, %v6172_v58  ;;  %v6209_v52 = vld [vmem:[%s7276_s4 + $0x88] sm:$0xff] }
 0x45e   :  { %4818 = vmatprep.subr.mxu0 %v936_v18  ;;  %v6186_v18 = vld [vmem:[%s7276_s4 + $0x18] sm:$0xff]  ;;  %7333 = vst [vmem:[#allocation15_spill] sm:$0xff] %v6209_v52 }
 0x45f   :  { %4819 = vmatpush3.msra.mxu0 %v920_v10  ;;  %v932_v10 = vmul.f32 %v6026_v1, %v6167_v39  ;;  %v915_v1 = vmul.f32 %v6002_v46, %v6186_v18  ;;  %v6223_v46 = vld [vmem:[%s7276_s4 + $0x80] sm:$0xff] }
 0x460   :  { %4820 = vmatprep.subr.mxu0 %v935_v26  ;;  %v6200_v26 = vld [vmem:[%s7276_s4 + $0x10] sm:$0xff]  ;;  %7335 = vst [vmem:[#allocation17_spill] sm:$0xff] %v6223_v46 }
 0x461   :  { %4821 = vmatpush3.msra.mxu0 %v919_v5  ;;  %7332 = vst [vmem:[#allocation14_spill] sm:$0xff] %v6200_v26  ;;  %v931_v5 = vmul.f32 %v6020_v62, %v6181_v49  ;;  %v914_v62 = vmul.f32 %v5998_v42, %v6200_v26  ;;  %v928_v42 = vmul.f32 %v6018_v61, %v6223_v46  ;;  %v5398_v61 = vld [vmem:[%s7281_s9 + $0x8] sm:$0xff]  }
 0x462   :  { %4822 = vmatprep.subr.mxu0 %v934_v36  ;;  %v6214_v36 = vld [vmem:[%s7276_s4 + $0x8] sm:$0xff] }
 0x463   :  { %4823 = vmatpush3.msra.mxu0 %v918_v2  ;;  %7334 = vst [vmem:[#allocation16_spill] sm:$0xff] %v6214_v36  ;;  %v930_v2 = vmul.f32 %v6016_v60, %v6195_v40  ;;  %v913_v60 = vmul.f32 %v6004_v48, %v6214_v36  ;;  %v5397_v48 = vld [vmem:[%s7281_s9 + $0x10] sm:$0xff]  }
 0x464   :  { %4824 = vmatprep.subr.mxu0 %v933_v16  ;;  %v6228_v16 = vld [vmem:[%s7276_s4] sm:$0xff] }
 0x465   :  { %4825 = vmatpush3.msra.mxu0 %v917_v0  ;;  %7336 = vst [vmem:[#allocation18_spill] sm:$0xff] %v6228_v16  ;;  %v929_v0 = vmul.f32 %v6022_v63, %v6209_v52  ;;  %v5399_v63 = vld [vmem:[%s7281_s9] sm:$0xff]  }
 0x466   :  { %4826 = vmatprep.subr.mxu0 %v932_v10  ;;  %v912_v10 = vmul.f32 %v6000_v43, %v6228_v16  ;;  %v5396_v43 = vld [vmem:[%s7281_s9 + $0x18] sm:$0xff]  }
 0x467   :  { %4827 = vmatpush3.msra.mxu0 %v916_v3 }
 0x468   :  { %4828 = vmatprep.subr.mxu0 %v931_v5  ;;  %v4654_v5 = vld [vmem:[%s7280_s8] ss:$0 sm:$0xff] }
 0x469   :  { %4829 = vmatpush3.msra.mxu0 %v915_v1 }
 0x46a   :  { %4830 = vmatprep.subr.mxu0 %v930_v2 }
 0x46b   :  { %4831 = vmatpush3.msra.mxu0 %v914_v62 }
 0x46c   :  { %4832 = vmatprep.subr.mxu0 %v929_v0 }
 0x46d   :  { %4833 = vmatpush3.msra.mxu0 %v913_v60 }
 0x46e   :  { %4834 = vmatprep.subr.mxu0 %v928_v42 }
 0x46f   :  { %4835 = vmatpush3.msra.mxu0 %v912_v10 }
 0x470   :  { %1016 = vmatmul.mubr.f32.vlgmr.msra.gmra.mxu0 %v5891_v28  ;;  %5172 = vmatprep.subr.bf16.mxu0 %v5396_v43 }
 0x471   :  { %1020 = vmatprep.mubr.f32.mxu0 %v5906_v34  ;;  %5173 = vmatpush3.bf16.msra.mxu0 %v5396_v43 }
 0x472   :  { %5174 = vmatprep.subr.bf16.mxu0 %v5397_v48 }
 0x474   :  { %1021 = vmatmul.mubr.f32.gmra.mxu0 %v5896_v30 }
 0x475   :  { %1025 = vmatprep.mubr.f32.mxu0 %v5913_v37  ;;  %5175 = vmatpush3.bf16.msra.mxu0 %v5397_v48 }
 0x476   :  { %5176 = vmatprep.subr.bf16.mxu0 %v5398_v61 }
 0x478   :  { %1026 = vmatmul.mubr.f32.gmra.mxu0 %v5901_v31 }
 0x479   :  { %1030 = vmatprep.mubr.f32.mxu0 %v5926_v44  ;;  %5177 = vmatpush3.bf16.msra.mxu0 %v5398_v61 }
 0x47a   :  { %5178 = vmatprep.subr.bf16.mxu0 %v5399_v63 }
 0x47c   :  { %1031 = vmatmul.mubr.f32.gmra.mxu0 %v5918_v38 }
 0x47d   :  { %5179 = vmatpush3.bf16.msra.mxu0 %v5399_v63 }
 0x47e   :  { %1188 = vmatprep.subr.mxu0 %v5844_v7 }
 0x530   :  { %v4836_v3 = vpop.f32.mrf.mxu0 }
 0x532   :  { %v4837_v1 = vpop.f32.mrf.mxu0 }
 0x533   :  { %v4838_v2 = vadd.f32 %v4837_v1, %v4836_v3 }
 0x534   :  { %v4839_v62 = vpop.f32.mrf.mxu0 }
 0x535   :  { %v1018_v0 = vadd.f32 %v4838_v2, %v4654_v5 }
 0x536   :  { %v4840_v60 = vpop.f32.mrf.mxu0 }
 0x537   :  { %v4841_v42 = vadd.f32 %v4840_v60, %v4839_v62  ;;  %v1040_v43 = vmul.f32 0.2, %v1018_v0  ;;  %vm1036_vm11 = vcmp.gt.f32.partialorder %v1018_v0, 0.0 }
 0x538   :  { %v4842_v10 = vpop.f32.mrf.mxu0 }
 0x539   :  { %v1023_v48 = vadd.f32 %v4841_v42, %v4654_v5  ;;  %v1044_v16 = vsel %vm1036_vm11, %v1018_v0, %v1040_v43  ;;  %v7337_v0 = vmov 0.0   ;;  %v6280_v43 = vld [vmem:[%s7274_s2 + $0x8] sm:$0xff] }
 0x53a   :  { %v4843_v61 = vpop.f32.mrf.mxu0  ;;  %7338 = vst [vmem:[#allocation19_spill] sm:$0xff] %v6280_v43 }
 0x53b   :  { %vm1037_vm12 = vcmp.gt.f32.partialorder %v1023_v48, 0.0  ;;  %v1041_v63 = vmul.f32 0.2, %v1023_v48  ;;  %v4844_v9 = vadd.f32 %v4843_v61, %v4842_v10 }
 0x53c   :  { %v4845_v7 = vpop.f32.mrf.mxu0 }
 0x53d   :  { %v1045_v46 = vsel %vm1037_vm12, %v1023_v48, %v1041_v63  ;;  %v1028_v36 = vadd.f32 %v4844_v9, %v4654_v5 }
 0x53e   :  { %v4846_v52 = vpop.f32.mrf.mxu0  ;;  %v1056_v26 = vpack.c.bf16 %v1045_v46, %v1044_v16 }
 0x53f   :  { %v4847_v3 = vadd.f32 %v4846_v52, %v4845_v7  ;;  %v1042_v1 = vmul.f32 0.2, %v1028_v36  ;;  %vm1038_vm14 = vcmp.gt.f32.partialorder %v1028_v36, 0.0 }
 0x540   :  { %5180 = vmatprep.mubr.msk.bf16.mxu0 %vm1082_vm13, %v1056_v26 }
 0x541   :  { %v1033_v2 = vadd.f32 %v4847_v3, %v4654_v5  ;;  %v1046_v60 = vsel %vm1038_vm14, %v1028_v36, %v1042_v1 }
 0x543   :  { %vm1039_vm15 = vcmp.gt.f32.partialorder %v1033_v2, 0.0  ;;  %v1043_v62 = vmul.f32 0.2, %v1033_v2 }
 0x545   :  { %v1047_v42 = vsel %vm1039_vm15, %v1033_v2, %v1043_v62 }
 0x546   :  { %v1057_v40 = vpack.c.bf16 %v1047_v42, %v1046_v60 }
 0x548   :  { %5181 = vmatmul.mubr.msk.bf16.vlgmr.msra.gmra.mxu0 %vm1082_vm13, %v1057_v40 }
 0x549   :  { %1189 = vmatpush1.msra.mxu0 %v5850_v8  ;;  %1222 = vmatprep.mubr.f32.mxu0 %v7337_v0 }
 0x608   :  { %v5182_v9 = vpop.f32.mrf.mxu0 }
 0x60a   :  { %v1123_v10 = vpop.f32.mrf.mxu0 }
 0x60b   :  { %1142 = vrot.lane.b32.xlu0 %v1123_v10, %s5717_s30 }
 0x60c   :  { %v5183_v52 = vpop.f32.mrf.mxu0 }
 0x60d   :  { %v1561_v26 = vpack.c.bf16 %v5183_v52, %v5182_v9 }
 0x60e   :  { %v1126_v46 = vpop.f32.mrf.mxu0 }
 0x60f   :  { %1146 = vrot.lane.b32.xlu0 %v5182_v9, %s5717_s30  ;;  %5184 = vmatprep.subr.bf16.mxu0 %v1561_v26  ;;  %v1560_v40 = vpack.c.bf16 %v1126_v46, %v1123_v10 }
 0x610   :  { %1144 = vrot.lane.b32.xlu1 %v1126_v46, %s5717_s30 }
 0x613   :  { %1273 = vrot.lane.b32.xlu0 %v1123_v10, %s5712_s20 }
 0x614   :  { %1148 = vrot.lane.b32.xlu1 %v5183_v52, %s5717_s30 }
 0x617   :  { %1277 = vrot.lane.b32.xlu0 %v5182_v9, %s5712_s20 }
 0x618   :  { %1275 = vrot.lane.b32.xlu1 %v1126_v46, %s5712_s20 }
 0x61c   :  { %1279 = vrot.lane.b32.xlu1 %v5183_v52, %s5712_s20 }
 0x67d   :  { %v1143_v8 = vpop.permute.xlu0 %1142 }
 0x67e   :  { %4661 = vmatmul.mubr.msk.f32.vlgmr.msra.gmra.mxu0 %vm289_vm1, %v1143_v8 }
 0x67f   :  { %5185 = vmatpush3.bf16.msra.mxu0 %v1561_v26  ;;  %1228 = vmatprep.mubr.f32.mxu0 %v7337_v0 }
 0x680   :  { %5186 = vmatprep.subr.bf16.mxu0 %v1560_v40 }
 0x681   :  { %v1147_v36 = vpop.permute.xlu0 %1146 }
 0x682   :  { %v1145_v16 = vpop.permute.xlu1 %1144 }
 0x683   :  { %4662 = vmatmul.mubr.msk.f32.gmra.mxu0 %vm289_vm1, %v1145_v16 }
 0x684   :  { %5187 = vmatpush3.bf16.msra.mxu0 %v1560_v40  ;;  %1234 = vmatprep.mubr.f32.mxu0 %v7337_v0 }
 0x685   :  { %v1274_v5 = vpop.permute.xlu0 %1273  ;;  %2177 = vmatprep.subr.mxu0 %v6280_v43 }
 0x686   :  { %v1149_v48 = vpop.permute.xlu1 %1148  ;;  %4665 = vmatmul.mubr.msk.f32.vlgmr.msra.gmra.mxu1 %vm289_vm1, %v1274_v5 }
 0x687   :  { %4663 = vmatmul.mubr.msk.f32.gmra.mxu0 %vm289_vm1, %v1147_v36  ;;  %1359 = vmatprep.mubr.f32.mxu1 %v7337_v0 }
 0x688   :  { %1240 = vmatprep.mubr.f32.mxu0 %v7337_v0 }
 0x689   :  { %v1278_v63 = vpop.permute.xlu0 %1277 }
 0x68a   :  { %v1276_v61 = vpop.permute.xlu1 %1275 }
 0x68b   :  { %4664 = vmatmul.mubr.msk.f32.gmra.mxu0 %vm289_vm1, %v1149_v48  ;;  %4666 = vmatmul.mubr.msk.f32.gmra.mxu1 %vm289_vm1, %v1276_v61 }
 0x68c   :  { %1365 = vmatprep.mubr.f32.mxu1 %v7337_v0 }
 0x68e   :  { %v1280_v7 = vpop.permute.xlu1 %1279 }
 0x68f   :  { %4667 = vmatmul.mubr.msk.f32.gmra.mxu1 %vm289_vm1, %v1278_v63 }
 0x690   :  { %1371 = vmatprep.mubr.f32.mxu1 %v7337_v0 }
 0x693   :  { %4668 = vmatmul.mubr.msk.f32.gmra.mxu1 %vm289_vm1, %v1280_v7 }
 0x694   :  { %1874 = vmatprep.mubr.f32.mxu1 %v5885_v24 }
 0x73e   :  { %v1224_v3 = vpop.f32.mrf.mxu0 }
 0x73f   :  { %v1247_v10 = vmul.f32 %v1224_v3, %v5891_v28 }
 0x740   :  { %v1226_v1 = vpop.f32.mrf.mxu0 }
 0x741   :  { %v1248_v40 = vmul.f32 %v1226_v1, %v5885_v24 }
 0x743   :  { %v1230_v2 = vpop.f32.mrf.mxu0 }
 0x744   :  { %v1249_v60 = vmul.f32 %v1230_v2, %v5896_v30 }
 0x745   :  { %v1232_v62 = vpop.f32.mrf.mxu0 }
 0x746   :  { %v1355_v42 = vpop.f32.mrf.mxu1  ;;  %v1250_v52 = vmul.f32 %v1232_v62, %v5906_v34  ;;  %v1255_v36 = vadd.f32 %v1249_v60, %v1247_v10 }
 0x747   :  { %v1236_v9 = vpop.f32.mrf.mxu0 }
 0x748   :  { %v1251_v26 = vmul.f32 %v1236_v9, %v5901_v31  ;;  %v1357_v46 = vpop.f32.mrf.mxu1  ;;  %v1264_v48 = vadd.f32 %v1250_v52, %v1248_v40 }
 0x749   :  { %v1238_v8 = vpop.f32.mrf.mxu0 }
 0x74a   :  { %v1252_v16 = vmul.f32 %v1238_v8, %v5913_v37  ;;  %v1256_v61 = vadd.f32 %v1255_v36, %v1251_v26 }
 0x74b   :  { %v1242_v5 = vpop.f32.mrf.mxu0  ;;  %v1361_v63 = vpop.f32.mrf.mxu1 }
 0x74c   :  { %v1253_v30 = vmul.f32 %v1242_v5, %v5918_v38  ;;  %v1265_v2 = vadd.f32 %v1264_v48, %v1252_v16 }
 0x74d   :  { %v1244_v7 = vpop.f32.mrf.mxu0  ;;  %v1363_v62 = vpop.f32.mrf.mxu1 }
 0x74e   :  { %v1257_v28 = vadd.f32 %v1256_v61, %v1253_v30  ;;  %v1254_v34 = vmul.f32 %v1244_v7, %v5926_v44 }
 0x74f   :  { %v1367_v60 = vpop.f32.mrf.mxu1 }
 0x750   :  { %v1258_v3 = vrot.slane %v1257_v28, 4  ;;  %v1266_v31 = vadd.f32 %v1265_v2, %v1254_v34 }
 0x751   :  { %v1369_v8 = vpop.f32.mrf.mxu1 }
 0x752   :  { %v1259_v9 = vadd.f32 %v1258_v3, %v1257_v28  ;;  %v1267_v43 = vrot.slane %v1266_v31, 4 }
 0x753   :  { %v1373_v44 = vpop.f32.mrf.mxu1 }
 0x754   :  { %v1260_v24 = vrot.slane %v1259_v9, 2  ;;  %v1268_v1 = vadd.f32 %v1267_v43, %v1266_v31 }
 0x756   :  { %v1261_v37 = vadd.f32 %v1260_v24, %v1259_v9  ;;  %v1269_v10 = vrot.slane %v1268_v1, 2 }
 0x758   :  { %v1262_v52 = vrot.slane %v1261_v37, 1  ;;  %v1270_v26 = vadd.f32 %v1269_v10, %v1268_v1 }
 0x75a   :  { %v1263_v38 = vadd.f32 %v1262_v52, %v1261_v37  ;;  %v1271_v40 = vrot.slane %v1270_v26, 1 }
 0x75c   :  { %v1362_v36 = vadd.f32 %v1361_v63, %v1263_v38  ;;  %v1272_v16 = vadd.f32 %v1271_v40, %v1270_v26  ;;  %v1356_v5 = vadd.f32 %v1355_v42, %v1263_v38  ;;  %v1368_v48 = vadd.f32 %v1367_v60, %v1263_v38 }
 0x75d   :  { %v1374_v61 = vadd.f32 %v1373_v44, %v1263_v38 }
 0x75e   :  { %vm1380_vm0 = vcmp.gt.f32.partialorder %v1362_v36, 0.0  ;;  %v1388_v30 = vmul.f32 0.2, %v1362_v36  ;;  %v1364_v7 = vadd.f32 %v1363_v62, %v1272_v16  ;;  %vm1378_vm2 = vcmp.gt.f32.partialorder %v1356_v5, 0.0  ;;  %v1375_v62 = vpop.f32.mrf.mxu1 }
 0x75f   :  { %vm1382_vm3 = vcmp.gt.f32.partialorder %v1368_v48, 0.0  ;;  %v1386_v43 = vmul.f32 0.2, %v1356_v5  ;;  %v1390_v2 = vmul.f32 0.2, %v1368_v48  ;;  %v1358_v28 = vadd.f32 %v1357_v46, %v1272_v16 }
 0x760   :  { %v1370_v34 = vadd.f32 %v1369_v8, %v1272_v16  ;;  %v1396_v3 = vsel %vm1380_vm0, %v1362_v36, %v1388_v30  ;;  %v1389_v31 = vmul.f32 0.2, %v1364_v7  ;;  %vm1381_vm4 = vcmp.gt.f32.partialorder %v1364_v7, 0.0 }
 0x761   :  { %v1394_v9 = vsel %vm1378_vm2, %v1356_v5, %v1386_v43  ;;  %v1398_v24 = vsel %vm1382_vm3, %v1368_v48, %v1390_v2  ;;  %vm1379_vm5 = vcmp.gt.f32.partialorder %v1358_v28, 0.0  ;;  %v1387_v1 = vmul.f32 0.2, %v1358_v28 }
 0x762   :  { %v1402_v63 = vadd.f32 %v1394_v9, %v5934_v21  ;;  %vm1383_vm6 = vcmp.gt.f32.partialorder %v1370_v34, 0.0  ;;  %v1406_v42 = vadd.f32 %v1398_v24, %v5939_v25  ;;  %v1391_v60 = vmul.f32 0.2, %v1370_v34 }
 0x763   :  { %vm1384_vm7 = vcmp.gt.f32.partialorder %v1374_v61, 0.0  ;;  %v1392_v37 = vmul.f32 0.2, %v1374_v61  ;;  %v1376_v10 = vadd.f32 %v1375_v62, %v1272_v16  ;;  %v1404_v46 = vadd.f32 %v1396_v3, %v5949_v33 }
 0x764   :  { %v1397_v52 = vsel %vm1381_vm4, %v1364_v7, %v1389_v31  ;;  %v1395_v26 = vsel %vm1379_vm5, %v1358_v28, %v1387_v1  ;;  %v1399_v8 = vsel %vm1383_vm6, %v1370_v34, %v1391_v60  ;;  %v1410_v36 = vmax.f32 %v1402_v63, %v1406_v42 }
 0x765   :  { %v1403_v38 = vadd.f32 %v1395_v26, %v5944_v29  ;;  %v1407_v40 = vadd.f32 %v1399_v8, %v5957_v41  ;;  %v1400_v21 = vsel %vm1384_vm7, %v1374_v61, %v1392_v37  ;;  %vm1385_vm8 = vcmp.gt.f32.partialorder %v1376_v10, 0.0 }
 0x766   :  { %v1408_v25 = vadd.f32 %v1400_v21, %v5967_v47  ;;  %v1393_v5 = vmul.f32 0.2, %v1376_v10  ;;  %v1405_v48 = vadd.f32 %v1397_v52, %v5962_v45 }
 0x767   :  { %v1419_v16 = vmax.f32 %v1403_v38, %v1407_v40 }
 0x768   :  { %v1411_v44 = vmax.f32 %v1404_v46, %v1408_v25  ;;  %v1401_v30 = vsel %vm1385_vm8, %v1376_v10, %v1393_v5 }
 0x769   :  { %v1409_v33 = vadd.f32 %v1401_v30, %v5975_v55 }
 0x76a   :  { %v1412_v7 = vmax.f32 %v1410_v36, %v1411_v44 }
 0x76b   :  { %v1420_v43 = vmax.f32 %v1405_v48, %v1409_v33 }
 0x76c   :  { %v1413_v2 = vrot.slane %v1412_v7, 4 }
 0x76d   :  { %v1421_v28 = vmax.f32 %v1419_v16, %v1420_v43 }
 0x76e   :  { %v1414_v29 = vmax.f32 %v1412_v7, %v1413_v2 }
 0x76f   :  { %v1422_v34 = vrot.slane %v1421_v28, 4 }
 0x770   :  { %v1415_v41 = vrot.slane %v1414_v29, 2 }
 0x771   :  { %v1423_v61 = vmax.f32 %v1421_v28, %v1422_v34 }
 0x772   :  { %v1416_v3 = vmax.f32 %v1414_v29, %v1415_v41 }
 0x773   :  { %v1424_v31 = vrot.slane %v1423_v61, 2 }
 0x774   :  { %v1417_v9 = vrot.slane %v1416_v3, 1 }
 0x775   :  { %v1425_v47 = vmax.f32 %v1423_v61, %v1424_v31 }
 0x776   :  { %v1418_v24 = vmax.f32 %v1416_v3, %v1417_v9 }
 0x777   :  { %v1426_v1 = vrot.slane %v1425_v47, 1 }
 0x778   :  { %v1430_v45 = vsub.f32 %v1404_v46, %v1418_v24  ;;  %v1428_v62 = vsub.f32 %v1402_v63, %v1418_v24  ;;  %v1432_v10 = vsub.f32 %v1406_v42, %v1418_v24  ;;  %v1434_v21 = vsub.f32 %v1408_v25, %v1418_v24 }
 0x779   :  { %v1427_v60 = vmax.f32 %v1425_v47, %v1426_v1 }
 0x77a   :  { %v1440_v55 = vmul.f32 1.442695, %v1430_v45  ;;  %v1436_v36 = vmul.f32 1.442695, %v1428_v62  ;;  %v1444_v30 = vmul.f32 1.442695, %v1432_v10 }
 0x77b   :  { %v1431_v37 = vsub.f32 %v1405_v48, %v1427_v60  ;;  %v1429_v52 = vsub.f32 %v1403_v38, %v1427_v60  ;;  %v1433_v26 = vsub.f32 %v1407_v40, %v1427_v60  ;;  %v1435_v5 = vsub.f32 %v1409_v33, %v1427_v60 }
 0x77c   :  { %5432 = vpow2.f32 %v1440_v55  ;;  %v1448_v7 = vmul.f32 1.442695, %v1434_v21 }
 0x77d   :  { %v1442_v8 = vmul.f32 1.442695, %v1431_v37  ;;  %v1438_v44 = vmul.f32 1.442695, %v1429_v52  ;;  %v1446_v16 = vmul.f32 1.442695, %v1433_v26 }
 0x77e   :  { %v1450_v43 = vmul.f32 1.442695, %v1435_v5 }
 0x77f   :  { %5434 = vpow2.f32 %v1442_v8 }
 0x780   :  { %5436 = vpow2.f32 %v1436_v36 }
 0x781   :  { %5438 = vpow2.f32 %v1438_v44 }
 0x782   :  { %5440 = vpow2.f32 %v1444_v30 }
 0x783   :  { %5442 = vpow2.f32 %v1446_v16 }
 0x784   :  { %5444 = vpow2.f32 %v1448_v7 }
 0x785   :  { %5446 = vpow2.f32 %v1450_v43 }
 0x789   :  { %v5433_v63 = vpop.eup %5432 }
 0x78c   :  { %v5435_v42 = vpop.eup %5434 }
 0x78d   :  { %v5437_v46 = vpop.eup %5436 }
 0x78e   :  { %v5439_v38 = vpop.eup %5438  ;;  %v1452_v40 = vadd.f32 %v5437_v46, %v5433_v63 }
 0x78f   :  { %v5441_v25 = vpop.eup %5440  ;;  %v1461_v48 = vadd.f32 %v5439_v38, %v5435_v42 }
 0x790   :  { %v5443_v33 = vpop.eup %5442  ;;  %v1453_v2 = vadd.f32 %v5441_v25, %v1452_v40 }
 0x791   :  { %v5445_v28 = vpop.eup %5444  ;;  %v1462_v29 = vadd.f32 %v5443_v33, %v1461_v48 }
 0x792   :  { %v5447_v34 = vpop.eup %5446  ;;  %v1454_v41 = vadd.f32 %v5445_v28, %v1453_v2 }
 0x793   :  { %v1463_v61 = vadd.f32 %v5447_v34, %v1462_v29 }
 0x794   :  { %v1455_v3 = vrot.slane %v1454_v41, 4 }
 0x795   :  { %v1464_v31 = vrot.slane %v1463_v61, 4 }
 0x796   :  { %v1456_v9 = vadd.f32 %v1455_v3, %v1454_v41 }
 0x797   :  { %v1465_v47 = vadd.f32 %v1464_v31, %v1463_v61 }
 0x798   :  { %v1457_v24 = vrot.slane %v1456_v9, 2 }
 0x799   :  { %v1466_v1 = vrot.slane %v1465_v47, 2 }
 0x79a   :  { %v1458_v45 = vadd.f32 %v1457_v24, %v1456_v9 }
 0x79b   :  { %v1467_v60 = vadd.f32 %v1466_v1, %v1465_v47 }
 0x79c   :  { %v1459_v62 = vrot.slane %v1458_v45, 1 }
 0x79d   :  { %v1468_v37 = vrot.slane %v1467_v60, 1 }
 0x79e   :  { %v1460_v10 = vadd.f32 %v1459_v62, %v1458_v45 }
 0x79f   :  { %v1469_v55 = vadd.f32 %v1468_v37, %v1467_v60 }
 0x7a0   :  { %5448 = vrcp.f32 %v1460_v10 }
 0x7a1   :  { %5450 = vrcp.f32 %v1469_v55 }
 0x7ad   :  { %v5449_v52 = vpop.eup %5448 }
 0x7ae   :  { %v5451_v26 = vpop.eup %5450  ;;  %v1472_v8 = vmul.f32 %v5449_v52, %v5437_v46  ;;  %v1474_v36 = vmul.f32 %v5449_v52, %v5433_v63  ;;  %v1476_v44 = vmul.f32 %v5449_v52, %v5441_v25  ;;  %v1478_v16 = vmul.f32 %v5449_v52, %v5445_v28 }
 0x7af   :  { %v1473_v21 = vmul.f32 %v5451_v26, %v5439_v38  ;;  %v1475_v5 = vmul.f32 %v5451_v26, %v5435_v42  ;;  %v1477_v30 = vmul.f32 %v5451_v26, %v5443_v33  ;;  %v1479_v7 = vmul.f32 %v5451_v26, %v5447_v34  ;;  %v6315_v33 = vld [vmem:[%s7274_s2] sm:$0xff] }
 0x7b0   :  { %1480 = vxpose.xlu0.b32.start [1/4] (short) %v1472_v8, 128  ;;  %7339 = vst [vmem:[#allocation20_spill] sm:$0xff] %v6315_v33 }
 0x7b1   :  { %1512 = vxpose.xlu1.b32.start [1/4] (short) %v1473_v21, 128 }
 0x7b4   :  { %1481 = vxpose.xlu0.b32.cont [2/4] (short) %v1474_v36, 128 }
 0x7b5   :  { %1513 = vxpose.xlu1.b32.cont [2/4] (short) %v1475_v5, 128 }
 0x7b8   :  { %1482 = vxpose.xlu0.b32.cont [3/4] (short) %v1476_v44, 128 }
 0x7b9   :  { %1514 = vxpose.xlu1.b32.cont [3/4] (short) %v1477_v30, 128 }
 0x7bc   :  { %1483 = vxpose.xlu0.b32.end [4/4] (short) %v1478_v16, 128 }
 0x7bd   :  { %1515 = vxpose.xlu1.b32.end [4/4] (short) %v1479_v7, 128 }
 0x82c   :  { %v1496_v43 = vpop.trf.xlu0 }
 0x82d   :  { %v1528_v40 = vpop.trf.xlu1 }
 0x830   :  { %v1497_v48 = vpop.trf.xlu0 }
 0x831   :  { %v1544_v2 = vpack.c.bf16 %v1497_v48, %v1496_v43  ;;  %v1529_v46 = vpop.trf.xlu1 }
 0x832   :  { %v1552_v7 = vpack.c.bf16 %v1529_v46, %v1528_v40 }
 0x833   :  { %5188 = vmatprep.mubr.msk.bf16.mxu0 %vm702_vm10, %v1544_v2 }
 0x834   :  { %v1498_v38 = vpop.trf.xlu0 }
 0x835   :  { %v1530_v42 = vpop.trf.xlu1 }
 0x838   :  { %v1499_v63 = vpop.trf.xlu0 }
 0x839   :  { %v1545_v29 = vpack.c.bf16 %v1499_v63, %v1498_v38  ;;  %v1531_v28 = vpop.trf.xlu1 }
 0x83a   :  { %v1553_v48 = vpack.c.bf16 %v1531_v28, %v1530_v42 }
 0x83b   :  { %5189 = vmatmul.mubr.msk.bf16.vlgmr.msra.gmra.mxu0 %vm702_vm10, %v1545_v29 }
 0x83c   :  { %v1500_v25 = vpop.trf.xlu0  ;;  %2178 = vmatpush1.msra.mxu0 %v6315_v33 }
 0x83d   :  { %v1532_v3 = vpop.trf.xlu1 }
 0x840   :  { %v1501_v34 = vpop.trf.xlu0 }
 0x841   :  { %v1546_v41 = vpack.c.bf16 %v1501_v34, %v1500_v25  ;;  %v1533_v47 = vpop.trf.xlu1 }
 0x842   :  { %v1554_v2 = vpack.c.bf16 %v1533_v47, %v1532_v3 }
 0x843   :  { %5192 = vmatprep.mubr.msk.bf16.mxu0 %vm702_vm10, %v1546_v41 }
 0x844   :  { %v1502_v61 = vpop.trf.xlu0 }
 0x845   :  { %v1534_v45 = vpop.trf.xlu1 }
 0x848   :  { %v1503_v31 = vpop.trf.xlu0 }
 0x849   :  { %v1547_v9 = vpack.c.bf16 %v1503_v31, %v1502_v61  ;;  %v1535_v37 = vpop.trf.xlu1 }
 0x84a   :  { %v1555_v63 = vpack.c.bf16 %v1535_v37, %v1534_v45 }
 0x84b   :  { %5193 = vmatmul.mubr.msk.bf16.gmra.mxu0 %vm702_vm10, %v1547_v9 }
 0x84c   :  { %v1504_v24 = vpop.trf.xlu0 }
 0x84d   :  { %v1536_v26 = vpop.trf.xlu1 }
 0x850   :  { %v1505_v1 = vpop.trf.xlu0 }
 0x851   :  { %v1548_v60 = vpack.c.bf16 %v1505_v1, %v1504_v24  ;;  %v1537_v36 = vpop.trf.xlu1 }
 0x852   :  { %v1556_v29 = vpack.c.bf16 %v1537_v36, %v1536_v26 }
 0x853   :  { %5196 = vmatprep.mubr.msk.bf16.mxu0 %vm702_vm10, %v1548_v60 }
 0x854   :  { %v1506_v62 = vpop.trf.xlu0 }
 0x855   :  { %v1538_v30 = vpop.trf.xlu1 }
 0x858   :  { %v1507_v10 = vpop.trf.xlu0 }
 0x859   :  { %v1549_v55 = vpack.c.bf16 %v1507_v10, %v1506_v62  ;;  %v1539_v43 = vpop.trf.xlu1 }
 0x85a   :  { %v1557_v46 = vpack.c.bf16 %v1539_v43, %v1538_v30 }
 0x85b   :  { %5197 = vmatmul.mubr.msk.bf16.gmra.mxu0 %vm702_vm10, %v1549_v55 }
 0x85c   :  { %v1508_v52 = vpop.trf.xlu0 }
 0x85d   :  { %v1540_v38 = vpop.trf.xlu1 }
 0x860   :  { %v1509_v8 = vpop.trf.xlu0 }
 0x861   :  { %v1550_v21 = vpack.c.bf16 %v1509_v8, %v1508_v52  ;;  %v1541_v25 = vpop.trf.xlu1 }
 0x862   :  { %v1558_v34 = vpack.c.bf16 %v1541_v25, %v1540_v38 }
 0x863   :  { %5200 = vmatprep.mubr.msk.bf16.mxu0 %vm702_vm10, %v1550_v21 }
 0x864   :  { %v1510_v5 = vpop.trf.xlu0 }
 0x865   :  { %v1542_v40 = vpop.trf.xlu1 }
 0x868   :  { %v1511_v44 = vpop.trf.xlu0 }
 0x869   :  { %v1551_v16 = vpack.c.bf16 %v1511_v44, %v1510_v5  ;;  %v1543_v42 = vpop.trf.xlu1 }
 0x86a   :  { %v1559_v28 = vpack.c.bf16 %v1543_v42, %v1542_v40 }
 0x86b   :  { %5201 = vmatmul.mubr.msk.bf16.gmra.mxu0 %vm702_vm10, %v1551_v16 }
 0x86c   :  { %5204 = vmatprep.mubr.msk.bf16.mxu0 %vm702_vm10, %v1552_v7 }
 0x873   :  { %5205 = vmatmul.mubr.msk.bf16.gmra.mxu0 %vm702_vm10, %v1553_v48 }
 0x874   :  { %5208 = vmatprep.mubr.msk.bf16.mxu0 %vm702_vm10, %v1554_v2 }
 0x87b   :  { %5209 = vmatmul.mubr.msk.bf16.gmra.mxu0 %vm702_vm10, %v1555_v63 }
 0x87c   :  { %5212 = vmatprep.mubr.msk.bf16.mxu0 %vm702_vm10, %v1556_v29 }
 0x883   :  { %5213 = vmatmul.mubr.msk.bf16.gmra.mxu0 %vm702_vm10, %v1557_v46 }
 0x884   :  { %5216 = vmatprep.mubr.msk.bf16.mxu0 %vm702_vm10, %v1558_v34 }
 0x88b   :  { %5217 = vmatmul.mubr.msk.bf16.gmra.mxu0 %vm702_vm10, %v1559_v28 }
 0x88c   :  { %2211 = vmatprep.mubr.f32.mxu0 %v7337_v0 }
 0x8fb   :  { %v6333_v41 = vpop.f32.mrf.mxu0 }
 0x8fd   :  { %v6335_v61 = vpop.f32.mrf.mxu0 }
 0x8fe   :  { %7340 = vst [vmem:[#allocation21_spill] sm:$0xff] %v6335_v61 }
 0x8ff   :  { %v6337_v3 = vpop.f32.mrf.mxu0 }
 0x901   :  { %v6339_v31 = vpop.f32.mrf.mxu0 }
 0x90b   :  { %v6341_v9 = vpop.f32.mrf.mxu0 }
 0x90d   :  { %v6343_v47 = vpop.f32.mrf.mxu0 }
 0x90f   :  { %v5195_v24 = vpop.f32.mrf.mxu0 }
 0x911   :  { %v6345_v1 = vpop.f32.mrf.mxu0 }
 0x91b   :  { %v5198_v45 = vpop.f32.mrf.mxu0 }
 0x91d   :  { %v1676_v60 = vpop.f32.mrf.mxu0 }
 0x91f   :  { %v5199_v62 = vpop.f32.mrf.mxu0 }
 0x921   :  { %v1679_v37 = vpop.f32.mrf.mxu0 }
 0x92b   :  { %v5202_v10 = vpop.f32.mrf.mxu0 }
 0x92c   :  { %v1785_v28 = vmul.f32 %v5202_v10, %v6048_v17  ;;  %v5401_v10 = vld [vmem:[%s7283_s11 + $0x10] sm:$0xff]  }
 0x92d   :  { %v1692_v55 = vpop.f32.mrf.mxu0 }
 0x92f   :  { %v5203_v52 = vpop.f32.mrf.mxu0 }
 0x930   :  { %v1786_v46 = vmul.f32 %v5203_v52, %v6038_v14  ;;  %v5403_v52 = vld [vmem:[%s7283_s11] sm:$0xff]  }
 0x931   :  { %v1695_v26 = vpop.f32.mrf.mxu0 }
 0x932   :  { %v1784_v33 = vmul.f32 %v1695_v26, %v6060_v23  ;;  %v7348_v26 = vld [vmem:[#allocation19_spill] sm:$0xff] }
 0x933   :  { %v6347_v8 = vpop.f32.mrf.mxu0 }
 0x935   :  { %v6349_v21 = vpop.f32.mrf.mxu0 }
 0x937   :  { %v5207_v36 = vpop.f32.mrf.mxu0 }
 0x939   :  { %v6351_v5 = vpop.f32.mrf.mxu0 }
 0x93b   :  { %v5210_v44 = vpop.f32.mrf.mxu0 }
 0x93d   :  { %v1724_v30 = vpop.f32.mrf.mxu0 }
 0x93f   :  { %v5211_v16 = vpop.f32.mrf.mxu0 }
 0x941   :  { %v1727_v7 = vpop.f32.mrf.mxu0 }
 0x943   :  { %v5214_v43 = vpop.f32.mrf.mxu0 }
 0x944   :  { %v1797_v17 = vmul.f32 %v5214_v43, %v6091_v59  ;;  %v1778_v59 = vmul.f32 %v5195_v24, %v6132_v4  ;;  %v1790_v4 = vmul.f32 %v5207_v36, %v6181_v49  ;;  %v6410_v24 = vld [vmem:[%s7275_s3 + $0x10] sm:$0xff] }
 0x945   :  { %v1740_v48 = vpop.f32.mrf.mxu0 }
 0x947   :  { %v5215_v2 = vpop.f32.mrf.mxu0 }
 0x948   :  { %v1798_v14 = vmul.f32 %v5215_v2, %v6079_v56  ;;  %v1779_v56 = vmul.f32 %v1676_v60, %v6120_v6  ;;  %v1791_v6 = vmul.f32 %v1724_v30, %v6167_v39  ;;  %v7343_v39 = vld [vmem:[#allocation15_spill] sm:$0xff] }
 0x949   :  { %v1743_v38 = vpop.f32.mrf.mxu0  ;;  %v6428_v60 = vld [vmem:[%s7275_s3 + $0x38] sm:$0xff] }
 0x94a   :  { %v1796_v23 = vmul.f32 %v1743_v38, %v6103_v57  ;;  %v1777_v57 = vmul.f32 %v6341_v9, %v6145_v22  ;;  %v7341_v22 = vld [vmem:[#allocation13_spill] sm:$0xff] }
 0x94b   :  { %v5218_v63 = vpop.f32.mrf.mxu0  ;;  %v7347_v9 = vld [vmem:[#allocation21_spill] sm:$0xff] }
 0x94c   :  { %v1801_v42 = vmul.f32 %v5218_v63, %v6043_v15  ;;  %v1782_v15 = vmul.f32 %v5199_v62, %v6084_v11  ;;  %v1794_v11 = vmul.f32 %v5211_v16, %v6127_v50  ;;  %v1775_v50 = vmul.f32 %v6343_v47, %v6172_v58  ;;  %v7344_v58 = vld [vmem:[#allocation16_spill] sm:$0xff]  ;;  %v6434_v62 = vld [vmem:[%s7275_s3 + $0x30] sm:$0xff] }
 0x94d   :  { %v1756_v29 = vpop.f32.mrf.mxu0  ;;  %v1772_v49 = vmul.f32 %v6339_v31, %v7344_v58  ;;  %v6404_v31 = vld [vmem:[%s7275_s3 + $0x18] sm:$0xff] }
 0x94e   :  { %v1799_v61 = vmul.f32 %v1756_v29, %v6067_v32  ;;  %v1780_v32 = vmul.f32 %v1679_v37, %v6108_v12  ;;  %v1792_v12 = vmul.f32 %v1727_v7, %v6153_v51  ;;  %v1789_v51 = vmul.f32 %v6347_v8, %v7341_v22  ;;  %v5400_v37 = vld [vmem:[%s7283_s11 + $0x18] sm:$0xff]  }
 0x94f   :  { %v5219_v25 = vpop.f32.mrf.mxu0 }
 0x950   :  { %v1802_v40 = vmul.f32 %v5219_v25, %v6033_v13  ;;  %v1783_v13 = vmul.f32 %v1692_v55, %v6072_v35  ;;  %v1795_v35 = vmul.f32 %v1740_v48, %v6115_v53  ;;  %v1776_v53 = vmul.f32 %v6345_v1, %v6158_v27  ;;  %v7342_v27 = vld [vmem:[#allocation14_spill] sm:$0xff]  ;;  %v6416_v1 = vld [vmem:[%s7275_s3 + $0x28] sm:$0xff] }
 0x951   :  { %v1759_v34 = vpop.f32.mrf.mxu0  ;;  %v5402_v55 = vld [vmem:[%s7283_s11 + $0x8] sm:$0xff]  }
 0x952   :  { %4872 = vmatprep.subr.mxu1 %v1802_v40  ;;  %v1800_v0 = vmul.f32 %v1759_v34, %v6055_v20  ;;  %v1781_v20 = vmul.f32 %v5198_v45, %v6096_v19  ;;  %v1793_v19 = vmul.f32 %v5210_v44, %v6140_v54  ;;  %v1774_v54 = vmul.f32 %v6337_v3, %v6186_v18  ;;  %v7346_v3 = vld [vmem:[#allocation18_spill] sm:$0xff]  ;;  %v6422_v45 = vld [vmem:[%s7275_s3 + $0x20] sm:$0xff] }
 0x953   :  { %4873 = vmatpush3.msra.mxu1 %v1786_v46  ;;  %v1771_v47 = vmul.f32 %v7347_v9, %v7346_v3 }
 0x954   :  { %4874 = vmatprep.subr.mxu1 %v1801_v42 }
 0x955   :  { %4875 = vmatpush3.msra.mxu1 %v1785_v28 }
 0x956   :  { %4876 = vmatprep.subr.mxu1 %v1800_v0  ;;  %v1773_v0 = vmul.f32 %v6333_v41, %v7342_v27  ;;  %v6398_v41 = vld [vmem:[%s7275_s3] sm:$0xff] }
 0x957   :  { %4877 = vmatpush3.msra.mxu1 %v1784_v33  ;;  %v1788_v33 = vmul.f32 %v6351_v5, %v7343_v39  ;;  %v6483_v39 = vld [vmem:[%s7275_s3 + $0x8] sm:$0xff] }
 0x958   :  { %4878 = vmatprep.subr.mxu1 %v1799_v61  ;;  %v7345_v61 = vld [vmem:[#allocation17_spill] sm:$0xff] }
 0x959   :  { %4879 = vmatpush3.msra.mxu1 %v1783_v13  ;;  %v1787_v18 = vmul.f32 %v6349_v21, %v7345_v61  ;;  %v4685_v21 = vld [vmem:[%s7282_s10] ss:$0 sm:$0xff] }
 0x95a   :  { %4880 = vmatprep.subr.mxu1 %v1798_v14 }
 0x95b   :  { %4881 = vmatpush3.msra.mxu1 %v1782_v15 }
 0x95c   :  { %4882 = vmatprep.subr.mxu1 %v1797_v17 }
 0x95d   :  { %4883 = vmatpush3.msra.mxu1 %v1781_v20 }
 0x95e   :  { %4884 = vmatprep.subr.mxu1 %v1796_v23 }
 0x95f   :  { %4885 = vmatpush3.msra.mxu1 %v1780_v32 }
 0x960   :  { %4886 = vmatprep.subr.mxu1 %v1795_v35  ;;  %v7349_v35 = vld [vmem:[#allocation20_spill] sm:$0xff] }
 0x961   :  { %4887 = vmatpush3.msra.mxu1 %v1779_v56  ;;  %v7350_v56 = vmov 0.0  }
 0x962   :  { %4888 = vmatprep.subr.mxu1 %v1794_v11 }
 0x963   :  { %4889 = vmatpush3.msra.mxu1 %v1778_v59 }
 0x964   :  { %4890 = vmatprep.subr.mxu1 %v1793_v19 }
 0x965   :  { %4891 = vmatpush3.msra.mxu1 %v1777_v57 }
 0x966   :  { %4892 = vmatprep.subr.mxu1 %v1792_v12 }
 0x967   :  { %4893 = vmatpush3.msra.mxu1 %v1776_v53 }
 0x968   :  { %4894 = vmatprep.subr.mxu1 %v1791_v6 }
 0x969   :  { %4895 = vmatpush3.msra.mxu1 %v1775_v50 }
 0x96a   :  { %4896 = vmatprep.subr.mxu1 %v1790_v4 }
 0x96b   :  { %4897 = vmatpush3.msra.mxu1 %v1774_v54 }
 0x96c   :  { %4898 = vmatprep.subr.mxu1 %v1789_v51 }
 0x96d   :  { %4899 = vmatpush3.msra.mxu1 %v1773_v0 }
 0x96e   :  { %4900 = vmatprep.subr.mxu1 %v1788_v33 }
 0x96f   :  { %4901 = vmatpush3.msra.mxu1 %v1772_v49 }
 0x970   :  { %4902 = vmatprep.subr.mxu1 %v1787_v18 }
 0x971   :  { %4903 = vmatpush3.msra.mxu1 %v1771_v47 }
 0x972   :  { %1875 = vmatmul.mubr.f32.vlgmr.msra.gmra.mxu1 %v6398_v41  ;;  %5220 = vmatprep.subr.bf16.mxu1 %v5400_v37 }
 0x973   :  { %1879 = vmatprep.mubr.f32.mxu1 %v6404_v31  ;;  %5221 = vmatpush3.bf16.msra.mxu1 %v5400_v37 }
 0x974   :  { %5222 = vmatprep.subr.bf16.mxu1 %v5401_v10 }
 0x976   :  { %1880 = vmatmul.mubr.f32.gmra.mxu1 %v6410_v24 }
 0x977   :  { %1884 = vmatprep.mubr.f32.mxu1 %v6416_v1  ;;  %5223 = vmatpush3.bf16.msra.mxu1 %v5401_v10 }
 0x978   :  { %5224 = vmatprep.subr.bf16.mxu1 %v5402_v55 }
 0x97a   :  { %1885 = vmatmul.mubr.f32.gmra.mxu1 %v6422_v45 }
 0x97b   :  { %1889 = vmatprep.mubr.f32.mxu1 %v6428_v60  ;;  %5225 = vmatpush3.bf16.msra.mxu1 %v5402_v55 }
 0x97c   :  { %5226 = vmatprep.subr.bf16.mxu1 %v5403_v52 }
 0x97e   :  { %1890 = vmatmul.mubr.f32.gmra.mxu1 %v6434_v62 }
 0x97f   :  { %5227 = vmatpush3.bf16.msra.mxu1 %v5403_v52 }
 0x980   :  { %2046 = vmatprep.subr.mxu1 %v7348_v26 }
 0xa32   :  { %v4904_v8 = vpop.f32.mrf.mxu1 }
 0xa34   :  { %v4905_v36 = vpop.f32.mrf.mxu1 }
 0xa35   :  { %v4906_v5 = vadd.f32 %v4905_v36, %v4904_v8 }
 0xa36   :  { %v4907_v44 = vpop.f32.mrf.mxu1 }
 0xa37   :  { %v1877_v30 = vadd.f32 %v4906_v5, %v4685_v21 }
 0xa38   :  { %v4908_v16 = vpop.f32.mrf.mxu1 }
 0xa39   :  { %v4909_v7 = vadd.f32 %v4908_v16, %v4907_v44  ;;  %v1899_v48 = vmul.f32 0.2, %v1877_v30  ;;  %vm1895_vm9 = vcmp.gt.f32.partialorder %v1877_v30, 0.0 }
 0xa3a   :  { %v4910_v43 = vpop.f32.mrf.mxu1 }
 0xa3b   :  { %v1882_v2 = vadd.f32 %v4909_v7, %v4685_v21  ;;  %v1903_v40 = vsel %vm1895_vm9, %v1877_v30, %v1899_v48 }
 0xa3c   :  { %v4911_v38 = vpop.f32.mrf.mxu1 }
 0xa3d   :  { %vm1896_vm11 = vcmp.gt.f32.partialorder %v1882_v2, 0.0  ;;  %v1900_v63 = vmul.f32 0.2, %v1882_v2  ;;  %v4912_v29 = vadd.f32 %v4911_v38, %v4910_v43 }
 0xa3e   :  { %v4913_v25 = vpop.f32.mrf.mxu1 }
 0xa3f   :  { %v1904_v46 = vsel %vm1896_vm11, %v1882_v2, %v1900_v63  ;;  %v1887_v34 = vadd.f32 %v4912_v29, %v4685_v21 }
 0xa40   :  { %v4914_v42 = vpop.f32.mrf.mxu1  ;;  %v1915_v28 = vpack.c.bf16 %v1904_v46, %v1903_v40 }
 0xa41   :  { %v4915_v13 = vadd.f32 %v4914_v42, %v4913_v25  ;;  %v1901_v14 = vmul.f32 0.2, %v1887_v34  ;;  %vm1897_vm12 = vcmp.gt.f32.partialorder %v1887_v34, 0.0 }
 0xa42   :  { %5228 = vmatprep.mubr.msk.bf16.mxu1 %vm1082_vm13, %v1915_v28 }
 0xa43   :  { %v1892_v15 = vadd.f32 %v4915_v13, %v4685_v21  ;;  %v1905_v20 = vsel %vm1897_vm12, %v1887_v34, %v1901_v14 }
 0xa45   :  { %vm1898_vm14 = vcmp.gt.f32.partialorder %v1892_v15, 0.0  ;;  %v1902_v17 = vmul.f32 0.2, %v1892_v15 }
 0xa47   :  { %v1906_v23 = vsel %vm1898_vm14, %v1892_v15, %v1902_v17 }
 0xa48   :  { %v1916_v32 = vpack.c.bf16 %v1906_v23, %v1905_v20 }
 0xa4a   :  { %5229 = vmatmul.mubr.msk.bf16.vlgmr.msra.gmra.mxu1 %vm1082_vm13, %v1916_v32 }
 0xa4b   :  { %2047 = vmatpush1.msra.mxu1 %v7349_v35  ;;  %2080 = vmatprep.mubr.f32.mxu1 %v7350_v56 }
 0xb0a   :  { %v5230_v11 = vpop.f32.mrf.mxu1 }
 0xb0c   :  { %v1981_v59 = vpop.f32.mrf.mxu1 }
 0xb0d   :  { %2000 = vrot.lane.b32.xlu0 %v1981_v59, %s5717_s30 }
 0xb0e   :  { %v5231_v19 = vpop.f32.mrf.mxu1 }
 0xb0f   :  { %v2419_v57 = vpack.c.bf16 %v5231_v19, %v5230_v11 }
 0xb10   :  { %v1984_v12 = vpop.f32.mrf.mxu1 }
 0xb11   :  { %2004 = vrot.lane.b32.xlu0 %v5230_v11, %s5717_s30  ;;  %5232 = vmatprep.subr.bf16.mxu1 %v2419_v57  ;;  %v2418_v6 = vpack.c.bf16 %v1984_v12, %v1981_v59 }
 0xb12   :  { %2002 = vrot.lane.b32.xlu1 %v1984_v12, %s5717_s30 }
 0xb15   :  { %2131 = vrot.lane.b32.xlu0 %v1981_v59, %s5712_s20 }
 0xb16   :  { %2006 = vrot.lane.b32.xlu1 %v5231_v19, %s5717_s30 }
 0xb19   :  { %2135 = vrot.lane.b32.xlu0 %v5230_v11, %s5712_s20 }
 0xb1a   :  { %2133 = vrot.lane.b32.xlu1 %v1984_v12, %s5712_s20 }
 0xb1e   :  { %2137 = vrot.lane.b32.xlu1 %v5231_v19, %s5712_s20 }
 0xb7f   :  { %v2001_v53 = vpop.permute.xlu0 %2000 }
 0xb80   :  { %4692 = vmatmul.mubr.msk.f32.vlgmr.msra.gmra.mxu1 %vm289_vm1, %v2001_v53 }
 0xb81   :  { %5233 = vmatpush3.bf16.msra.mxu1 %v2419_v57  ;;  %2086 = vmatprep.mubr.f32.mxu1 %v7350_v56 }
 0xb82   :  { %5234 = vmatprep.subr.bf16.mxu1 %v2418_v6 }
 0xb83   :  { %v2005_v50 = vpop.permute.xlu0 %2004 }
 0xb84   :  { %v2003_v4 = vpop.permute.xlu1 %2002 }
 0xb85   :  { %4693 = vmatmul.mubr.msk.f32.gmra.mxu1 %vm289_vm1, %v2003_v4 }
 0xb86   :  { %5235 = vmatpush3.bf16.msra.mxu1 %v2418_v6  ;;  %2092 = vmatprep.mubr.f32.mxu1 %v7350_v56 }
 0xb87   :  { %v2132_v54 = vpop.permute.xlu0 %2131  ;;  %3035 = vmatprep.subr.mxu1 %v7348_v26 }
 0xb88   :  { %v2007_v22 = vpop.permute.xlu1 %2006  ;;  %4696 = vmatmul.mubr.msk.f32.vlgmr.msra.gmra.mxu0 %vm289_vm1, %v2132_v54 }
 0xb89   :  { %4694 = vmatmul.mubr.msk.f32.gmra.mxu1 %vm289_vm1, %v2005_v50  ;;  %2217 = vmatprep.mubr.f32.mxu0 %v7350_v56 }
 0xb8a   :  { %2098 = vmatprep.mubr.f32.mxu1 %v7350_v56 }
 0xb8b   :  { %v2136_v27 = vpop.permute.xlu0 %2135 }
 0xb8c   :  { %v2134_v51 = vpop.permute.xlu1 %2133 }
 0xb8d   :  { %4695 = vmatmul.mubr.msk.f32.gmra.mxu1 %vm289_vm1, %v2007_v22  ;;  %4697 = vmatmul.mubr.msk.f32.gmra.mxu0 %vm289_vm1, %v2134_v51 }
 0xb8e   :  { %2223 = vmatprep.mubr.f32.mxu0 %v7350_v56 }
 0xb90   :  { %v2138_v0 = vpop.permute.xlu1 %2137 }
 0xb91   :  { %4698 = vmatmul.mubr.msk.f32.gmra.mxu0 %vm289_vm1, %v2136_v27 }
 0xb92   :  { %2229 = vmatprep.mubr.f32.mxu0 %v7350_v56 }
 0xb95   :  { %4699 = vmatmul.mubr.msk.f32.gmra.mxu0 %vm289_vm1, %v2138_v0 }
 0xb96   :  { %2732 = vmatprep.mubr.f32.mxu0 %v6483_v39 }
 0xc40   :  { %v2082_v33 = vpop.f32.mrf.mxu1 }
 0xc41   :  { %v2105_v47 = vmul.f32 %v6398_v41, %v2082_v33 }
 0xc42   :  { %v2084_v58 = vpop.f32.mrf.mxu1 }
 0xc43   :  { %v2106_v26 = vmul.f32 %v6483_v39, %v2084_v58  ;;  %v6497_v58 = vld [vmem:[%s7330_s18] sm:$0xff] }
 0xc45   :  { %v2088_v49 = vpop.f32.mrf.mxu1 }
 0xc46   :  { %v2107_v18 = vmul.f32 %v6410_v24, %v2088_v49 }
 0xc47   :  { %v2090_v61 = vpop.f32.mrf.mxu1 }
 0xc48   :  { %v2213_v3 = vpop.f32.mrf.mxu0  ;;  %v2108_v37 = vmul.f32 %v6404_v31, %v2090_v61  ;;  %v2113_v8 = vadd.f32 %v2107_v18, %v2105_v47  ;;  %v6503_v61 = vld [vmem:[%s7330_s18 + $0x20] sm:$0xff] }
 0xc49   :  { %v2094_v9 = vpop.f32.mrf.mxu1 }
 0xc4a   :  { %v2109_v10 = vmul.f32 %v6422_v45, %v2094_v9  ;;  %v2215_v55 = vpop.f32.mrf.mxu0  ;;  %v2122_v5 = vadd.f32 %v2108_v37, %v2106_v26 }
 0xc4b   :  { %v2096_v52 = vpop.f32.mrf.mxu1 }
 0xc4c   :  { %v2110_v21 = vmul.f32 %v6416_v1, %v2096_v52  ;;  %v2114_v44 = vadd.f32 %v2113_v8, %v2109_v10 }
 0xc4d   :  { %v2100_v36 = vpop.f32.mrf.mxu1  ;;  %v2219_v16 = vpop.f32.mrf.mxu0 }
 0xc4e   :  { %v2111_v30 = vmul.f32 %v6434_v62, %v2100_v36  ;;  %v2123_v43 = vadd.f32 %v2122_v5, %v2110_v21  ;;  %v6515_v36 = vld [vmem:[%s7330_s18 + $0x8] sm:$0xff] }
 0xc4f   :  { %v2102_v7 = vpop.f32.mrf.mxu1  ;;  %v2221_v29 = vpop.f32.mrf.mxu0 }
 0xc50   :  { %v2115_v48 = vadd.f32 %v2114_v44, %v2111_v30  ;;  %v2112_v2 = vmul.f32 %v6428_v60, %v2102_v7  ;;  %v6521_v44 = vld [vmem:[%s7330_s18 + $0x28] sm:$0xff] }
 0xc51   :  { %v2225_v42 = vpop.f32.mrf.mxu0 }
 0xc52   :  { %v2116_v38 = vrot.slane %v2115_v48, 4  ;;  %v2124_v63 = vadd.f32 %v2123_v43, %v2112_v2  ;;  %v6527_v43 = vld [vmem:[%s7330_s18 + $0x30] sm:$0xff] }
 0xc53   :  { %v2227_v17 = vpop.f32.mrf.mxu0 }
 0xc54   :  { %v2117_v25 = vadd.f32 %v2116_v38, %v2115_v48  ;;  %v2125_v40 = vrot.slane %v2124_v63, 4  ;;  %v6533_v38 = vld [vmem:[%s7330_s18 + $0x18] sm:$0xff] }
 0xc55   :  { %v2231_v57 = vpop.f32.mrf.mxu0 }
 0xc56   :  { %v2118_v46 = vrot.slane %v2117_v25, 2  ;;  %v2126_v34 = vadd.f32 %v2125_v40, %v2124_v63 }
 0xc57   :  { %v2233_v47 = vpop.f32.mrf.mxu0 }
 0xc58   :  { %v2119_v28 = vadd.f32 %v2118_v46, %v2117_v25  ;;  %v2127_v13 = vrot.slane %v2126_v34, 2  ;;  %v6539_v46 = vld [vmem:[%s7330_s18 + $0x38] sm:$0xff] }
 0xc5a   :  { %v2120_v14 = vrot.slane %v2119_v28, 1  ;;  %v2128_v15 = vadd.f32 %v2127_v13, %v2126_v34 }
 0xc5c   :  { %v2121_v20 = vadd.f32 %v2120_v14, %v2119_v28  ;;  %v2129_v23 = vrot.slane %v2128_v15, 1 }
 0xc5e   :  { %v2220_v32 = vadd.f32 %v2219_v16, %v2121_v20  ;;  %v2130_v11 = vadd.f32 %v2129_v23, %v2128_v15  ;;  %v2214_v59 = vadd.f32 %v2213_v3, %v2121_v20  ;;  %v2226_v19 = vadd.f32 %v2225_v42, %v2121_v20 }
 0xc5f   :  { %v2232_v12 = vadd.f32 %v2231_v57, %v2121_v20 }
 0xc60   :  { %vm2238_vm15 = vcmp.gt.f32.partialorder %v2220_v32, 0.0  ;;  %v2246_v53 = vmul.f32 0.2, %v2220_v32  ;;  %v2222_v6 = vadd.f32 %v2221_v29, %v2130_v11  ;;  %vm2236_vm0 = vcmp.gt.f32.partialorder %v2214_v59, 0.0 }
 0xc61   :  { %vm2240_vm2 = vcmp.gt.f32.partialorder %v2226_v19, 0.0  ;;  %v2244_v50 = vmul.f32 0.2, %v2214_v59  ;;  %v2248_v4 = vmul.f32 0.2, %v2226_v19  ;;  %v2216_v54 = vadd.f32 %v2215_v55, %v2130_v11  ;;  %v6509_v55 = vld [vmem:[%s7330_s18 + $0x10] sm:$0xff] }
 0xc62   :  { %v2228_v22 = vadd.f32 %v2227_v17, %v2130_v11  ;;  %v2254_v51 = vsel %vm2238_vm15, %v2220_v32, %v2246_v53  ;;  %v2247_v27 = vmul.f32 0.2, %v2222_v6  ;;  %vm2239_vm3 = vcmp.gt.f32.partialorder %v2222_v6, 0.0 }
 0xc63   :  { %v2252_v0 = vsel %vm2236_vm0, %v2214_v59, %v2244_v50  ;;  %v2256_v33 = vsel %vm2240_vm2, %v2226_v19, %v2248_v4  ;;  %vm2237_vm4 = vcmp.gt.f32.partialorder %v2216_v54, 0.0  ;;  %v2245_v3 = vmul.f32 0.2, %v2216_v54 }
 0xc64   :  { %v2260_v49 = vadd.f32 %v6497_v58, %v2252_v0  ;;  %vm2241_vm5 = vcmp.gt.f32.partialorder %v2228_v22, 0.0  ;;  %v2264_v18 = vadd.f32 %v6503_v61, %v2256_v33  ;;  %v2249_v9 = vmul.f32 0.2, %v2228_v22 }
 0xc65   :  { %vm2242_vm6 = vcmp.gt.f32.partialorder %v2232_v12, 0.0  ;;  %v2250_v37 = vmul.f32 0.2, %v2232_v12  ;;  %v2234_v10 = vadd.f32 %v2233_v47, %v2130_v11  ;;  %v2262_v52 = vadd.f32 %v6509_v55, %v2254_v51 }
 0xc66   :  { %v2255_v26 = vsel %vm2239_vm3, %v2222_v6, %v2247_v27  ;;  %v2253_v8 = vsel %vm2237_vm4, %v2216_v54, %v2245_v3  ;;  %v2257_v21 = vsel %vm2241_vm5, %v2228_v22, %v2249_v9  ;;  %v2268_v7 = vmax.f32 %v2260_v49, %v2264_v18 }
 0xc67   :  { %v2261_v5 = vadd.f32 %v6515_v36, %v2253_v8  ;;  %v2265_v30 = vadd.f32 %v6521_v44, %v2257_v21  ;;  %v2258_v16 = vsel %vm2242_vm6, %v2232_v12, %v2250_v37  ;;  %vm2243_vm7 = vcmp.gt.f32.partialorder %v2234_v10, 0.0 }
 0xc68   :  { %v2266_v48 = vadd.f32 %v6527_v43, %v2258_v16  ;;  %v2251_v2 = vmul.f32 0.2, %v2234_v10  ;;  %v2263_v63 = vadd.f32 %v6533_v38, %v2255_v26 }
 0xc69   :  { %v2277_v40 = vmax.f32 %v2261_v5, %v2265_v30 }
 0xc6a   :  { %v2269_v29 = vmax.f32 %v2262_v52, %v2266_v48  ;;  %v2259_v25 = vsel %vm2243_vm7, %v2234_v10, %v2251_v2 }
 0xc6b   :  { %v2267_v34 = vadd.f32 %v6539_v46, %v2259_v25 }
 0xc6c   :  { %v2270_v42 = vmax.f32 %v2268_v7, %v2269_v29 }
 0xc6d   :  { %v2278_v28 = vmax.f32 %v2263_v63, %v2267_v34 }
 0xc6e   :  { %v2271_v13 = vrot.slane %v2270_v42, 4 }
 0xc6f   :  { %v2279_v14 = vmax.f32 %v2277_v40, %v2278_v28 }
 0xc70   :  { %v2272_v15 = vmax.f32 %v2270_v42, %v2271_v13 }
 0xc71   :  { %v2280_v17 = vrot.slane %v2279_v14, 4 }
 0xc72   :  { %v2273_v20 = vrot.slane %v2272_v15, 2 }
 0xc73   :  { %v2281_v23 = vmax.f32 %v2279_v14, %v2280_v17 }
 0xc74   :  { %v2274_v32 = vmax.f32 %v2272_v15, %v2273_v20 }
 0xc75   :  { %v2282_v11 = vrot.slane %v2281_v23, 2 }
 0xc76   :  { %v2275_v59 = vrot.slane %v2274_v32, 1 }
 0xc77   :  { %v2283_v19 = vmax.f32 %v2281_v23, %v2282_v11 }
 0xc78   :  { %v2276_v57 = vmax.f32 %v2274_v32, %v2275_v59 }
 0xc79   :  { %v2284_v12 = vrot.slane %v2283_v19, 1 }
 0xc7a   :  { %v2288_v53 = vsub.f32 %v2262_v52, %v2276_v57  ;;  %v2286_v50 = vsub.f32 %v2260_v49, %v2276_v57  ;;  %v2290_v54 = vsub.f32 %v2264_v18, %v2276_v57  ;;  %v2292_v33 = vsub.f32 %v2266_v48, %v2276_v57 }
 0xc7b   :  { %v2285_v6 = vmax.f32 %v2283_v19, %v2284_v12 }
 0xc7c   :  { %v2298_v22 = vmul.f32 1.442695, %v2288_v53  ;;  %v2294_v3 = vmul.f32 1.442695, %v2286_v50  ;;  %v2302_v37 = vmul.f32 1.442695, %v2290_v54 }
 0xc7d   :  { %v2289_v4 = vsub.f32 %v2263_v63, %v2285_v6  ;;  %v2287_v51 = vsub.f32 %v2261_v5, %v2285_v6  ;;  %v2291_v27 = vsub.f32 %v2265_v30, %v2285_v6  ;;  %v2293_v9 = vsub.f32 %v2267_v34, %v2285_v6 }
 0xc7e   :  { %5452 = vpow2.f32 %v2298_v22  ;;  %v2306_v26 = vmul.f32 1.442695, %v2292_v33 }
 0xc7f   :  { %v2300_v0 = vmul.f32 1.442695, %v2289_v4  ;;  %v2296_v47 = vmul.f32 1.442695, %v2287_v51  ;;  %v2304_v10 = vmul.f32 1.442695, %v2291_v27 }
 0xc80   :  { %v2308_v8 = vmul.f32 1.442695, %v2293_v9 }
 0xc81   :  { %5454 = vpow2.f32 %v2300_v0 }
 0xc82   :  { %5456 = vpow2.f32 %v2294_v3 }
 0xc83   :  { %5458 = vpow2.f32 %v2296_v47 }
 0xc84   :  { %5460 = vpow2.f32 %v2302_v37 }
 0xc85   :  { %5462 = vpow2.f32 %v2304_v10 }
 0xc86   :  { %5464 = vpow2.f32 %v2306_v26 }
 0xc87   :  { %5466 = vpow2.f32 %v2308_v8 }
 0xc8b   :  { %v5453_v49 = vpop.eup %5452 }
 0xc8e   :  { %v5455_v18 = vpop.eup %5454 }
 0xc8f   :  { %v5457_v52 = vpop.eup %5456 }
 0xc90   :  { %v5459_v21 = vpop.eup %5458  ;;  %v2310_v5 = vadd.f32 %v5457_v52, %v5453_v49 }
 0xc91   :  { %v5461_v30 = vpop.eup %5460  ;;  %v2319_v16 = vadd.f32 %v5459_v21, %v5455_v18 }
 0xc92   :  { %v5463_v7 = vpop.eup %5462  ;;  %v2311_v48 = vadd.f32 %v5461_v30, %v2310_v5 }
 0xc93   :  { %v5465_v2 = vpop.eup %5464  ;;  %v2320_v63 = vadd.f32 %v5463_v7, %v2319_v16 }
 0xc94   :  { %v5467_v29 = vpop.eup %5466  ;;  %v2312_v25 = vadd.f32 %v5465_v2, %v2311_v48 }
 0xc95   :  { %v2321_v40 = vadd.f32 %v5467_v29, %v2320_v63 }
 0xc96   :  { %v2313_v34 = vrot.slane %v2312_v25, 4 }
 0xc97   :  { %v2322_v42 = vrot.slane %v2321_v40, 4 }
 0xc98   :  { %v2314_v28 = vadd.f32 %v2313_v34, %v2312_v25 }
 0xc99   :  { %v2323_v13 = vadd.f32 %v2322_v42, %v2321_v40 }
 0xc9a   :  { %v2315_v14 = vrot.slane %v2314_v28, 2 }
 0xc9b   :  { %v2324_v15 = vrot.slane %v2323_v13, 2 }
 0xc9c   :  { %v2316_v17 = vadd.f32 %v2315_v14, %v2314_v28 }
 0xc9d   :  { %v2325_v20 = vadd.f32 %v2324_v15, %v2323_v13 }
 0xc9e   :  { %v2317_v23 = vrot.slane %v2316_v17, 1 }
 0xc9f   :  { %v2326_v32 = vrot.slane %v2325_v20, 1 }
 0xca0   :  { %v2318_v11 = vadd.f32 %v2317_v23, %v2316_v17 }
 0xca1   :  { %v2327_v59 = vadd.f32 %v2326_v32, %v2325_v20 }
 0xca2   :  { %5468 = vrcp.f32 %v2318_v11 }
 0xca3   :  { %5470 = vrcp.f32 %v2327_v59 }
 0xcaf   :  { %v5469_v19 = vpop.eup %5468 }
 0xcb0   :  { %v5471_v57 = vpop.eup %5470  ;;  %v2330_v12 = vmul.f32 %v5469_v19, %v5457_v52  ;;  %v2332_v6 = vmul.f32 %v5469_v19, %v5453_v49  ;;  %v2334_v4 = vmul.f32 %v5469_v19, %v5461_v30  ;;  %v2336_v22 = vmul.f32 %v5469_v19, %v5465_v2 }
 0xcb1   :  { %v2331_v53 = vmul.f32 %v5471_v57, %v5459_v21  ;;  %v2333_v50 = vmul.f32 %v5471_v57, %v5455_v18  ;;  %v2335_v54 = vmul.f32 %v5471_v57, %v5463_v7  ;;  %v2337_v51 = vmul.f32 %v5471_v57, %v5467_v29 }
 0xcb2   :  { %2338 = vxpose.xlu0.b32.start [1/4] (short) %v2330_v12, 128 }
 0xcb3   :  { %2370 = vxpose.xlu1.b32.start [1/4] (short) %v2331_v53, 128 }
 0xcb6   :  { %2339 = vxpose.xlu0.b32.cont [2/4] (short) %v2332_v6, 128 }
 0xcb7   :  { %2371 = vxpose.xlu1.b32.cont [2/4] (short) %v2333_v50, 128 }
 0xcba   :  { %2340 = vxpose.xlu0.b32.cont [3/4] (short) %v2334_v4, 128 }
 0xcbb   :  { %2372 = vxpose.xlu1.b32.cont [3/4] (short) %v2335_v54, 128 }
 0xcbe   :  { %2341 = vxpose.xlu0.b32.end [4/4] (short) %v2336_v22, 128 }
 0xcbf   :  { %2373 = vxpose.xlu1.b32.end [4/4] (short) %v2337_v51, 128 }
 0xd2e   :  { %v2354_v27 = vpop.trf.xlu0 }
 0xd2f   :  { %v2386_v0 = vpop.trf.xlu1 }
 0xd32   :  { %v2355_v33 = vpop.trf.xlu0 }
 0xd33   :  { %v2402_v3 = vpack.c.bf16 %v2355_v33, %v2354_v27  ;;  %v2387_v9 = vpop.trf.xlu1 }
 0xd34   :  { %v2410_v11 = vpack.c.bf16 %v2387_v9, %v2386_v0 }
 0xd35   :  { %5236 = vmatprep.mubr.msk.bf16.mxu1 %vm702_vm10, %v2402_v3 }
 0xd36   :  { %v2356_v47 = vpop.trf.xlu0 }
 0xd37   :  { %v2388_v10 = vpop.trf.xlu1 }
 0xd3a   :  { %v2357_v37 = vpop.trf.xlu0 }
 0xd3b   :  { %v2403_v26 = vpack.c.bf16 %v2357_v37, %v2356_v47  ;;  %v2389_v49 = vpop.trf.xlu1 }
 0xd3c   :  { %v2411_v19 = vpack.c.bf16 %v2389_v49, %v2388_v10 }
 0xd3d   :  { %5237 = vmatmul.mubr.msk.bf16.vlgmr.msra.gmra.mxu1 %vm702_vm10, %v2403_v26 }
 0xd3e   :  { %v2358_v8 = vpop.trf.xlu0  ;;  %3036 = vmatpush1.msra.mxu1 %v7349_v35 }
 0xd3f   :  { %v2390_v5 = vpop.trf.xlu1 }
 0xd42   :  { %v2359_v18 = vpop.trf.xlu0 }
 0xd43   :  { %v2404_v52 = vpack.c.bf16 %v2359_v18, %v2358_v8  ;;  %v2391_v7 = vpop.trf.xlu1 }
 0xd44   :  { %v2412_v57 = vpack.c.bf16 %v2391_v7, %v2390_v5 }
 0xd45   :  { %5240 = vmatprep.mubr.msk.bf16.mxu1 %vm702_vm10, %v2404_v52 }
 0xd46   :  { %v2360_v21 = vpop.trf.xlu0 }
 0xd47   :  { %v2392_v63 = vpop.trf.xlu1 }
 0xd4a   :  { %v2361_v30 = vpop.trf.xlu0 }
 0xd4b   :  { %v2405_v16 = vpack.c.bf16 %v2361_v30, %v2360_v21  ;;  %v2393_v35 = vpop.trf.xlu1 }
 0xd4c   :  { %v2413_v53 = vpack.c.bf16 %v2393_v35, %v2392_v63 }
 0xd4d   :  { %5241 = vmatmul.mubr.msk.bf16.gmra.mxu1 %vm702_vm10, %v2405_v16 }
 0xd4e   :  { %v2362_v48 = vpop.trf.xlu0 }
 0xd4f   :  { %v2394_v28 = vpop.trf.xlu1 }
 0xd52   :  { %v2363_v2 = vpop.trf.xlu0 }
 0xd53   :  { %v2406_v29 = vpack.c.bf16 %v2363_v2, %v2362_v48  ;;  %v2395_v15 = vpop.trf.xlu1 }
 0xd54   :  { %v2414_v6 = vpack.c.bf16 %v2395_v15, %v2394_v28 }
 0xd55   :  { %5244 = vmatprep.mubr.msk.bf16.mxu1 %vm702_vm10, %v2406_v29 }
 0xd56   :  { %v2364_v25 = vpop.trf.xlu0 }
 0xd57   :  { %v2396_v23 = vpop.trf.xlu1 }
 0xd5a   :  { %v2365_v40 = vpop.trf.xlu0 }
 0xd5b   :  { %v2407_v34 = vpack.c.bf16 %v2365_v40, %v2364_v25  ;;  %v2397_v59 = vpop.trf.xlu1 }
 0xd5c   :  { %v2415_v54 = vpack.c.bf16 %v2397_v59, %v2396_v23 }
 0xd5d   :  { %5245 = vmatmul.mubr.msk.bf16.gmra.mxu1 %vm702_vm10, %v2407_v34 }
 0xd5e   :  { %v2366_v42 = vpop.trf.xlu0 }
 0xd5f   :  { %v2398_v12 = vpop.trf.xlu1 }
 0xd62   :  { %v2367_v13 = vpop.trf.xlu0 }
 0xd63   :  { %v2408_v14 = vpack.c.bf16 %v2367_v13, %v2366_v42  ;;  %v2399_v50 = vpop.trf.xlu1 }
 0xd64   :  { %v2416_v22 = vpack.c.bf16 %v2399_v50, %v2398_v12  ;;  %v6613_v12 = vld [vmem:[%s7276_s4 + $0x70] sm:$0xff] }
 0xd65   :  { %5248 = vmatprep.mubr.msk.bf16.mxu1 %vm702_vm10, %v2408_v14 }
 0xd66   :  { %v2368_v17 = vpop.trf.xlu0 }
 0xd67   :  { %v2400_v4 = vpop.trf.xlu1 }
 0xd6a   :  { %v2369_v20 = vpop.trf.xlu0 }
 0xd6b   :  { %v2409_v32 = vpack.c.bf16 %v2369_v20, %v2368_v17  ;;  %v2401_v51 = vpop.trf.xlu1  ;;  %v6595_v20 = vld [vmem:[%s7276_s4 + $0xf8] sm:$0xff] }
 0xd6c   :  { %v2417_v27 = vpack.c.bf16 %v2401_v51, %v2400_v4  ;;  %v6625_v4 = vld [vmem:[%s7276_s4 + $0x68] sm:$0xff] }
 0xd6d   :  { %5249 = vmatmul.mubr.msk.bf16.gmra.mxu1 %vm702_vm10, %v2409_v32  ;;  %v6601_v32 = vld [vmem:[%s7276_s4 + $0x78] sm:$0xff] }
 0xd6e   :  { %5252 = vmatprep.mubr.msk.bf16.mxu1 %vm702_vm10, %v2410_v11 }
 0xd75   :  { %5253 = vmatmul.mubr.msk.bf16.gmra.mxu1 %vm702_vm10, %v2411_v19  ;;  %v6607_v19 = vld [vmem:[%s7276_s4 + $0xf0] sm:$0xff] }
 0xd76   :  { %5256 = vmatprep.mubr.msk.bf16.mxu1 %vm702_vm10, %v2412_v57 }
 0xd7d   :  { %5257 = vmatmul.mubr.msk.bf16.gmra.mxu1 %vm702_vm10, %v2413_v53 }
 0xd7e   :  { %5260 = vmatprep.mubr.msk.bf16.mxu1 %vm702_vm10, %v2414_v6  ;;  %v6619_v6 = vld [vmem:[%s7276_s4 + $0xe8] sm:$0xff] }
 0xd85   :  { %5261 = vmatmul.mubr.msk.bf16.gmra.mxu1 %vm702_vm10, %v2415_v54 }
 0xd86   :  { %5264 = vmatprep.mubr.msk.bf16.mxu1 %vm702_vm10, %v2416_v22  ;;  %v6631_v22 = vld [vmem:[%s7276_s4 + $0xe0] sm:$0xff] }
 0xd8d   :  { %5265 = vmatmul.mubr.msk.bf16.gmra.mxu1 %vm702_vm10, %v2417_v27  ;;  %v6637_v27 = vld [vmem:[%s7276_s4 + $0x60] sm:$0xff] }
 0xd8e   :  { %3069 = vmatprep.mubr.f32.mxu1 %v7350_v56 }
 0xdfd   :  { %v6560_v0 = vpop.f32.mrf.mxu1 }
 0xdff   :  { %v6562_v33 = vpop.f32.mrf.mxu1 }
 0xe01   :  { %v6564_v3 = vpop.f32.mrf.mxu1 }
 0xe03   :  { %v6566_v9 = vpop.f32.mrf.mxu1 }
 0xe0d   :  { %v6568_v47 = vpop.f32.mrf.mxu1 }
 0xe0f   :  { %v6570_v37 = vpop.f32.mrf.mxu1 }
 0xe11   :  { %v6572_v10 = vpop.f32.mrf.mxu1 }
 0xe13   :  { %v6574_v26 = vpop.f32.mrf.mxu1 }
 0xe1d   :  { %v5246_v8 = vpop.f32.mrf.mxu1 }
 0xe1f   :  { %v6576_v49 = vpop.f32.mrf.mxu1 }
 0xe21   :  { %v5247_v18 = vpop.f32.mrf.mxu1 }
 0xe23   :  { %v2537_v52 = vpop.f32.mrf.mxu1 }
 0xe2d   :  { %v5250_v21 = vpop.f32.mrf.mxu1 }
 0xe2e   :  { %v2643_v53 = vmul.f32 %v6613_v12, %v5250_v21 }
 0xe2f   :  { %v2550_v5 = vpop.f32.mrf.mxu1 }
 0xe30   :  { %v2641_v21 = vmul.f32 %v6637_v27, %v2550_v5  ;;  %v6655_v5 = vld [vmem:[%s7276_s4 + $0xd0] sm:$0xff] }
 0xe31   :  { %v5251_v30 = vpop.f32.mrf.mxu1 }
 0xe32   :  { %v2644_v11 = vmul.f32 %v6601_v32, %v5251_v30  ;;  %v6643_v30 = vld [vmem:[%s7276_s4 + $0xd8] sm:$0xff] }
 0xe33   :  { %v2553_v16 = vpop.f32.mrf.mxu1 }
 0xe34   :  { %v2642_v54 = vmul.f32 %v6625_v4, %v2553_v16 }
 0xe35   :  { %v6578_v7 = vpop.f32.mrf.mxu1 }
 0xe37   :  { %v6580_v48 = vpop.f32.mrf.mxu1 }
 0xe39   :  { %v6582_v2 = vpop.f32.mrf.mxu1 }
 0xe3b   :  { %v6584_v63 = vpop.f32.mrf.mxu1 }
 0xe3d   :  { %v6586_v29 = vpop.f32.mrf.mxu1 }
 0xe3f   :  { %v6588_v25 = vpop.f32.mrf.mxu1 }
 0xe41   :  { %v5259_v35 = vpop.f32.mrf.mxu1 }
 0xe43   :  { %v6590_v40 = vpop.f32.mrf.mxu1 }
 0xe45   :  { %v5262_v34 = vpop.f32.mrf.mxu1 }
 0xe47   :  { %v2598_v42 = vpop.f32.mrf.mxu1 }
 0xe49   :  { %v5263_v28 = vpop.f32.mrf.mxu1 }
 0xe4a   :  { %v2656_v16 = vmul.f32 %v6643_v30, %v5263_v28  ;;  %v6661_v28 = vld [vmem:[%s7276_s4 + $0x50] sm:$0xff] }
 0xe4b   :  { %v2601_v13 = vpop.f32.mrf.mxu1 }
 0xe4d   :  { %v5266_v14 = vpop.f32.mrf.mxu1 }
 0xe4e   :  { %v2659_v57 = vmul.f32 %v6607_v19, %v5266_v14  ;;  %v6649_v14 = vld [vmem:[%s7276_s4 + $0x58] sm:$0xff] }
 0xe4f   :  { %v2614_v15 = vpop.f32.mrf.mxu1 }
 0xe50   :  { %v2657_v51 = vmul.f32 %v6631_v22, %v2614_v15  ;;  %v2640_v15 = vmul.f32 %v6649_v14, %v5247_v18  ;;  %v6667_v18 = vld [vmem:[%s7276_s4 + $0xc8] sm:$0xff] }
 0xe51   :  { %v5267_v17 = vpop.f32.mrf.mxu1 }
 0xe52   :  { %v2660_v23 = vmul.f32 %v6595_v20, %v5267_v17  ;;  %v2655_v17 = vmul.f32 %v6655_v5, %v5262_v34  ;;  %v6673_v34 = vld [vmem:[%s7276_s4 + $0x48] sm:$0xff] }
 0xe53   :  { %v2617_v59 = vpop.f32.mrf.mxu1 }
 0xe54   :  { %4940 = vmatprep.subr.mxu0 %v2660_v23  ;;  %v2658_v50 = vmul.f32 %v6619_v6, %v2617_v59  ;;  %v2639_v23 = vmul.f32 %v6661_v28, %v5246_v8  ;;  %v2638_v59 = vmul.f32 %v6673_v34, %v2537_v52  ;;  %v6679_v8 = vld [vmem:[%s7276_s4 + $0xc0] sm:$0xff]  ;;  %v6692_v52 = vld [vmem:[%s7276_s4 + $0xb8] sm:$0xff] }
 0xe55   :  { %4941 = vmatpush3.msra.mxu0 %v2644_v11  ;;  %v2654_v11 = vmul.f32 %v6667_v18, %v2601_v13  ;;  %v6685_v13 = vld [vmem:[%s7276_s4 + $0x40] sm:$0xff] }
 0xe56   :  { %4942 = vmatprep.subr.mxu0 %v2659_v57  ;;  %v2653_v57 = vmul.f32 %v6679_v8, %v2598_v42  ;;  %v6698_v42 = vld [vmem:[%s7276_s4 + $0x38] sm:$0xff] }
 0xe57   :  { %4943 = vmatpush3.msra.mxu0 %v2643_v53  ;;  %v2637_v53 = vmul.f32 %v6685_v13, %v6576_v49  ;;  %v6705_v49 = vld [vmem:[%s7276_s4 + $0xb0] sm:$0xff] }
 0xe58   :  { %4944 = vmatprep.subr.mxu0 %v2658_v50  ;;  %v2652_v50 = vmul.f32 %v6692_v52, %v5259_v35  ;;  %v6712_v35 = vld [vmem:[%s7276_s4 + $0x30] sm:$0xff] }
 0xe59   :  { %4945 = vmatpush3.msra.mxu0 %v2642_v54  ;;  %v2636_v54 = vmul.f32 %v6698_v42, %v6572_v10  ;;  %v6719_v10 = vld [vmem:[%s7276_s4 + $0xa8] sm:$0xff] }
 0xe5a   :  { %4946 = vmatprep.subr.mxu0 %v2657_v51  ;;  %v2651_v51 = vmul.f32 %v6705_v49, %v6586_v29  ;;  %v6726_v29 = vld [vmem:[%s7276_s4 + $0x28] sm:$0xff] }
 0xe5b   :  { %4947 = vmatpush3.msra.mxu0 %v2641_v21  ;;  %v2635_v21 = vmul.f32 %v6712_v35, %v6568_v47  ;;  %v6733_v47 = vld [vmem:[%s7276_s4 + $0xa0] sm:$0xff] }
 0xe5c   :  { %4948 = vmatprep.subr.mxu0 %v2656_v16  ;;  %v2650_v16 = vmul.f32 %v6719_v10, %v6590_v40  ;;  %v6740_v40 = vld [vmem:[%s7276_s4 + $0x20] sm:$0xff] }
 0xe5d   :  { %4949 = vmatpush3.msra.mxu0 %v2640_v15  ;;  %v2634_v15 = vmul.f32 %v6726_v29, %v6574_v26  ;;  %v6747_v26 = vld [vmem:[%s7276_s4 + $0x98] sm:$0xff] }
 0xe5e   :  { %4950 = vmatprep.subr.mxu0 %v2655_v17  ;;  %v2649_v17 = vmul.f32 %v6733_v47, %v6588_v25  ;;  %v6754_v25 = vld [vmem:[%s7276_s4 + $0x18] sm:$0xff] }
 0xe5f   :  { %4951 = vmatpush3.msra.mxu0 %v2639_v23  ;;  %v2633_v23 = vmul.f32 %v6740_v40, %v6570_v37  ;;  %v6761_v37 = vld [vmem:[%s7276_s4 + $0x90] sm:$0xff] }
 0xe60   :  { %4952 = vmatprep.subr.mxu0 %v2654_v11  ;;  %v2648_v11 = vmul.f32 %v6747_v26, %v6582_v2  ;;  %v6768_v2 = vld [vmem:[%s7276_s4 + $0x10] sm:$0xff] }
 0xe61   :  { %4953 = vmatpush3.msra.mxu0 %v2638_v59  ;;  %v2632_v59 = vmul.f32 %v6754_v25, %v6564_v3  ;;  %7351 = vst [vmem:[#allocation13_spill] sm:$0xff] %v6768_v2  ;;  %v6775_v3 = vld [vmem:[%s7276_s4 + $0x88] sm:$0xff] }
 0xe62   :  { %4954 = vmatprep.subr.mxu0 %v2653_v57  ;;  %v2647_v57 = vmul.f32 %v6761_v37, %v6578_v7  ;;  %7352 = vst [vmem:[#allocation14_spill] sm:$0xff] %v6775_v3  ;;  %v6782_v7 = vld [vmem:[%s7276_s4 + $0x8] sm:$0xff] }
 0xe63   :  { %4955 = vmatpush3.msra.mxu0 %v2637_v53  ;;  %v2631_v53 = vmul.f32 %v6768_v2, %v6560_v0  ;;  %7353 = vst [vmem:[#allocation15_spill] sm:$0xff] %v6782_v7  ;;  %v6789_v0 = vld [vmem:[%s7276_s4 + $0x80] sm:$0xff] }
 0xe64   :  { %4956 = vmatprep.subr.mxu0 %v2652_v50  ;;  %v2646_v50 = vmul.f32 %v6775_v3, %v6584_v63  ;;  %7354 = vst [vmem:[#allocation16_spill] sm:$0xff] %v6789_v0  ;;  %v6796_v63 = vld [vmem:[%s7276_s4] sm:$0xff]  ;;  %s5718_s4 = smov 72  }
 0xe65   :  { %4957 = vmatpush3.msra.mxu0 %v2636_v54  ;;  %v2630_v54 = vmul.f32 %v6782_v7, %v6566_v9  ;;  %7355 = vst [vmem:[#allocation17_spill] sm:$0xff] %v6796_v63 }
 0xe66   :  { %4958 = vmatprep.subr.mxu0 %v2651_v51  ;;  %v2645_v51 = vmul.f32 %v6789_v0, %v6580_v48 }
 0xe67   :  { %4959 = vmatpush3.msra.mxu0 %v2635_v21  ;;  %v2629_v21 = vmul.f32 %v6796_v63, %v6562_v33  ;;  %v5404_v33 = vld [vmem:[%s7285_s13 + $0x18] sm:$0xff]  }
 0xe68   :  { %4960 = vmatprep.subr.mxu0 %v2650_v16 }
 0xe69   :  { %4961 = vmatpush3.msra.mxu0 %v2634_v15 }
 0xe6a   :  { %4962 = vmatprep.subr.mxu0 %v2649_v17 }
 0xe6b   :  { %4963 = vmatpush3.msra.mxu0 %v2633_v23 }
 0xe6c   :  { %4964 = vmatprep.subr.mxu0 %v2648_v11 }
 0xe6d   :  { %4965 = vmatpush3.msra.mxu0 %v2632_v59 }
 0xe6e   :  { %4966 = vmatprep.subr.mxu0 %v2647_v57 }
 0xe6f   :  { %4967 = vmatpush3.msra.mxu0 %v2631_v53 }
 0xe70   :  { %4968 = vmatprep.subr.mxu0 %v2646_v50 }
 0xe71   :  { %4969 = vmatpush3.msra.mxu0 %v2630_v54 }
 0xe72   :  { %4970 = vmatprep.subr.mxu0 %v2645_v51 }
 0xe73   :  { %4971 = vmatpush3.msra.mxu0 %v2629_v21 }
 0xe74   :  { %2733 = vmatmul.mubr.f32.vlgmr.msra.gmra.mxu0 %v6398_v41  ;;  %5268 = vmatprep.subr.bf16.mxu0 %v5404_v33  ;;  %v5405_v41 = vld [vmem:[%s7285_s13 + $0x10] sm:$0xff]  }
 0xe75   :  { %2737 = vmatprep.mubr.f32.mxu0 %v6404_v31  ;;  %5269 = vmatpush3.bf16.msra.mxu0 %v5404_v33  ;;  %v5406_v31 = vld [vmem:[%s7285_s13 + $0x8] sm:$0xff]  }
 0xe76   :  { %5270 = vmatprep.subr.bf16.mxu0 %v5405_v41 }
 0xe78   :  { %2738 = vmatmul.mubr.f32.gmra.mxu0 %v6410_v24  ;;  %v5407_v24 = vld [vmem:[%s7285_s13] sm:$0xff]  }
 0xe79   :  { %2742 = vmatprep.mubr.f32.mxu0 %v6416_v1  ;;  %5271 = vmatpush3.bf16.msra.mxu0 %v5405_v41  ;;  %v6822_v1 = vld [vmem:[%s7274_s2 + $0x8] sm:$0xff] }
 0xe7a   :  { %5272 = vmatprep.subr.bf16.mxu0 %v5406_v31  ;;  %7356 = vst [vmem:[#allocation18_spill] sm:$0xff] %v6822_v1 }
 0xe7c   :  { %2743 = vmatmul.mubr.f32.gmra.mxu0 %v6422_v45 }
 0xe7d   :  { %2747 = vmatprep.mubr.f32.mxu0 %v6428_v60  ;;  %5273 = vmatpush3.bf16.msra.mxu0 %v5406_v31  ;;  %v4716_v60 = vld [vmem:[#allocation4] ss:$0 sm:$0xff] }
 0xe7e   :  { %5274 = vmatprep.subr.bf16.mxu0 %v5407_v24 }
 0xe80   :  { %2748 = vmatmul.mubr.f32.gmra.mxu0 %v6434_v62 }
 0xe81   :  { %5275 = vmatpush3.bf16.msra.mxu0 %v5407_v24 }
 0xe82   :  { %2904 = vmatprep.subr.mxu0 %v6822_v1 }
 0xf34   :  { %v4972_v45 = vpop.f32.mrf.mxu0 }
 0xf36   :  { %v4973_v62 = vpop.f32.mrf.mxu0 }
 0xf37   :  { %v4974_v9 = vadd.f32 %v4973_v62, %v4972_v45 }
 0xf38   :  { %v4975_v48 = vpop.f32.mrf.mxu0 }
 0xf39   :  { %v2735_v16 = vadd.f32 %v4974_v9, %v4716_v60 }
 0xf3a   :  { %v4976_v15 = vpop.f32.mrf.mxu0 }
 0xf3b   :  { %v4977_v17 = vadd.f32 %v4976_v15, %v4975_v48  ;;  %v2757_v11 = vmul.f32 0.2, %v2735_v16  ;;  %vm2753_vm8 = vcmp.gt.f32.partialorder %v2735_v16, 0.0 }
 0xf3c   :  { %v4978_v23 = vpop.f32.mrf.mxu0 }
 0xf3d   :  { %v2740_v59 = vadd.f32 %v4977_v17, %v4716_v60  ;;  %v2761_v51 = vsel %vm2753_vm8, %v2735_v16, %v2757_v11  ;;  %v6830_v16 = vld [vmem:[%s7274_s2] sm:$0xff] }
 0xf3e   :  { %v4979_v57 = vpop.f32.mrf.mxu0  ;;  %7357 = vst [vmem:[#allocation21_spill] sm:$0xff] %v6830_v16 }
 0xf3f   :  { %vm2754_vm9 = vcmp.gt.f32.partialorder %v2740_v59, 0.0  ;;  %v2758_v53 = vmul.f32 0.2, %v2740_v59  ;;  %v4980_v50 = vadd.f32 %v4979_v57, %v4978_v23 }
 0xf40   :  { %v4981_v54 = vpop.f32.mrf.mxu0 }
 0xf41   :  { %v2762_v21 = vsel %vm2754_vm9, %v2740_v59, %v2758_v53  ;;  %v2745_v33 = vadd.f32 %v4980_v50, %v4716_v60 }
 0xf42   :  { %v4982_v41 = vpop.f32.mrf.mxu0  ;;  %v2773_v31 = vpack.c.bf16 %v2762_v21, %v2761_v51 }
 0xf43   :  { %v4983_v24 = vadd.f32 %v4982_v41, %v4981_v54  ;;  %v2759_v45 = vmul.f32 0.2, %v2745_v33  ;;  %vm2755_vm11 = vcmp.gt.f32.partialorder %v2745_v33, 0.0 }
 0xf44   :  { %5276 = vmatprep.mubr.msk.bf16.mxu0 %vm1082_vm13, %v2773_v31 }
 0xf45   :  { %v2750_v62 = vadd.f32 %v4983_v24, %v4716_v60  ;;  %v2763_v48 = vsel %vm2755_vm11, %v2745_v33, %v2759_v45 }
 0xf47   :  { %vm2756_vm12 = vcmp.gt.f32.partialorder %v2750_v62, 0.0  ;;  %v2760_v9 = vmul.f32 0.2, %v2750_v62 }
 0xf49   :  { %v2764_v15 = vsel %vm2756_vm12, %v2750_v62, %v2760_v9 }
 0xf4a   :  { %v2774_v17 = vpack.c.bf16 %v2764_v15, %v2763_v48  ;;  %v6861_v15 = vld [vmem:[%s7275_s3 + $0x10] sm:$0xff] }
 0xf4b   :  { %7358 = vst [vmem:[#allocation19_spill] sm:$0xff] %v6861_v15 }
 0xf4c   :  { %5277 = vmatmul.mubr.msk.bf16.vlgmr.msra.gmra.mxu0 %vm1082_vm13, %v2774_v17 }
 0xf4d   :  { %2905 = vmatpush1.msra.mxu0 %v6830_v16  ;;  %2938 = vmatprep.mubr.f32.mxu0 %v7350_v56 }
0x100c   :  { %v5278_v23 = vpop.f32.mrf.mxu0 }
0x100e   :  { %v2839_v11 = vpop.f32.mrf.mxu0 }
0x100f   :  { %2858 = vrot.lane.b32.xlu0 %v2839_v11, %s5717_s30 }
0x1010   :  { %v5279_v60 = vpop.f32.mrf.mxu0 }
0x1011   :  { %v3277_v59 = vpack.c.bf16 %v5279_v60, %v5278_v23 }
0x1012   :  { %v2842_v57 = vpop.f32.mrf.mxu0 }
0x1013   :  { %2862 = vrot.lane.b32.xlu0 %v5278_v23, %s5717_s30  ;;  %5280 = vmatprep.subr.bf16.mxu0 %v3277_v59  ;;  %v3276_v50 = vpack.c.bf16 %v2842_v57, %v2839_v11 }
0x1014   :  { %2860 = vrot.lane.b32.xlu1 %v2842_v57, %s5717_s30 }
0x1017   :  { %2989 = vrot.lane.b32.xlu0 %v2839_v11, %s5712_s20 }
0x1018   :  { %2864 = vrot.lane.b32.xlu1 %v5279_v60, %s5717_s30 }
0x101b   :  { %2993 = vrot.lane.b32.xlu0 %v5278_v23, %s5712_s20 }
0x101c   :  { %2991 = vrot.lane.b32.xlu1 %v2842_v57, %s5712_s20  ;;  %v6873_v57 = vld [vmem:[%s7275_s3 + $0x18] sm:$0xff] }
0x101d   :  { %7360 = vst [vmem:[#allocation22_spill] sm:$0xff] %v6873_v57 }
0x1020   :  { %2995 = vrot.lane.b32.xlu1 %v5279_v60, %s5712_s20  ;;  %v6867_v60 = vld [vmem:[%s7275_s3] sm:$0xff] }
0x1021   :  { %7359 = vst [vmem:[#allocation20_spill] sm:$0xff] %v6867_v60 }
0x1081   :  { %v2859_v53 = vpop.permute.xlu0 %2858 }
0x1082   :  { %4723 = vmatmul.mubr.msk.f32.vlgmr.msra.gmra.mxu0 %vm289_vm1, %v2859_v53 }
0x1083   :  { %5281 = vmatpush3.bf16.msra.mxu0 %v3277_v59  ;;  %2944 = vmatprep.mubr.f32.mxu0 %v7350_v56 }
0x1084   :  { %5282 = vmatprep.subr.bf16.mxu0 %v3276_v50 }
0x1085   :  { %v2863_v54 = vpop.permute.xlu0 %2862 }
0x1086   :  { %v2861_v51 = vpop.permute.xlu1 %2860 }
0x1087   :  { %4724 = vmatmul.mubr.msk.f32.gmra.mxu0 %vm289_vm1, %v2861_v51 }
0x1088   :  { %5283 = vmatpush3.bf16.msra.mxu0 %v3276_v50  ;;  %2950 = vmatprep.mubr.f32.mxu0 %v7350_v56  ;;  %v6879_v50 = vld [vmem:[%s7275_s3 + $0x20] sm:$0xff] }
0x1089   :  { %v2990_v21 = vpop.permute.xlu0 %2989  ;;  %3893 = vmatprep.subr.mxu0 %v6822_v1  ;;  %7361 = vst [vmem:[#allocation23_spill] sm:$0xff] %v6879_v50  ;;  %v6892_v1 = vld [vmem:[%s7275_s3 + $0x30] sm:$0xff] }
0x108a   :  { %v2865_v33 = vpop.permute.xlu1 %2864  ;;  %4727 = vmatmul.mubr.msk.f32.vlgmr.msra.gmra.mxu1 %vm289_vm1, %v2990_v21  ;;  %7363 = vst [vmem:[#allocation25_spill] sm:$0xff] %v6892_v1 }
0x108b   :  { %4725 = vmatmul.mubr.msk.f32.gmra.mxu0 %vm289_vm1, %v2863_v54  ;;  %3075 = vmatprep.mubr.f32.mxu1 %v7350_v56 }
0x108c   :  { %2956 = vmatprep.mubr.f32.mxu0 %v7350_v56 }
0x108d   :  { %v2994_v31 = vpop.permute.xlu0 %2993 }
0x108e   :  { %v2992_v41 = vpop.permute.xlu1 %2991 }
0x108f   :  { %4726 = vmatmul.mubr.msk.f32.gmra.mxu0 %vm289_vm1, %v2865_v33  ;;  %4728 = vmatmul.mubr.msk.f32.gmra.mxu1 %vm289_vm1, %v2992_v41 }
0x1090   :  { %3081 = vmatprep.mubr.f32.mxu1 %v7350_v56 }
0x1092   :  { %v2996_v24 = vpop.permute.xlu1 %2995 }
0x1093   :  { %4729 = vmatmul.mubr.msk.f32.gmra.mxu1 %vm289_vm1, %v2994_v31  ;;  %v6886_v31 = vld [vmem:[%s7275_s3 + $0x28] sm:$0xff] }
0x1094   :  { %3087 = vmatprep.mubr.f32.mxu1 %v7350_v56  ;;  %7362 = vst [vmem:[#allocation24_spill] sm:$0xff] %v6886_v31 }
0x1097   :  { %4730 = vmatmul.mubr.msk.f32.gmra.mxu1 %vm289_vm1, %v2996_v24 }
0x1098   :  { %3590 = vmatprep.mubr.f32.mxu1 %v6483_v39 }
0x1142   :  { %v2940_v45 = vpop.f32.mrf.mxu0 }
0x1143   :  { %v2963_v59 = vmul.f32 %v6867_v60, %v2940_v45 }
0x1144   :  { %v2942_v62 = vpop.f32.mrf.mxu0 }
0x1145   :  { %v2964_v33 = vmul.f32 %v6483_v39, %v2942_v62 }
0x1147   :  { %v2946_v9 = vpop.f32.mrf.mxu0 }
0x1148   :  { %v2965_v17 = vmul.f32 %v6861_v15, %v2946_v9 }
0x1149   :  { %v2948_v48 = vpop.f32.mrf.mxu0 }
0x114a   :  { %v3071_v23 = vpop.f32.mrf.mxu1  ;;  %v2966_v53 = vmul.f32 %v6873_v57, %v2948_v48  ;;  %v2971_v41 = vadd.f32 %v2965_v17, %v2963_v59  ;;  %v6898_v59 = vld [vmem:[%s7275_s3 + $0x38] sm:$0xff] }
0x114b   :  { %v2952_v11 = vpop.f32.mrf.mxu0  ;;  %7364 = vst [vmem:[#allocation26_spill] sm:$0xff] %v6898_v59 }
0x114c   :  { %v2967_v54 = vmul.f32 %v6879_v50, %v2952_v11  ;;  %v3073_v51 = vpop.f32.mrf.mxu1  ;;  %v2980_v9 = vadd.f32 %v2966_v53, %v2964_v33 }
0x114d   :  { %v2954_v21 = vpop.f32.mrf.mxu0 }
0x114e   :  { %v2968_v24 = vmul.f32 %v6886_v31, %v2954_v21  ;;  %v2972_v48 = vadd.f32 %v2971_v41, %v2967_v54 }
0x114f   :  { %v2958_v45 = vpop.f32.mrf.mxu0  ;;  %v3077_v50 = vpop.f32.mrf.mxu1 }
0x1150   :  { %v2969_v11 = vmul.f32 %v6892_v1, %v2958_v45  ;;  %v2981_v62 = vadd.f32 %v2980_v9, %v2968_v24 }
0x1151   :  { %v2960_v39 = vpop.f32.mrf.mxu0  ;;  %v3079_v33 = vpop.f32.mrf.mxu1 }
0x1152   :  { %v2973_v17 = vadd.f32 %v2972_v48, %v2969_v11  ;;  %v2970_v21 = vmul.f32 %v6898_v59, %v2960_v39 }
0x1153   :  { %v3083_v60 = vpop.f32.mrf.mxu1 }
0x1154   :  { %v2974_v53 = vrot.slane %v2973_v17, 4  ;;  %v2982_v54 = vadd.f32 %v2981_v62, %v2970_v21 }
0x1155   :  { %v3085_v9 = vpop.f32.mrf.mxu1 }
0x1156   :  { %v2975_v41 = vadd.f32 %v2974_v53, %v2973_v17  ;;  %v2983_v31 = vrot.slane %v2982_v54, 4 }
0x1157   :  { %v3089_v39 = vpop.f32.mrf.mxu1 }
0x1158   :  { %v2976_v15 = vrot.slane %v2975_v41, 2  ;;  %v2984_v57 = vadd.f32 %v2983_v31, %v2982_v54 }
0x115a   :  { %v2977_v45 = vadd.f32 %v2976_v15, %v2975_v41  ;;  %v2985_v1 = vrot.slane %v2984_v57, 2 }
0x115c   :  { %v2978_v63 = vrot.slane %v2977_v45, 1  ;;  %v2986_v24 = vadd.f32 %v2985_v1, %v2984_v57 }
0x115e   :  { %v2979_v48 = vadd.f32 %v2978_v63, %v2977_v45  ;;  %v2987_v11 = vrot.slane %v2986_v24, 1 }
0x1160   :  { %v3078_v0 = vadd.f32 %v3077_v50, %v2979_v48  ;;  %v2988_v7 = vadd.f32 %v2987_v11, %v2986_v24  ;;  %v3072_v3 = vadd.f32 %v3071_v23, %v2979_v48  ;;  %v3084_v2 = vadd.f32 %v3083_v60, %v2979_v48 }
0x1161   :  { %v3090_v59 = vadd.f32 %v3089_v39, %v2979_v48 }
0x1162   :  { %vm3096_vm14 = vcmp.gt.f32.partialorder %v3078_v0, 0.0  ;;  %v3104_v62 = vmul.f32 0.2, %v3078_v0  ;;  %v3080_v17 = vadd.f32 %v3079_v33, %v2988_v7  ;;  %vm3094_vm15 = vcmp.gt.f32.partialorder %v3072_v3, 0.0  ;;  %v3091_v33 = vpop.f32.mrf.mxu1 }
0x1163   :  { %vm3098_vm0 = vcmp.gt.f32.partialorder %v3084_v2, 0.0  ;;  %v3102_v31 = vmul.f32 0.2, %v3072_v3  ;;  %v3106_v21 = vmul.f32 0.2, %v3084_v2  ;;  %v3074_v15 = vadd.f32 %v3073_v51, %v2988_v7 }
0x1164   :  { %v3086_v53 = vadd.f32 %v3085_v9, %v2988_v7  ;;  %v3112_v54 = vsel %vm3096_vm14, %v3078_v0, %v3104_v62  ;;  %v3105_v1 = vmul.f32 0.2, %v3080_v17  ;;  %vm3097_vm2 = vcmp.gt.f32.partialorder %v3080_v17, 0.0 }
0x1165   :  { %v3110_v57 = vsel %vm3094_vm15, %v3072_v3, %v3102_v31  ;;  %v3114_v63 = vsel %vm3098_vm0, %v3084_v2, %v3106_v21  ;;  %vm3095_vm3 = vcmp.gt.f32.partialorder %v3074_v15, 0.0  ;;  %v3103_v60 = vmul.f32 0.2, %v3074_v15 }
0x1166   :  { %v3118_v50 = vadd.f32 %v6497_v58, %v3110_v57  ;;  %vm3099_vm4 = vcmp.gt.f32.partialorder %v3086_v53, 0.0  ;;  %v3122_v23 = vadd.f32 %v6503_v61, %v3114_v63  ;;  %v3107_v41 = vmul.f32 0.2, %v3086_v53 }
0x1167   :  { %vm3100_vm5 = vcmp.gt.f32.partialorder %v3090_v59, 0.0  ;;  %v3108_v45 = vmul.f32 0.2, %v3090_v59  ;;  %v3092_v24 = vadd.f32 %v3091_v33, %v2988_v7  ;;  %v3120_v51 = vadd.f32 %v6509_v55, %v3112_v54 }
0x1168   :  { %v3113_v9 = vsel %vm3097_vm2, %v3080_v17, %v3105_v1  ;;  %v3111_v0 = vsel %vm3095_vm3, %v3074_v15, %v3103_v60  ;;  %v3115_v48 = vsel %vm3099_vm4, %v3086_v53, %v3107_v41  ;;  %v3126_v11 = vmax.f32 %v3118_v50, %v3122_v23 }
0x1169   :  { %v3119_v2 = vadd.f32 %v6515_v36, %v3111_v0  ;;  %v3123_v3 = vadd.f32 %v6521_v44, %v3115_v48  ;;  %v3116_v58 = vsel %vm3100_vm5, %v3090_v59, %v3108_v45  ;;  %vm3101_vm6 = vcmp.gt.f32.partialorder %v3092_v24, 0.0 }
0x116a   :  { %v3124_v61 = vadd.f32 %v6527_v43, %v3116_v58  ;;  %v3109_v39 = vmul.f32 0.2, %v3092_v24  ;;  %v3121_v62 = vadd.f32 %v6533_v38, %v3113_v9  ;;  %vm4567_vm4 = vcmask 48128  }
0x116b   :  { %v3135_v7 = vmax.f32 %v3119_v2, %v3123_v3 }
0x116c   :  { %v3127_v31 = vmax.f32 %v3120_v51, %v3124_v61  ;;  %v3117_v21 = vsel %vm3101_vm6, %v3092_v24, %v3109_v39 }
0x116d   :  { %v3125_v55 = vadd.f32 %v6539_v46, %v3117_v21 }
0x116e   :  { %v3128_v17 = vmax.f32 %v3126_v11, %v3127_v31 }
0x116f   :  { %v3136_v15 = vmax.f32 %v3121_v62, %v3125_v55 }
0x1170   :  { %v3129_v53 = vrot.slane %v3128_v17, 4 }
0x1171   :  { %v3137_v54 = vmax.f32 %v3135_v7, %v3136_v15 }
0x1172   :  { %v3130_v36 = vmax.f32 %v3128_v17, %v3129_v53 }
0x1173   :  { %v3138_v1 = vrot.slane %v3137_v54, 4 }
0x1174   :  { %v3131_v44 = vrot.slane %v3130_v36, 2 }
0x1175   :  { %v3139_v59 = vmax.f32 %v3137_v54, %v3138_v1 }
0x1176   :  { %v3132_v57 = vmax.f32 %v3130_v36, %v3131_v44 }
0x1177   :  { %v3140_v63 = vrot.slane %v3139_v59, 2 }
0x1178   :  { %v3133_v60 = vrot.slane %v3132_v57, 1 }
0x1179   :  { %v3141_v43 = vmax.f32 %v3139_v59, %v3140_v63 }
0x117a   :  { %v3134_v41 = vmax.f32 %v3132_v57, %v3133_v60 }
0x117b   :  { %v3142_v33 = vrot.slane %v3141_v43, 1 }
0x117c   :  { %v3146_v38 = vsub.f32 %v3120_v51, %v3134_v41  ;;  %v3144_v24 = vsub.f32 %v3118_v50, %v3134_v41  ;;  %v3148_v0 = vsub.f32 %v3122_v23, %v3134_v41  ;;  %v3150_v39 = vsub.f32 %v3124_v61, %v3134_v41 }
0x117d   :  { %v3143_v45 = vmax.f32 %v3141_v43, %v3142_v33 }
0x117e   :  { %v3156_v46 = vmul.f32 1.442695, %v3146_v38  ;;  %v3152_v31 = vmul.f32 1.442695, %v3144_v24  ;;  %v3160_v17 = vmul.f32 1.442695, %v3148_v0 }
0x117f   :  { %v3147_v9 = vsub.f32 %v3121_v62, %v3143_v45  ;;  %v3145_v48 = vsub.f32 %v3119_v2, %v3143_v45  ;;  %v3149_v58 = vsub.f32 %v3123_v3, %v3143_v45  ;;  %v3151_v21 = vsub.f32 %v3125_v55, %v3143_v45 }
0x1180   :  { %5472 = vpow2.f32 %v3156_v46  ;;  %v3164_v53 = vmul.f32 1.442695, %v3150_v39 }
0x1181   :  { %v3158_v11 = vmul.f32 1.442695, %v3147_v9  ;;  %v3154_v7 = vmul.f32 1.442695, %v3145_v48  ;;  %v3162_v15 = vmul.f32 1.442695, %v3149_v58 }
0x1182   :  { %v3166_v54 = vmul.f32 1.442695, %v3151_v21 }
0x1183   :  { %5474 = vpow2.f32 %v3158_v11 }
0x1184   :  { %5476 = vpow2.f32 %v3152_v31 }
0x1185   :  { %5478 = vpow2.f32 %v3154_v7 }
0x1186   :  { %5480 = vpow2.f32 %v3160_v17 }
0x1187   :  { %5482 = vpow2.f32 %v3162_v15 }
0x1188   :  { %5484 = vpow2.f32 %v3164_v53 }
0x1189   :  { %5486 = vpow2.f32 %v3166_v54 }
0x118d   :  { %v5473_v50 = vpop.eup %5472 }
0x1190   :  { %v5475_v23 = vpop.eup %5474 }
0x1191   :  { %v5477_v51 = vpop.eup %5476 }
0x1192   :  { %v5479_v2 = vpop.eup %5478  ;;  %v3168_v3 = vadd.f32 %v5477_v51, %v5473_v50 }
0x1193   :  { %v5481_v61 = vpop.eup %5480  ;;  %v3177_v62 = vadd.f32 %v5479_v2, %v5475_v23 }
0x1194   :  { %v5483_v55 = vpop.eup %5482  ;;  %v3169_v36 = vadd.f32 %v5481_v61, %v3168_v3 }
0x1195   :  { %v5485_v1 = vpop.eup %5484  ;;  %v3178_v44 = vadd.f32 %v5483_v55, %v3177_v62 }
0x1196   :  { %v5487_v59 = vpop.eup %5486  ;;  %v3170_v57 = vadd.f32 %v5485_v1, %v3169_v36 }
0x1197   :  { %v3179_v63 = vadd.f32 %v5487_v59, %v3178_v44 }
0x1198   :  { %v3171_v60 = vrot.slane %v3170_v57, 4 }
0x1199   :  { %v3180_v43 = vrot.slane %v3179_v63, 4 }
0x119a   :  { %v3172_v41 = vadd.f32 %v3171_v60, %v3170_v57 }
0x119b   :  { %v3181_v33 = vadd.f32 %v3180_v43, %v3179_v63 }
0x119c   :  { %v3173_v38 = vrot.slane %v3172_v41, 2 }
0x119d   :  { %v3182_v45 = vrot.slane %v3181_v33, 2 }
0x119e   :  { %v3174_v24 = vadd.f32 %v3173_v38, %v3172_v41 }
0x119f   :  { %v3183_v9 = vadd.f32 %v3182_v45, %v3181_v33 }
0x11a0   :  { %v3175_v0 = vrot.slane %v3174_v24, 1 }
0x11a1   :  { %v3184_v46 = vrot.slane %v3183_v9, 1 }
0x11a2   :  { %v3176_v48 = vadd.f32 %v3175_v0, %v3174_v24 }
0x11a3   :  { %v3185_v58 = vadd.f32 %v3184_v46, %v3183_v9 }
0x11a4   :  { %5488 = vrcp.f32 %v3176_v48 }
0x11a5   :  { %5490 = vrcp.f32 %v3185_v58 }
0x11b1   :  { %v5489_v11 = vpop.eup %5488 }
0x11b2   :  { %v5491_v39 = vpop.eup %5490  ;;  %v3188_v31 = vmul.f32 %v5489_v11, %v5477_v51  ;;  %v3190_v7 = vmul.f32 %v5489_v11, %v5473_v50  ;;  %v3192_v15 = vmul.f32 %v5489_v11, %v5481_v61  ;;  %v3194_v54 = vmul.f32 %v5489_v11, %v5485_v1 }
0x11b3   :  { %v3189_v21 = vmul.f32 %v5491_v39, %v5479_v2  ;;  %v3191_v17 = vmul.f32 %v5491_v39, %v5475_v23  ;;  %v3193_v53 = vmul.f32 %v5491_v39, %v5483_v55  ;;  %v3195_v3 = vmul.f32 %v5491_v39, %v5487_v59 }
0x11b4   :  { %3196 = vxpose.xlu0.b32.start [1/4] (short) %v3188_v31, 128 }
0x11b5   :  { %3228 = vxpose.xlu1.b32.start [1/4] (short) %v3189_v21, 128 }
0x11b8   :  { %3197 = vxpose.xlu0.b32.cont [2/4] (short) %v3190_v7, 128 }
0x11b9   :  { %3229 = vxpose.xlu1.b32.cont [2/4] (short) %v3191_v17, 128 }
0x11bc   :  { %3198 = vxpose.xlu0.b32.cont [3/4] (short) %v3192_v15, 128 }
0x11bd   :  { %3230 = vxpose.xlu1.b32.cont [3/4] (short) %v3193_v53, 128 }
0x11c0   :  { %3199 = vxpose.xlu0.b32.end [4/4] (short) %v3194_v54, 128 }
0x11c1   :  { %3231 = vxpose.xlu1.b32.end [4/4] (short) %v3195_v3, 128 }
0x1230   :  { %v3212_v62 = vpop.trf.xlu0 }
0x1231   :  { %v3244_v36 = vpop.trf.xlu1 }
0x1234   :  { %v3213_v44 = vpop.trf.xlu0 }
0x1235   :  { %v3260_v57 = vpack.c.bf16 %v3213_v44, %v3212_v62  ;;  %v3245_v51 = vpop.trf.xlu1 }
0x1236   :  { %v3268_v62 = vpack.c.bf16 %v3245_v51, %v3244_v36 }
0x1237   :  { %5284 = vmatprep.mubr.msk.bf16.mxu0 %vm702_vm10, %v3260_v57 }
0x1238   :  { %v3214_v2 = vpop.trf.xlu0 }
0x1239   :  { %v3246_v23 = vpop.trf.xlu1 }
0x123c   :  { %v3215_v50 = vpop.trf.xlu0 }
0x123d   :  { %v3261_v63 = vpack.c.bf16 %v3215_v50, %v3214_v2  ;;  %v3247_v55 = vpop.trf.xlu1 }
0x123e   :  { %v3269_v57 = vpack.c.bf16 %v3247_v55, %v3246_v23 }
0x123f   :  { %5285 = vmatmul.mubr.msk.bf16.vlgmr.msra.gmra.mxu0 %vm702_vm10, %v3261_v63 }
0x1240   :  { %v3216_v61 = vpop.trf.xlu0  ;;  %3894 = vmatpush1.msra.mxu0 %v6830_v16 }
0x1241   :  { %v3248_v43 = vpop.trf.xlu1 }
0x1244   :  { %v3217_v1 = vpop.trf.xlu0 }
0x1245   :  { %v3262_v59 = vpack.c.bf16 %v3217_v1, %v3216_v61  ;;  %v3249_v38 = vpop.trf.xlu1 }
0x1246   :  { %v3270_v2 = vpack.c.bf16 %v3249_v38, %v3248_v43 }
0x1247   :  { %5288 = vmatprep.mubr.msk.bf16.mxu0 %vm702_vm10, %v3262_v59 }
0x1248   :  { %v3218_v60 = vpop.trf.xlu0 }
0x1249   :  { %v3250_v9 = vpop.trf.xlu1 }
0x124c   :  { %v3219_v41 = vpop.trf.xlu0 }
0x124d   :  { %v3263_v33 = vpack.c.bf16 %v3219_v41, %v3218_v60  ;;  %v3251_v48 = vpop.trf.xlu1 }
0x124e   :  { %v3271_v63 = vpack.c.bf16 %v3251_v48, %v3250_v9 }
0x124f   :  { %5289 = vmatmul.mubr.msk.bf16.gmra.mxu0 %vm702_vm10, %v3263_v33 }
0x1250   :  { %v3220_v45 = vpop.trf.xlu0 }
0x1251   :  { %v3252_v31 = vpop.trf.xlu1 }
0x1254   :  { %v3221_v24 = vpop.trf.xlu0 }
0x1255   :  { %v3264_v0 = vpack.c.bf16 %v3221_v24, %v3220_v45  ;;  %v3253_v17 = vpop.trf.xlu1 }
0x1256   :  { %v3272_v61 = vpack.c.bf16 %v3253_v17, %v3252_v31 }
0x1257   :  { %5292 = vmatprep.mubr.msk.bf16.mxu0 %vm702_vm10, %v3264_v0 }
0x1258   :  { %v3222_v46 = vpop.trf.xlu0 }
0x1259   :  { %v3254_v54 = vpop.trf.xlu1 }
0x125c   :  { %v3223_v58 = vpop.trf.xlu0 }
0x125d   :  { %v3265_v11 = vpack.c.bf16 %v3223_v58, %v3222_v46  ;;  %v3255_v44 = vpop.trf.xlu1 }
0x125e   :  { %v3273_v51 = vpack.c.bf16 %v3255_v44, %v3254_v54 }
0x125f   :  { %5293 = vmatmul.mubr.msk.bf16.gmra.mxu0 %vm702_vm10, %v3265_v11 }
0x1260   :  { %v3224_v39 = vpop.trf.xlu0 }
0x1261   :  { %v3256_v50 = vpop.trf.xlu1 }
0x1264   :  { %v3225_v21 = vpop.trf.xlu0 }
0x1265   :  { %v3266_v7 = vpack.c.bf16 %v3225_v21, %v3224_v39  ;;  %v3257_v1 = vpop.trf.xlu1 }
0x1266   :  { %v3274_v59 = vpack.c.bf16 %v3257_v1, %v3256_v50 }
0x1267   :  { %5296 = vmatprep.mubr.msk.bf16.mxu0 %vm702_vm10, %v3266_v7 }
0x1268   :  { %v3226_v15 = vpop.trf.xlu0 }
0x1269   :  { %v3258_v36 = vpop.trf.xlu1 }
0x126c   :  { %v3227_v53 = vpop.trf.xlu0 }
0x126d   :  { %v3267_v3 = vpack.c.bf16 %v3227_v53, %v3226_v15  ;;  %v3259_v23 = vpop.trf.xlu1 }
0x126e   :  { %v3275_v55 = vpack.c.bf16 %v3259_v23, %v3258_v36 }
0x126f   :  { %5297 = vmatmul.mubr.msk.bf16.gmra.mxu0 %vm702_vm10, %v3267_v3 }
0x1270   :  { %5300 = vmatprep.mubr.msk.bf16.mxu0 %vm702_vm10, %v3268_v62 }
0x1277   :  { %5301 = vmatmul.mubr.msk.bf16.gmra.mxu0 %vm702_vm10, %v3269_v57 }
0x1278   :  { %5304 = vmatprep.mubr.msk.bf16.mxu0 %vm702_vm10, %v3270_v2 }
0x127f   :  { %5305 = vmatmul.mubr.msk.bf16.gmra.mxu0 %vm702_vm10, %v3271_v63 }
0x1280   :  { %5308 = vmatprep.mubr.msk.bf16.mxu0 %vm702_vm10, %v3272_v61 }
0x1287   :  { %5309 = vmatmul.mubr.msk.bf16.gmra.mxu0 %vm702_vm10, %v3273_v51 }
0x1288   :  { %5312 = vmatprep.mubr.msk.bf16.mxu0 %vm702_vm10, %v3274_v59 }
0x128f   :  { %5313 = vmatmul.mubr.msk.bf16.gmra.mxu0 %vm702_vm10, %v3275_v55 }
0x1290   :  { %3927 = vmatprep.mubr.f32.mxu0 %v7350_v56 }
0x12ff   :  { %v6927_v60 = vpop.f32.mrf.mxu0 }
0x1301   :  { %v6929_v43 = vpop.f32.mrf.mxu0 }
0x1302   :  { %7365 = vst [vmem:[#allocation27_spill] sm:$0xff] %v6929_v43 }
0x1303   :  { %v6931_v41 = vpop.f32.mrf.mxu0 }
0x1305   :  { %v6933_v33 = vpop.f32.mrf.mxu0 }
0x130f   :  { %v6935_v38 = vpop.f32.mrf.mxu0 }
0x1311   :  { %v6937_v45 = vpop.f32.mrf.mxu0 }
0x1313   :  { %v5291_v24 = vpop.f32.mrf.mxu0 }
0x1315   :  { %v6939_v9 = vpop.f32.mrf.mxu0 }
0x131f   :  { %v5294_v0 = vpop.f32.mrf.mxu0 }
0x1321   :  { %v3392_v46 = vpop.f32.mrf.mxu0 }
0x1323   :  { %v5295_v48 = vpop.f32.mrf.mxu0 }
0x1325   :  { %v3395_v58 = vpop.f32.mrf.mxu0 }
0x132f   :  { %v5298_v11 = vpop.f32.mrf.mxu0 }
0x1330   :  { %v3501_v56 = vmul.f32 %v6613_v12, %v5298_v11  ;;  %v5410_v11 = vld [vmem:[#allocation7 + $0x8] sm:$0xff]  }
0x1331   :  { %v3408_v39 = vpop.f32.mrf.mxu0 }
0x1333   :  { %v5299_v31 = vpop.f32.mrf.mxu0 }
0x1334   :  { %v3502_v59 = vmul.f32 %v6601_v32, %v5299_v31  ;;  %v7381_v31 = vld [vmem:[#allocation18_spill] sm:$0xff] }
0x1335   :  { %v3411_v21 = vpop.f32.mrf.mxu0 }
0x1336   :  { %v3500_v43 = vmul.f32 %v6625_v4, %v3411_v21  ;;  %v3496_v4 = vmul.f32 %v6673_v34, %v3395_v58  ;;  %v3492_v34 = vmul.f32 %v6726_v29, %v6939_v9  ;;  %v7368_v29 = vld [vmem:[#allocation14_spill] sm:$0xff]  ;;  %v7377_v9 = vld [vmem:[#allocation24_spill] sm:$0xff] }
0x1337   :  { %v6941_v7 = vpop.f32.mrf.mxu0  ;;  %v5409_v58 = vld [vmem:[#allocation7 + $0x10] sm:$0xff]  }
0x1339   :  { %v6943_v17 = vpop.f32.mrf.mxu0 }
0x133a   :  { %7366 = vst [vmem:[#allocation28_spill] sm:$0xff] %v6943_v17 }
0x133b   :  { %v5303_v15 = vpop.f32.mrf.mxu0 }
0x133d   :  { %v6945_v53 = vpop.f32.mrf.mxu0 }
0x133f   :  { %v5306_v54 = vpop.f32.mrf.mxu0 }
0x1341   :  { %v3440_v3 = vpop.f32.mrf.mxu0 }
0x1343   :  { %v5307_v62 = vpop.f32.mrf.mxu0 }
0x1345   :  { %v3443_v44 = vpop.f32.mrf.mxu0 }
0x1347   :  { %v5310_v57 = vpop.f32.mrf.mxu0 }
0x1348   :  { %v3513_v12 = vmul.f32 %v6655_v5, %v5310_v57  ;;  %v3509_v5 = vmul.f32 %v6705_v49, %v5306_v54  ;;  %v3505_v49 = vmul.f32 %v6761_v37, %v6941_v7  ;;  %v4747_v7 = vld [vmem:[#allocation6] ss:$0 sm:$0xff] }
0x1349   :  { %v3456_v2 = vpop.f32.mrf.mxu0 }
0x134b   :  { %v5311_v50 = vpop.f32.mrf.mxu0 }
0x134c   :  { %v3514_v32 = vmul.f32 %v6643_v30, %v5311_v50  ;;  %v3510_v30 = vmul.f32 %v6692_v52, %v5307_v62  ;;  %v3506_v52 = vmul.f32 %v6747_v26, %v5303_v15 }
0x134d   :  { %v3459_v63 = vpop.f32.mrf.mxu0 }
0x134f   :  { %v5314_v61 = vpop.f32.mrf.mxu0 }
0x1350   :  { %v3517_v55 = vmul.f32 %v6607_v19, %v5314_v61  ;;  %v3498_v19 = vmul.f32 %v6649_v14, %v5295_v48  ;;  %v3494_v14 = vmul.f32 %v6698_v42, %v5291_v24  ;;  %v3490_v42 = vmul.f32 %v6754_v25, %v6931_v41  ;;  %v7372_v41 = vld [vmem:[#allocation27_spill] sm:$0xff] }
0x1351   :  { %v3472_v1 = vpop.f32.mrf.mxu0  ;;  %v7376_v24 = vld [vmem:[#allocation19_spill] sm:$0xff] }
0x1352   :  { %v3515_v17 = vmul.f32 %v6631_v22, %v3472_v1  ;;  %v3511_v22 = vmul.f32 %v6679_v8, %v3456_v2  ;;  %v3507_v8 = vmul.f32 %v6733_v47, %v3440_v3  ;;  %v3504_v47 = vmul.f32 %v7368_v29, %v6945_v53  ;;  %v5408_v48 = vld [vmem:[#allocation7 + $0x18] sm:$0xff]  }
0x1353   :  { %v5315_v36 = vpop.f32.mrf.mxu0 }
0x1354   :  { %v3518_v51 = vmul.f32 %v6595_v20, %v5315_v36  ;;  %v3499_v20 = vmul.f32 %v6637_v27, %v3408_v39  ;;  %v3495_v27 = vmul.f32 %v6685_v13, %v3392_v46  ;;  %v3491_v13 = vmul.f32 %v6740_v40, %v6937_v45  ;;  %v7369_v40 = vld [vmem:[#allocation15_spill] sm:$0xff]  ;;  %v7375_v45 = vld [vmem:[#allocation22_spill] sm:$0xff]  ;;  %v7380_v46 = vld [vmem:[#allocation25_spill] sm:$0xff] }
0x1355   :  { %v3475_v23 = vpop.f32.mrf.mxu0  ;;  %v3488_v26 = vmul.f32 %v7369_v40, %v6933_v33  ;;  %v7378_v33 = vld [vmem:[#allocation23_spill] sm:$0xff]  ;;  %v5411_v39 = vld [vmem:[#allocation7] sm:$0xff]  }
0x1356   :  { %5008 = vmatprep.subr.mxu1 %v3518_v51  ;;  %v3516_v16 = vmul.f32 %v6619_v6, %v3475_v23  ;;  %v3497_v6 = vmul.f32 %v6661_v28, %v5294_v0  ;;  %v3493_v28 = vmul.f32 %v6712_v35, %v6935_v38  ;;  %v7367_v35 = vld [vmem:[#allocation13_spill] sm:$0xff]  ;;  %v7379_v0 = vld [vmem:[#allocation26_spill] sm:$0xff] }
0x1357   :  { %5009 = vmatpush3.msra.mxu1 %v3502_v59  ;;  %v7373_v38 = vld [vmem:[#allocation17_spill] sm:$0xff] }
0x1358   :  { %5010 = vmatprep.subr.mxu1 %v3517_v55  ;;  %v3487_v37 = vmul.f32 %v7373_v38, %v7372_v41 }
0x1359   :  { %5011 = vmatpush3.msra.mxu1 %v3501_v56  ;;  %v3512_v56 = vmul.f32 %v6667_v18, %v3459_v63  ;;  %v3508_v18 = vmul.f32 %v6719_v10, %v3443_v44  ;;  %v3489_v10 = vmul.f32 %v7367_v35, %v6927_v60  ;;  %v7374_v60 = vld [vmem:[#allocation20_spill] sm:$0xff] }
0x135a   :  { %5012 = vmatprep.subr.mxu1 %v3516_v16  ;;  %v7370_v16 = vld [vmem:[#allocation28_spill] sm:$0xff] }
0x135b   :  { %5013 = vmatpush3.msra.mxu1 %v3500_v43  ;;  %v7371_v43 = vld [vmem:[#allocation16_spill] sm:$0xff] }
0x135c   :  { %5014 = vmatprep.subr.mxu1 %v3515_v17  ;;  %v3503_v25 = vmul.f32 %v7371_v43, %v7370_v16 }
0x135d   :  { %5015 = vmatpush3.msra.mxu1 %v3499_v20 }
0x135e   :  { %5016 = vmatprep.subr.mxu1 %v3514_v32 }
0x135f   :  { %5017 = vmatpush3.msra.mxu1 %v3498_v19 }
0x1360   :  { %5018 = vmatprep.subr.mxu1 %v3513_v12 }
0x1361   :  { %5019 = vmatpush3.msra.mxu1 %v3497_v6 }
0x1362   :  { %5020 = vmatprep.subr.mxu1 %v3512_v56 }
0x1363   :  { %5021 = vmatpush3.msra.mxu1 %v3496_v4 }
0x1364   :  { %5022 = vmatprep.subr.mxu1 %v3511_v22  ;;  %v7382_v22 = vld [vmem:[#allocation21_spill] sm:$0xff] }
0x1365   :  { %5023 = vmatpush3.msra.mxu1 %v3495_v27  ;;  %v7383_v27 = vmov 0.0  }
0x1366   :  { %5024 = vmatprep.subr.mxu1 %v3510_v30 }
0x1367   :  { %5025 = vmatpush3.msra.mxu1 %v3494_v14 }
0x1368   :  { %5026 = vmatprep.subr.mxu1 %v3509_v5 }
0x1369   :  { %5027 = vmatpush3.msra.mxu1 %v3493_v28 }
0x136a   :  { %5028 = vmatprep.subr.mxu1 %v3508_v18 }
0x136b   :  { %5029 = vmatpush3.msra.mxu1 %v3492_v34 }
0x136c   :  { %5030 = vmatprep.subr.mxu1 %v3507_v8 }
0x136d   :  { %5031 = vmatpush3.msra.mxu1 %v3491_v13 }
0x136e   :  { %5032 = vmatprep.subr.mxu1 %v3506_v52 }
0x136f   :  { %5033 = vmatpush3.msra.mxu1 %v3490_v42 }
0x1370   :  { %5034 = vmatprep.subr.mxu1 %v3505_v49 }
0x1371   :  { %5035 = vmatpush3.msra.mxu1 %v3489_v10 }
0x1372   :  { %5036 = vmatprep.subr.mxu1 %v3504_v47  ;;  %v5587_v47 = vld [vmem:[%s7275_s3 + $0x8] sm:$0xff] }
0x1373   :  { %5037 = vmatpush3.msra.mxu1 %v3488_v26 }
0x1374   :  { %5038 = vmatprep.subr.mxu1 %v3503_v25 }
0x1375   :  { %5039 = vmatpush3.msra.mxu1 %v3487_v37 }
0x1376   :  { %3591 = vmatmul.mubr.f32.vlgmr.msra.gmra.mxu1 %v7374_v60  ;;  %5316 = vmatprep.subr.bf16.mxu1 %v5408_v48 }
0x1377   :  { %3595 = vmatprep.mubr.f32.mxu1 %v7375_v45  ;;  %5317 = vmatpush3.bf16.msra.mxu1 %v5408_v48 }
0x1378   :  { %5318 = vmatprep.subr.bf16.mxu1 %v5409_v58 }
0x137a   :  { %3596 = vmatmul.mubr.f32.gmra.mxu1 %v7376_v24 }
0x137b   :  { %3600 = vmatprep.mubr.f32.mxu1 %v7377_v9  ;;  %5319 = vmatpush3.bf16.msra.mxu1 %v5409_v58 }
0x137c   :  { %5320 = vmatprep.subr.bf16.mxu1 %v5410_v11 }
0x137e   :  { %3601 = vmatmul.mubr.f32.gmra.mxu1 %v7378_v33 }
0x137f   :  { %3605 = vmatprep.mubr.f32.mxu1 %v7379_v0  ;;  %5321 = vmatpush3.bf16.msra.mxu1 %v5410_v11 }
0x1380   :  { %5322 = vmatprep.subr.bf16.mxu1 %v5411_v39 }
0x1382   :  { %3606 = vmatmul.mubr.f32.gmra.mxu1 %v7380_v46 }
0x1383   :  { %5323 = vmatpush3.bf16.msra.mxu1 %v5411_v39 }
0x1384   :  { %3762 = vmatprep.subr.mxu1 %v7381_v31 }
0x1436   :  { %v5040_v21 = vpop.f32.mrf.mxu1 }
0x1438   :  { %v5041_v17 = vpop.f32.mrf.mxu1 }
0x1439   :  { %v5042_v15 = vadd.f32 %v5041_v17, %v5040_v21 }
0x143a   :  { %v5043_v53 = vpop.f32.mrf.mxu1 }
0x143b   :  { %v3593_v54 = vadd.f32 %v5042_v15, %v4747_v7 }
0x143c   :  { %v5044_v3 = vpop.f32.mrf.mxu1 }
0x143d   :  { %v5045_v62 = vadd.f32 %v5044_v3, %v5043_v53  ;;  %v3615_v57 = vmul.f32 0.2, %v3593_v54  ;;  %vm3611_vm7 = vcmp.gt.f32.partialorder %v3593_v54, 0.0 }
0x143e   :  { %v5046_v44 = vpop.f32.mrf.mxu1 }
0x143f   :  { %v3598_v2 = vadd.f32 %v5045_v62, %v4747_v7  ;;  %v3619_v36 = vsel %vm3611_vm7, %v3593_v54, %v3615_v57 }
0x1440   :  { %v5047_v50 = vpop.f32.mrf.mxu1 }
0x1441   :  { %vm3612_vm8 = vcmp.gt.f32.partialorder %v3598_v2, 0.0  ;;  %v3616_v63 = vmul.f32 0.2, %v3598_v2  ;;  %v5048_v61 = vadd.f32 %v5047_v50, %v5046_v44 }
0x1442   :  { %v5049_v1 = vpop.f32.mrf.mxu1 }
0x1443   :  { %v3620_v51 = vsel %vm3612_vm8, %v3598_v2, %v3616_v63  ;;  %v3603_v59 = vadd.f32 %v5048_v61, %v4747_v7 }
0x1444   :  { %v5050_v23 = vpop.f32.mrf.mxu1  ;;  %v3631_v55 = vpack.c.bf16 %v3620_v51, %v3619_v36 }
0x1445   :  { %v5051_v20 = vadd.f32 %v5050_v23, %v5049_v1  ;;  %v3617_v32 = vmul.f32 0.2, %v3603_v59  ;;  %vm3613_vm9 = vcmp.gt.f32.partialorder %v3603_v59, 0.0 }
0x1446   :  { %5324 = vmatprep.mubr.msk.bf16.mxu1 %vm1082_vm13, %v3631_v55 }
0x1447   :  { %v3608_v19 = vadd.f32 %v5051_v20, %v4747_v7  ;;  %v3621_v6 = vsel %vm3613_vm9, %v3603_v59, %v3617_v32 }
0x1449   :  { %vm3614_vm11 = vcmp.gt.f32.partialorder %v3608_v19, 0.0  ;;  %v3618_v12 = vmul.f32 0.2, %v3608_v19 }
0x144b   :  { %v3622_v56 = vsel %vm3614_vm11, %v3608_v19, %v3618_v12 }
0x144c   :  { %v3632_v4 = vpack.c.bf16 %v3622_v56, %v3621_v6 }
0x144e   :  { %5325 = vmatmul.mubr.msk.bf16.vlgmr.msra.gmra.mxu1 %vm1082_vm13, %v3632_v4 }
0x144f   :  { %3763 = vmatpush1.msra.mxu1 %v7382_v22  ;;  %3796 = vmatprep.mubr.f32.mxu1 %v7383_v27 }
0x150e   :  { %v5326_v30 = vpop.f32.mrf.mxu1 }
0x1510   :  { %v3697_v14 = vpop.f32.mrf.mxu1 }
0x1511   :  { %3716 = vrot.lane.b32.xlu0 %v3697_v14, %s5718_s4 }
0x1512   :  { %v5327_v5 = vpop.f32.mrf.mxu1 }
0x1513   :  { %v4135_v28 = vpack.c.bf16 %v5327_v5, %v5326_v30 }
0x1514   :  { %v3700_v18 = vpop.f32.mrf.mxu1 }
0x1515   :  { %3720 = vrot.lane.b32.xlu0 %v5326_v30, %s5718_s4  ;;  %5328 = vmatprep.subr.bf16.mxu1 %v4135_v28  ;;  %v4134_v8 = vpack.c.bf16 %v3700_v18, %v3697_v14 }
0x1516   :  { %3718 = vrot.lane.b32.xlu1 %v3700_v18, %s5718_s4 }
0x1519   :  { %3847 = vrot.lane.b32.xlu0 %v3697_v14, %s5719_s24 }
0x151a   :  { %3722 = vrot.lane.b32.xlu1 %v5327_v5, %s5718_s4 }
0x151d   :  { %3851 = vrot.lane.b32.xlu0 %v5326_v30, %s5719_s24 }
0x151e   :  { %3849 = vrot.lane.b32.xlu1 %v3700_v18, %s5719_s24 }
0x1522   :  { %3853 = vrot.lane.b32.xlu1 %v5327_v5, %s5719_s24 }
0x1583   :  { %v3717_v34 = vpop.permute.xlu0 %3716 }
0x1584   :  { %4754 = vmatmul.mubr.msk.f32.vlgmr.msra.gmra.mxu1 %vm289_vm1, %v3717_v34 }
0x1585   :  { %5329 = vmatpush3.bf16.msra.mxu1 %v4135_v28  ;;  %3802 = vmatprep.mubr.f32.mxu1 %v7383_v27 }
0x1586   :  { %5330 = vmatprep.subr.bf16.mxu1 %v4134_v8 }
0x1587   :  { %v3721_v13 = vpop.permute.xlu0 %3720 }
0x1588   :  { %v3719_v52 = vpop.permute.xlu1 %3718 }
0x1589   :  { %4755 = vmatmul.mubr.msk.f32.gmra.mxu1 %vm289_vm1, %v3719_v52  ;;  %v5589_v52 = vld [vmem:[%s7330_s18 + $0x20] sm:$0xff] }
0x158a   :  { %5331 = vmatpush3.bf16.msra.mxu1 %v4134_v8  ;;  %3808 = vmatprep.mubr.f32.mxu1 %v7383_v27  ;;  %v5588_v8 = vld [vmem:[%s7330_s18] sm:$0xff] }
0x158b   :  { %v3848_v42 = vpop.permute.xlu0 %3847 }
0x158c   :  { %v3723_v49 = vpop.permute.xlu1 %3722  ;;  %4758 = vmatmul.mubr.msk.f32.vlgmr.msra.gmra.mxu0 %vm289_vm1, %v3848_v42 }
0x158d   :  { %4756 = vmatmul.mubr.msk.f32.gmra.mxu1 %vm289_vm1, %v3721_v13  ;;  %3933 = vmatprep.mubr.f32.mxu0 %v7383_v27 }
0x158e   :  { %3814 = vmatprep.mubr.f32.mxu1 %v7383_v27 }
0x158f   :  { %v3852_v10 = vpop.permute.xlu0 %3851 }
0x1590   :  { %v3850_v35 = vpop.permute.xlu1 %3849 }
0x1591   :  { %4757 = vmatmul.mubr.msk.f32.gmra.mxu1 %vm289_vm1, %v3723_v49  ;;  %4759 = vmatmul.mubr.msk.f32.gmra.mxu0 %vm289_vm1, %v3850_v35 }
0x1592   :  { %3939 = vmatprep.mubr.f32.mxu0 %v7383_v27 }
0x1594   :  { %v3854_v29 = vpop.permute.xlu1 %3853 }
0x1595   :  { %4760 = vmatmul.mubr.msk.f32.gmra.mxu0 %vm289_vm1, %v3852_v10 }
0x1596   :  { %3945 = vmatprep.mubr.f32.mxu0 %v7383_v27 }
0x1599   :  { %4761 = vmatmul.mubr.msk.f32.gmra.mxu0 %vm289_vm1, %v3854_v29 }
0x159a   :  { %4441 = vmatprep.mubr.f32.mxu0 %v5587_v47 }
0x1644   :  { %v3798_v40 = vpop.f32.mrf.mxu1 }
0x1645   :  { %v3821_v37 = vmul.f32 %v7374_v60, %v3798_v40  ;;  %v5590_v40 = vld [vmem:[%s7330_s18 + $0x10] sm:$0xff] }
0x1646   :  { %v3800_v26 = vpop.f32.mrf.mxu1 }
0x1647   :  { %v3822_v31 = vmul.f32 %v5587_v47, %v3800_v26 }
0x1649   :  { %v3804_v16 = vpop.f32.mrf.mxu1 }
0x164a   :  { %v3823_v25 = vmul.f32 %v7376_v24, %v3804_v16 }
0x164b   :  { %v3806_v43 = vpop.f32.mrf.mxu1 }
0x164c   :  { %v3929_v41 = vpop.f32.mrf.mxu0  ;;  %v3824_v48 = vmul.f32 %v7375_v45, %v3806_v43  ;;  %v3829_v21 = vadd.f32 %v3823_v25, %v3821_v37  ;;  %v5592_v37 = vld [vmem:[%s7330_s18 + $0x28] sm:$0xff] }
0x164d   :  { %v3810_v38 = vpop.f32.mrf.mxu1 }
0x164e   :  { %v3825_v58 = vmul.f32 %v7378_v33, %v3810_v38  ;;  %v3931_v11 = vpop.f32.mrf.mxu0  ;;  %v3838_v15 = vadd.f32 %v3824_v48, %v3822_v31 }
0x164f   :  { %v3812_v39 = vpop.f32.mrf.mxu1 }
0x1650   :  { %v3826_v7 = vmul.f32 %v7377_v9, %v3812_v39  ;;  %v3830_v53 = vadd.f32 %v3829_v21, %v3825_v58  ;;  %v5593_v39 = vld [vmem:[%s7330_s18 + $0x30] sm:$0xff] }
0x1651   :  { %v3816_v17 = vpop.f32.mrf.mxu1  ;;  %v3935_v24 = vpop.f32.mrf.mxu0 }
0x1652   :  { %v3827_v54 = vmul.f32 %v7380_v46, %v3816_v17  ;;  %v3839_v62 = vadd.f32 %v3838_v15, %v3826_v7  ;;  %v5594_v7 = vld [vmem:[%s7330_s18 + $0x18] sm:$0xff] }
0x1653   :  { %v3818_v3 = vpop.f32.mrf.mxu1  ;;  %v3937_v33 = vpop.f32.mrf.mxu0 }
0x1654   :  { %v3831_v44 = vadd.f32 %v3830_v53, %v3827_v54  ;;  %v3828_v60 = vmul.f32 %v7379_v0, %v3818_v3 }
0x1655   :  { %v3941_v1 = vpop.f32.mrf.mxu0 }
0x1656   :  { %v3832_v45 = vrot.slane %v3831_v44, 4  ;;  %v3840_v57 = vadd.f32 %v3839_v62, %v3828_v60 }
0x1657   :  { %v3943_v23 = vpop.f32.mrf.mxu0 }
0x1658   :  { %v3833_v2 = vadd.f32 %v3832_v45, %v3831_v44  ;;  %v3841_v50 = vrot.slane %v3840_v57, 4 }
0x1659   :  { %v3947_v0 = vpop.f32.mrf.mxu0 }
0x165a   :  { %v3834_v63 = vrot.slane %v3833_v2, 2  ;;  %v3842_v61 = vadd.f32 %v3841_v50, %v3840_v57 }
0x165b   :  { %v3949_v10 = vpop.f32.mrf.mxu0 }
0x165c   :  { %v3835_v9 = vadd.f32 %v3834_v63, %v3833_v2  ;;  %v3843_v36 = vrot.slane %v3842_v61, 2 }
0x165e   :  { %v3836_v51 = vrot.slane %v3835_v9, 1  ;;  %v3844_v59 = vadd.f32 %v3843_v36, %v3842_v61 }
0x1660   :  { %v3837_v46 = vadd.f32 %v3836_v51, %v3835_v9  ;;  %v3845_v55 = vrot.slane %v3844_v59, 1 }
0x1662   :  { %v3936_v20 = vadd.f32 %v3935_v24, %v3837_v46  ;;  %v3846_v32 = vadd.f32 %v3845_v55, %v3844_v59  ;;  %v3930_v19 = vadd.f32 %v3929_v41, %v3837_v46  ;;  %v3942_v12 = vadd.f32 %v3941_v1, %v3837_v46  ;;  %v5591_v41 = vld [vmem:[%s7330_s18 + $0x8] sm:$0xff]  ;;  %v5595_v24 = vld [vmem:[%s7330_s18 + $0x38] sm:$0xff] }
0x1663   :  { %v3948_v6 = vadd.f32 %v3947_v0, %v3837_v46 }
0x1664   :  { %vm3954_vm1 = vcmp.gt.f32.partialorder %v3936_v20, 0.0  ;;  %v3962_v56 = vmul.f32 0.2, %v3936_v20  ;;  %v3938_v4 = vadd.f32 %v3937_v33, %v3846_v32  ;;  %vm3952_vm13 = vcmp.gt.f32.partialorder %v3930_v19, 0.0 }
0x1665   :  { %vm3956_vm12 = vcmp.gt.f32.partialorder %v3942_v12, 0.0  ;;  %v3960_v22 = vmul.f32 0.2, %v3930_v19  ;;  %v3964_v27 = vmul.f32 0.2, %v3942_v12  ;;  %v3932_v30 = vadd.f32 %v3931_v11, %v3846_v32 }
0x1666   :  { %v3944_v14 = vadd.f32 %v3943_v23, %v3846_v32  ;;  %v3970_v5 = vsel %vm3954_vm1, %v3936_v20, %v3962_v56  ;;  %v3963_v28 = vmul.f32 0.2, %v3938_v4  ;;  %vm3955_vm14 = vcmp.gt.f32.partialorder %v3938_v4, 0.0 }
0x1667   :  { %v3968_v18 = vsel %vm3952_vm13, %v3930_v19, %v3960_v22  ;;  %v3972_v34 = vsel %vm3956_vm12, %v3942_v12, %v3964_v27  ;;  %vm3953_vm15 = vcmp.gt.f32.partialorder %v3932_v30, 0.0  ;;  %v3961_v49 = vmul.f32 0.2, %v3932_v30 }
0x1668   :  { %v3976_v13 = vadd.f32 %v5588_v8, %v3968_v18  ;;  %vm3957_vm0 = vcmp.gt.f32.partialorder %v3944_v14, 0.0  ;;  %v3980_v42 = vadd.f32 %v5589_v52, %v3972_v34  ;;  %v3965_v35 = vmul.f32 0.2, %v3944_v14 }
0x1669   :  { %vm3958_vm2 = vcmp.gt.f32.partialorder %v3948_v6, 0.0  ;;  %v3966_v29 = vmul.f32 0.2, %v3948_v6  ;;  %v3950_v47 = vadd.f32 %v3949_v10, %v3846_v32  ;;  %v3978_v26 = vadd.f32 %v5590_v40, %v3970_v5 }
0x166a   :  { %v3971_v16 = vsel %vm3955_vm14, %v3938_v4, %v3963_v28  ;;  %v3969_v43 = vsel %vm3953_vm15, %v3932_v30, %v3961_v49  ;;  %v3973_v25 = vsel %vm3957_vm0, %v3944_v14, %v3965_v35  ;;  %v3984_v11 = vmax.f32 %v3976_v13, %v3980_v42 }
0x166b   :  { %v3977_v38 = vadd.f32 %v5591_v41, %v3969_v43  ;;  %v3981_v48 = vadd.f32 %v5592_v37, %v3973_v25  ;;  %v3974_v58 = vsel %vm3958_vm2, %v3948_v6, %v3966_v29  ;;  %vm3959_vm3 = vcmp.gt.f32.partialorder %v3950_v47, 0.0 }
0x166c   :  { %v3982_v31 = vadd.f32 %v5593_v39, %v3974_v58  ;;  %v3967_v21 = vmul.f32 0.2, %v3950_v47  ;;  %v3979_v17 = vadd.f32 %v5594_v7, %v3971_v16 }
0x166d   :  { %v3993_v54 = vmax.f32 %v3977_v38, %v3981_v48 }
0x166e   :  { %v3985_v15 = vmax.f32 %v3978_v26, %v3982_v31  ;;  %v3975_v53 = vsel %vm3959_vm3, %v3950_v47, %v3967_v21 }
0x166f   :  { %v3983_v3 = vadd.f32 %v5595_v24, %v3975_v53 }
0x1670   :  { %v3986_v62 = vmax.f32 %v3984_v11, %v3985_v15 }
0x1671   :  { %v3994_v44 = vmax.f32 %v3979_v17, %v3983_v3 }
0x1672   :  { %v3987_v60 = vrot.slane %v3986_v62, 4 }
0x1673   :  { %v3995_v45 = vmax.f32 %v3993_v54, %v3994_v44 }
0x1674   :  { %v3988_v57 = vmax.f32 %v3986_v62, %v3987_v60 }
0x1675   :  { %v3996_v33 = vrot.slane %v3995_v45, 4 }
0x1676   :  { %v3989_v2 = vrot.slane %v3988_v57, 2 }
0x1677   :  { %v3997_v50 = vmax.f32 %v3995_v45, %v3996_v33 }
0x1678   :  { %v3990_v63 = vmax.f32 %v3988_v57, %v3989_v2 }
0x1679   :  { %v3998_v61 = vrot.slane %v3997_v50, 2 }
0x167a   :  { %v3991_v1 = vrot.slane %v3990_v63, 1 }
0x167b   :  { %v3999_v9 = vmax.f32 %v3997_v50, %v3998_v61 }
0x167c   :  { %v3992_v36 = vmax.f32 %v3990_v63, %v3991_v1 }
0x167d   :  { %v4000_v51 = vrot.slane %v3999_v9, 1 }
0x167e   :  { %v4004_v59 = vsub.f32 %v3978_v26, %v3992_v36  ;;  %v4002_v46 = vsub.f32 %v3976_v13, %v3992_v36  ;;  %v4006_v20 = vsub.f32 %v3980_v42, %v3992_v36  ;;  %v4008_v6 = vsub.f32 %v3982_v31, %v3992_v36 }
0x167f   :  { %v4001_v23 = vmax.f32 %v3999_v9, %v4000_v51 }
0x1680   :  { %v4014_v32 = vmul.f32 1.442695, %v4004_v59  ;;  %v4010_v56 = vmul.f32 1.442695, %v4002_v46  ;;  %v4018_v27 = vmul.f32 1.442695, %v4006_v20 }
0x1681   :  { %v4005_v55 = vsub.f32 %v3979_v17, %v4001_v23  ;;  %v4003_v19 = vsub.f32 %v3977_v38, %v4001_v23  ;;  %v4007_v12 = vsub.f32 %v3981_v48, %v4001_v23  ;;  %v4009_v4 = vsub.f32 %v3983_v3, %v4001_v23 }
0x1682   :  { %5492 = vpow2.f32 %v4014_v32  ;;  %v4022_v14 = vmul.f32 1.442695, %v4008_v6 }
0x1683   :  { %v4016_v0 = vmul.f32 1.442695, %v4005_v55  ;;  %v4012_v22 = vmul.f32 1.442695, %v4003_v19  ;;  %v4020_v30 = vmul.f32 1.442695, %v4007_v12 }
0x1684   :  { %v4024_v5 = vmul.f32 1.442695, %v4009_v4 }
0x1685   :  { %5494 = vpow2.f32 %v4016_v0 }
0x1686   :  { %5496 = vpow2.f32 %v4010_v56 }
0x1687   :  { %5498 = vpow2.f32 %v4012_v22 }
0x1688   :  { %5500 = vpow2.f32 %v4018_v27 }
0x1689   :  { %5502 = vpow2.f32 %v4020_v30 }
0x168a   :  { %5504 = vpow2.f32 %v4022_v14 }
0x168b   :  { %5506 = vpow2.f32 %v4024_v5 }
0x168f   :  { %v5493_v28 = vpop.eup %5492 }
0x1692   :  { %v5495_v18 = vpop.eup %5494 }
0x1693   :  { %v5497_v34 = vpop.eup %5496 }
0x1694   :  { %v5499_v8 = vpop.eup %5498  ;;  %v4026_v13 = vadd.f32 %v5497_v34, %v5493_v28 }
0x1695   :  { %v5501_v52 = vpop.eup %5500  ;;  %v4035_v42 = vadd.f32 %v5499_v8, %v5495_v18 }
0x1696   :  { %v5503_v49 = vpop.eup %5502  ;;  %v4027_v35 = vadd.f32 %v5501_v52, %v4026_v13 }
0x1697   :  { %v5505_v10 = vpop.eup %5504  ;;  %v4036_v29 = vadd.f32 %v5503_v49, %v4035_v42 }
0x1698   :  { %v5507_v47 = vpop.eup %5506  ;;  %v4028_v40 = vadd.f32 %v5505_v10, %v4027_v35 }
0x1699   :  { %v4037_v26 = vadd.f32 %v5507_v47, %v4036_v29 }
0x169a   :  { %v4029_v16 = vrot.slane %v4028_v40, 4 }
0x169b   :  { %v4038_v43 = vrot.slane %v4037_v26, 4 }
0x169c   :  { %v4030_v25 = vadd.f32 %v4029_v16, %v4028_v40 }
0x169d   :  { %v4039_v41 = vadd.f32 %v4038_v43, %v4037_v26 }
0x169e   :  { %v4031_v38 = vrot.slane %v4030_v25, 2 }
0x169f   :  { %v4040_v37 = vrot.slane %v4039_v41, 2 }
0x16a0   :  { %v4032_v48 = vadd.f32 %v4031_v38, %v4030_v25 }
0x16a1   :  { %v4041_v58 = vadd.f32 %v4040_v37, %v4039_v41 }
0x16a2   :  { %v4033_v11 = vrot.slane %v4032_v48, 1 }
0x16a3   :  { %v4042_v39 = vrot.slane %v4041_v58, 1 }
0x16a4   :  { %v4034_v31 = vadd.f32 %v4033_v11, %v4032_v48 }
0x16a5   :  { %v4043_v21 = vadd.f32 %v4042_v39, %v4041_v58 }
0x16a6   :  { %5508 = vrcp.f32 %v4034_v31 }
0x16a7   :  { %5510 = vrcp.f32 %v4043_v21 }
0x16b3   :  { %v5509_v7 = vpop.eup %5508 }
0x16b4   :  { %v5511_v17 = vpop.eup %5510  ;;  %v4045_v15 = vmul.f32 %v5509_v7, %v5497_v34  ;;  %v4048_v54 = vmul.f32 %v5509_v7, %v5493_v28  ;;  %v4050_v3 = vmul.f32 %v5509_v7, %v5501_v52  ;;  %v4052_v44 = vmul.f32 %v5509_v7, %v5505_v10 }
0x16b5   :  { %v4047_v53 = vmul.f32 %v5511_v17, %v5499_v8  ;;  %v4049_v24 = vmul.f32 %v5511_v17, %v5495_v18  ;;  %v4051_v62 = vmul.f32 %v5511_v17, %v5503_v49  ;;  %v4053_v60 = vmul.f32 %v5511_v17, %v5507_v47 }
0x16b6   :  { %4054 = vxpose.xlu0.b32.start [1/4] (short) %v4045_v15, 128 }
0x16b7   :  { %4086 = vxpose.xlu1.b32.start [1/4] (short) %v4047_v53, 128 }
0x16ba   :  { %4055 = vxpose.xlu0.b32.cont [2/4] (short) %v4048_v54, 128 }
0x16bb   :  { %4087 = vxpose.xlu1.b32.cont [2/4] (short) %v4049_v24, 128 }
0x16be   :  { %4056 = vxpose.xlu0.b32.cont [3/4] (short) %v4050_v3, 128 }
0x16bf   :  { %4088 = vxpose.xlu1.b32.cont [3/4] (short) %v4051_v62, 128 }
0x16c2   :  { %4057 = vxpose.xlu0.b32.end [4/4] (short) %v4052_v44, 128 }
0x16c3   :  { %4089 = vxpose.xlu1.b32.end [4/4] (short) %v4053_v60, 128 }
0x1732   :  { %v4070_v45 = vpop.trf.xlu0 }
0x1733   :  { %v4102_v57 = vpop.trf.xlu1 }
0x1736   :  { %v4071_v33 = vpop.trf.xlu0 }
0x1737   :  { %v4118_v2 = vpack.c.bf16 %v4071_v33, %v4070_v45  ;;  %v4103_v50 = vpop.trf.xlu1 }
0x1738   :  { %v4126_v49 = vpack.c.bf16 %v4103_v50, %v4102_v57 }
0x1739   :  { %5332 = vmatprep.mubr.msk.bf16.mxu1 %vm702_vm10, %v4118_v2 }
0x173a   :  { %v4072_v63 = vpop.trf.xlu0 }
0x173b   :  { %v4104_v1 = vpop.trf.xlu1 }
0x173e   :  { %v4073_v61 = vpop.trf.xlu0 }
0x173f   :  { %v4119_v9 = vpack.c.bf16 %v4073_v61, %v4072_v63  ;;  %v4105_v51 = vpop.trf.xlu1 }
0x1740   :  { %v4127_v10 = vpack.c.bf16 %v4105_v51, %v4104_v1 }
0x1741   :  { %5333 = vmatmul.mubr.msk.bf16.vlgmr.msra.gmra.mxu1 %vm702_vm10, %v4119_v9 }
0x1742   :  { %v4074_v36 = vpop.trf.xlu0 }
0x1743   :  { %v4106_v55 = vpop.trf.xlu1 }
0x1746   :  { %v4075_v59 = vpop.trf.xlu0 }
0x1747   :  { %v4120_v23 = vpack.c.bf16 %v4075_v59, %v4074_v36  ;;  %v4107_v19 = vpop.trf.xlu1 }
0x1748   :  { %v4128_v29 = vpack.c.bf16 %v4107_v19, %v4106_v55  ;;  %v200_v55 = vld [vmem:[%s7277_s5 + $0xf8] sm:$0xff] }
0x1749   :  { %5336 = vmatprep.mubr.msk.bf16.mxu1 %vm702_vm10, %v4120_v23 }
0x174a   :  { %v4076_v46 = vpop.trf.xlu0 }
0x174b   :  { %v4108_v6 = vpop.trf.xlu1 }
0x174e   :  { %v4077_v20 = vpop.trf.xlu0 }
0x174f   :  { %v4121_v32 = vpack.c.bf16 %v4077_v20, %v4076_v46  ;;  %v4109_v22 = vpop.trf.xlu1  ;;  %v184_v20 = vld [vmem:[%s7277_s5 + $0x78] sm:$0xff] }
0x1750   :  { %v4129_v40 = vpack.c.bf16 %v4109_v22, %v4108_v6  ;;  %v182_v22 = vld [vmem:[%s7277_s5 + $0x68] sm:$0xff] }
0x1751   :  { %5337 = vmatmul.mubr.msk.bf16.gmra.mxu1 %vm702_vm10, %v4121_v32  ;;  %v199_v32 = vld [vmem:[%s7277_s5 + $0xf0] sm:$0xff] }
0x1752   :  { %v4078_v12 = vpop.trf.xlu0 }
0x1753   :  { %v4110_v5 = vpop.trf.xlu1 }
0x1756   :  { %v4079_v0 = vpop.trf.xlu0 }
0x1757   :  { %v4122_v56 = vpack.c.bf16 %v4079_v0, %v4078_v12  ;;  %v4111_v34 = vpop.trf.xlu1  ;;  %v183_v12 = vld [vmem:[%s7277_s5 + $0x70] sm:$0xff] }
0x1758   :  { %v4130_v26 = vpack.c.bf16 %v4111_v34, %v4110_v5  ;;  %v181_v5 = vld [vmem:[%s7277_s5 + $0x60] sm:$0xff]  ;;  %v196_v34 = vld [vmem:[%s7277_s5 + $0xd8] sm:$0xff] }
0x1759   :  { %5340 = vmatprep.mubr.msk.bf16.mxu1 %vm702_vm10, %v4122_v56  ;;  %v198_v56 = vld [vmem:[%s7277_s5 + $0xe8] sm:$0xff] }
0x175a   :  { %v4080_v4 = vpop.trf.xlu0 }
0x175b   :  { %v4112_v52 = vpop.trf.xlu1 }
0x175e   :  { %v4081_v27 = vpop.trf.xlu0 }
0x175f   :  { %v4123_v30 = vpack.c.bf16 %v4081_v27, %v4080_v4  ;;  %v4113_v35 = vpop.trf.xlu1 }
0x1760   :  { %v4131_v25 = vpack.c.bf16 %v4113_v35, %v4112_v52 }
0x1761   :  { %5341 = vmatmul.mubr.msk.bf16.gmra.mxu1 %vm702_vm10, %v4123_v30 }
0x1762   :  { %v4082_v14 = vpop.trf.xlu0 }
0x1763   :  { %v4114_v47 = vpop.trf.xlu1 }
0x1766   :  { %v4083_v28 = vpop.trf.xlu0 }
0x1767   :  { %v4124_v18 = vpack.c.bf16 %v4083_v28, %v4082_v14  ;;  %v4115_v16 = vpop.trf.xlu1  ;;  %v197_v14 = vld [vmem:[%s7277_s5 + $0xe0] sm:$0xff] }
0x1768   :  { %v4132_v41 = vpack.c.bf16 %v4115_v16, %v4114_v47  ;;  %v178_v47 = vld [vmem:[%s7277_s5 + $0x48] sm:$0xff]  ;;  %v193_v16 = vld [vmem:[%s7277_s5 + $0xc0] sm:$0xff] }
0x1769   :  { %5344 = vmatprep.mubr.msk.bf16.mxu1 %vm702_vm10, %v4124_v18 }
0x176a   :  { %v4084_v8 = vpop.trf.xlu0 }
0x176b   :  { %v4116_v43 = vpop.trf.xlu1 }
0x176e   :  { %v4085_v13 = vpop.trf.xlu0 }
0x176f   :  { %v4125_v42 = vpack.c.bf16 %v4085_v13, %v4084_v8  ;;  %v4117_v38 = vpop.trf.xlu1  ;;  %v180_v8 = vld [vmem:[%s7277_s5 + $0x58] sm:$0xff] }
0x1770   :  { %v4133_v37 = vpack.c.bf16 %v4117_v38, %v4116_v43  ;;  %v177_v43 = vld [vmem:[%s7277_s5 + $0x40] sm:$0xff]  ;;  %v192_v38 = vld [vmem:[%s7277_s5 + $0xb8] sm:$0xff] }
0x1771   :  { %5345 = vmatmul.mubr.msk.bf16.gmra.mxu1 %vm702_vm10, %v4125_v42  ;;  %v195_v42 = vld [vmem:[%s7277_s5 + $0xd0] sm:$0xff] }
0x1772   :  { %5348 = vmatprep.mubr.msk.bf16.mxu1 %vm702_vm10, %v4126_v49  ;;  %v179_v49 = vld [vmem:[%s7277_s5 + $0x50] sm:$0xff] }
0x1779   :  { %5349 = vmatmul.mubr.msk.bf16.gmra.mxu1 %vm702_vm10, %v4127_v10 }
0x177a   :  { %5352 = vmatprep.mubr.msk.bf16.mxu1 %vm702_vm10, %v4128_v29  ;;  %v194_v29 = vld [vmem:[%s7277_s5 + $0xc8] sm:$0xff] }
0x1781   :  { %5353 = vmatmul.mubr.msk.bf16.gmra.mxu1 %vm702_vm10, %v4129_v40 }
0x1782   :  { %5356 = vmatprep.mubr.msk.bf16.mxu1 %vm702_vm10, %v4130_v26 }
0x1789   :  { %5357 = vmatmul.mubr.msk.bf16.gmra.mxu1 %vm702_vm10, %v4131_v25 }
0x178a   :  { %5360 = vmatprep.mubr.msk.bf16.mxu1 %vm702_vm10, %v4132_v41 }
0x1791   :  { %5361 = vmatmul.mubr.msk.bf16.gmra.mxu1 %vm702_vm10, %v4133_v37  ;;  %v176_v37 = vld [vmem:[%s7277_s5 + $0x38] sm:$0xff]  ;;  %vm4469_vm10 = vcmask 392192  }
0x1801   :  { %v7065_v48 = vpop.f32.mrf.mxu1 }
0x1803   :  { %v7067_v58 = vpop.f32.mrf.mxu1 }
0x1805   :  { %v7069_v11 = vpop.f32.mrf.mxu1 }
0x1807   :  { %v7071_v39 = vpop.f32.mrf.mxu1 }
0x1811   :  { %v7073_v31 = vpop.f32.mrf.mxu1 }
0x1813   :  { %v7075_v21 = vpop.f32.mrf.mxu1 }
0x1815   :  { %v7077_v7 = vpop.f32.mrf.mxu1 }
0x1817   :  { %v7079_v17 = vpop.f32.mrf.mxu1 }
0x1821   :  { %v5342_v15 = vpop.f32.mrf.mxu1 }
0x1822   :  { %v4355_v26 = vmul.f32 %v5342_v15, %v179_v49 }
0x1823   :  { %v7081_v53 = vpop.f32.mrf.mxu1 }
0x1825   :  { %v5343_v54 = vpop.f32.mrf.mxu1 }
0x1826   :  { %v4356_v10 = vmul.f32 %v5343_v54, %v180_v8  ;;  %v4353_v54 = vmul.f32 %v7081_v53, %v177_v43  ;;  %v174_v53 = vld [vmem:[%s7277_s5 + $0x28] sm:$0xff] }
0x1827   :  { %v4253_v24 = vpop.f32.mrf.mxu1 }
0x1828   :  { %v4354_v41 = vmul.f32 %v4253_v24, %v178_v47  ;;  %v175_v24 = vld [vmem:[%s7277_s5 + $0x30] sm:$0xff] }
0x1831   :  { %v5346_v3 = vpop.f32.mrf.mxu1 }
0x1832   :  { %v4359_v30 = vmul.f32 %v5346_v3, %v183_v12  ;;  %v191_v3 = vld [vmem:[%s7277_s5 + $0xb0] sm:$0xff] }
0x1833   :  { %v4266_v62 = vpop.f32.mrf.mxu1 }
0x1834   :  { %v4357_v52 = vmul.f32 %v4266_v62, %v181_v5  ;;  %v202_v5 = vld [vmem:[%s7278_s6 + $0x8] sm:$0xff] }
0x1835   :  { %v5347_v44 = vpop.f32.mrf.mxu1 }
0x1836   :  { %v4360_v6 = vmul.f32 %v5347_v44, %v184_v20  ;;  %v4352_v44 = vmul.f32 %v7077_v7, %v176_v37  ;;  %v173_v7 = vld [vmem:[%s7277_s5 + $0x20] sm:$0xff] }
0x1837   :  { %v4269_v60 = vpop.f32.mrf.mxu1 }
0x1838   :  { %v4358_v18 = vmul.f32 %v4269_v60, %v182_v22  ;;  %v190_v60 = vld [vmem:[%s7277_s5 + $0xa8] sm:$0xff]  ;;  %v5601_v22 = vld [vmem:[%s7275_s3 + $0x38] sm:$0xff] }
0x1839   :  { %v7083_v45 = vpop.f32.mrf.mxu1 }
0x183b   :  { %v7085_v57 = vpop.f32.mrf.mxu1 }
0x183d   :  { %v7087_v33 = vpop.f32.mrf.mxu1 }
0x183f   :  { %v7089_v2 = vpop.f32.mrf.mxu1 }
0x1841   :  { %v7091_v50 = vpop.f32.mrf.mxu1 }
0x1843   :  { %v7093_v63 = vpop.f32.mrf.mxu1 }
0x1845   :  { %v5355_v61 = vpop.f32.mrf.mxu1 }
0x1846   :  { %v4368_v62 = vmul.f32 %v5355_v61, %v192_v38  ;;  %v189_v61 = vld [vmem:[%s7277_s5 + $0xa0] sm:$0xff] }
0x1847   :  { %v7095_v1 = vpop.f32.mrf.mxu1 }
0x1849   :  { %v5358_v9 = vpop.f32.mrf.mxu1 }
0x184a   :  { %v4371_v40 = vmul.f32 %v5358_v9, %v195_v42  ;;  %v4367_v9 = vmul.f32 %v7091_v50, %v191_v3  ;;  %v188_v50 = vld [vmem:[%s7277_s5 + $0x98] sm:$0xff] }
0x184b   :  { %v4314_v36 = vpop.f32.mrf.mxu1 }
0x184c   :  { %v4369_v15 = vmul.f32 %v4314_v36, %v193_v16  ;;  %v4351_v36 = vmul.f32 %v7073_v31, %v175_v24  ;;  %v172_v31 = vld [vmem:[%s7277_s5 + $0x18] sm:$0xff] }
0x184d   :  { %v5359_v51 = vpop.f32.mrf.mxu1  ;;  %v4348_v20 = vmul.f32 %v7069_v11, %v172_v31  ;;  %v169_v11 = vld [vmem:[%s7277_s5] sm:$0xff] }
0x184e   :  { %v4372_v35 = vmul.f32 %v5359_v51, %v196_v34  ;;  %v4366_v51 = vmul.f32 %v7095_v1, %v190_v60  ;;  %v187_v1 = vld [vmem:[%s7277_s5 + $0x90] sm:$0xff] }
0x184f   :  { %v4317_v59 = vpop.f32.mrf.mxu1 }
0x1850   :  { %v4370_v25 = vmul.f32 %v4317_v59, %v194_v29  ;;  %v4350_v59 = vmul.f32 %v7079_v17, %v174_v53  ;;  %v171_v17 = vld [vmem:[%s7277_s5 + $0x10] sm:$0xff] }
0x1851   :  { %v5362_v23 = vpop.f32.mrf.mxu1 }
0x1852   :  { %v4375_v27 = vmul.f32 %v5362_v23, %v199_v32  ;;  %v4365_v23 = vmul.f32 %v7093_v63, %v189_v61  ;;  %v186_v63 = vld [vmem:[%s7277_s5 + $0x88] sm:$0xff]  ;;  %v4363_v32 = vmul.f32 %v7083_v45, %v187_v1 }
0x1853   :  { %v4330_v46 = vpop.f32.mrf.mxu1  ;;  %v4362_v12 = vmul.f32 %v7089_v2, %v186_v63  ;;  %v205_v2 = vld [vmem:[%s7278_s6 + $0x20] sm:$0xff] }
0x1854   :  { %v4373_v13 = vmul.f32 %v4330_v46, %v197_v14  ;;  %v4349_v46 = vmul.f32 %v7075_v21, %v173_v7  ;;  %v170_v21 = vld [vmem:[%s7277_s5 + $0x8] sm:$0xff]  ;;  %v203_v14 = vld [vmem:[%s7278_s6 + $0x10] sm:$0xff] }
0x1855   :  { %v5363_v19 = vpop.f32.mrf.mxu1 }
0x1856   :  { %v4376_v0 = vmul.f32 %v5363_v19, %v200_v55  ;;  %v4364_v55 = vmul.f32 %v7087_v33, %v188_v50  ;;  %v4347_v19 = vmul.f32 %v7065_v48, %v171_v17  ;;  %v185_v33 = vld [vmem:[%s7277_s5 + $0x80] sm:$0xff]  ;;  %v4345_v48 = vmul.f32 %v7067_v58, %v169_v11  ;;  %v5597_v58 = vld [vmem:[%s7275_s3 + $0x18] sm:$0xff] }
0x1857   :  { %v4333_v4 = vpop.f32.mrf.mxu1  ;;  %v4361_v45 = vmul.f32 %v7085_v57, %v185_v33  ;;  %v5598_v57 = vld [vmem:[%s7275_s3 + $0x10] sm:$0xff] }
0x1858   :  { %5076 = vmatprep.subr.mxu0 %v4376_v0  ;;  %v4374_v28 = vmul.f32 %v4333_v4, %v198_v56  ;;  %v4346_v0 = vmul.f32 %v7071_v39, %v170_v21  ;;  %v5596_v39 = vld [vmem:[%s7275_s3] sm:$0xff]  ;;  %v5599_v56 = vld [vmem:[%s7275_s3 + $0x28] sm:$0xff] }
0x1859   :  { %5077 = vmatpush3.msra.mxu0 %v4360_v6  ;;  %v206_v6 = vld [vmem:[%s7278_s6 + $0x28] sm:$0xff]  ;;  %v5600_v4 = vld [vmem:[%s7275_s3 + $0x20] sm:$0xff] }
0x185a   :  { %5078 = vmatprep.subr.mxu0 %v4375_v27  ;;  %v5602_v27 = vld [vmem:[%s7275_s3 + $0x30] sm:$0xff] }
0x185b   :  { %5079 = vmatpush3.msra.mxu0 %v4359_v30  ;;  %v204_v30 = vld [vmem:[%s7278_s6 + $0x18] sm:$0xff] }
0x185c   :  { %5080 = vmatprep.subr.mxu0 %v4374_v28  ;;  %v201_v28 = vld [vmem:[%s7278_s6] sm:$0xff] }
0x185d   :  { %5081 = vmatpush3.msra.mxu0 %v4358_v18 }
0x185e   :  { %5082 = vmatprep.subr.mxu0 %v4373_v13 }
0x185f   :  { %5083 = vmatpush3.msra.mxu0 %v4357_v52 }
0x1860   :  { %5084 = vmatprep.subr.mxu0 %v4372_v35 }
0x1861   :  { %5085 = vmatpush3.msra.mxu0 %v4356_v10 }
0x1862   :  { %5086 = vmatprep.subr.mxu0 %v4371_v40 }
0x1863   :  { %5087 = vmatpush3.msra.mxu0 %v4355_v26  ;;  %v4778_v26 = vld [vmem:[#allocation9] ss:$0 sm:$0xff] }
0x1864   :  { %5088 = vmatprep.subr.mxu0 %v4370_v25 }
0x1865   :  { %5089 = vmatpush3.msra.mxu0 %v4354_v41 }
0x1866   :  { %5090 = vmatprep.subr.mxu0 %v4369_v15 }
0x1867   :  { %5091 = vmatpush3.msra.mxu0 %v4353_v54 }
0x1868   :  { %5092 = vmatprep.subr.mxu0 %v4368_v62 }
0x1869   :  { %5093 = vmatpush3.msra.mxu0 %v4352_v44 }
0x186a   :  { %5094 = vmatprep.subr.mxu0 %v4367_v9 }
0x186b   :  { %5095 = vmatpush3.msra.mxu0 %v4351_v36 }
0x186c   :  { %5096 = vmatprep.subr.mxu0 %v4366_v51 }
0x186d   :  { %5097 = vmatpush3.msra.mxu0 %v4350_v59 }
0x186e   :  { %5098 = vmatprep.subr.mxu0 %v4365_v23 }
0x186f   :  { %5099 = vmatpush3.msra.mxu0 %v4349_v46 }
0x1870   :  { %5100 = vmatprep.subr.mxu0 %v4364_v55 }
0x1871   :  { %5101 = vmatpush3.msra.mxu0 %v4348_v20 }
0x1872   :  { %5102 = vmatprep.subr.mxu0 %v4363_v32 }
0x1873   :  { %5103 = vmatpush3.msra.mxu0 %v4347_v19 }
0x1874   :  { %5104 = vmatprep.subr.mxu0 %v4362_v12 }
0x1875   :  { %5105 = vmatpush3.msra.mxu0 %v4346_v0 }
0x1876   :  { %5106 = vmatprep.subr.mxu0 %v4361_v45 }
0x1877   :  { %5107 = vmatpush3.msra.mxu0 %v4345_v48 }
0x1878   :  { %4442 = vmatmul.mubr.f32.vlgmr.msra.gmra.mxu0 %v5596_v39  ;;  %5364 = vmatprep.subr.mxu0 %v206_v6 }
0x1879   :  { %4446 = vmatprep.mubr.f32.mxu0 %v5597_v58  ;;  %5365 = vmatpush3.msra.mxu0 %v206_v6 }
0x187a   :  { %5366 = vmatprep.subr.mxu0 %v205_v2 }
0x187b   :  { %5367 = vmatpush3.msra.mxu0 %v205_v2 }
0x187c   :  { %4447 = vmatmul.mubr.f32.gmra.mxu0 %v5598_v57  ;;  %5368 = vmatprep.subr.mxu0 %v204_v30 }
0x187d   :  { %4451 = vmatprep.mubr.f32.mxu0 %v5599_v56  ;;  %5369 = vmatpush3.msra.mxu0 %v204_v30 }
0x187e   :  { %5370 = vmatprep.subr.mxu0 %v203_v14 }
0x187f   :  { %5371 = vmatpush3.msra.mxu0 %v203_v14 }
0x1880   :  { %4452 = vmatmul.mubr.f32.gmra.mxu0 %v5600_v4  ;;  %5372 = vmatprep.subr.mxu0 %v202_v5 }
0x1881   :  { %4456 = vmatprep.mubr.f32.mxu0 %v5601_v22  ;;  %5373 = vmatpush3.msra.mxu0 %v202_v5 }
0x1882   :  { %5374 = vmatprep.subr.mxu0 %v201_v28 }
0x1883   :  { %5375 = vmatpush3.msra.mxu0 %v201_v28 }
0x1884   :  { %4457 = vmatmul.mubr.f32.gmra.mxu0 %v5602_v27 }
0x1938   :  { %v5108_v18 = vpop.f32.mrf.mxu0 }
0x193a   :  { %v5109_v34 = vpop.f32.mrf.mxu0 }
0x193b   :  { %v5110_v8 = vadd.f32 %v5109_v34, %v5108_v18 }
0x193c   :  { %v5111_v13 = vpop.f32.mrf.mxu0 }
0x193d   :  { %5376 = vmatprep.mubr.msk.f32.mxu0 %vm4469_vm10, %v5110_v8 }
0x193e   :  { %v5112_v52 = vpop.f32.mrf.mxu0 }
0x193f   :  { %v5113_v42 = vadd.f32 %v5112_v52, %v5111_v13 }
0x1940   :  { %v5114_v49 = vpop.f32.mrf.mxu0 }
0x1941   :  { %5377 = vmatmul.mubr.msk.f32.vlgmr.msra.gmra.mxu0 %vm4469_vm10, %v5113_v42 }
0x1942   :  { %v5115_v35 = vpop.f32.mrf.mxu0 }
0x1943   :  { %v5116_v10 = vadd.f32 %v5115_v35, %v5114_v49 }
0x1944   :  { %v5117_v29 = vpop.f32.mrf.mxu0 }
0x1945   :  { %5379 = vmatprep.mubr.msk.f32.mxu0 %vm4469_vm10, %v5116_v10 }
0x1946   :  { %v5118_v47 = vpop.f32.mrf.mxu0 }
0x1947   :  { %v5119_v40 = vadd.f32 %v5118_v47, %v5117_v29 }
0x1949   :  { %5380 = vmatmul.mubr.msk.f32.gmra.mxu0 %vm4469_vm10, %v5119_v40 }
0x1a01   :  { %v5378_v16 = vpop.f32.mrf.mxu0 }
0x1a02   :  { %v4554_v43 = vadd.f32 %v5378_v16, %v4778_v26 }
0x1a03   :  { %v4548_v25 = vpop.f32.mrf.mxu0 }
0x1a04   :  { %v4549_v41 = vadd.f32 %v4778_v26, %v4548_v25  ;;  %v4571_v38 = vsel %vm4567_vm4, %v4554_v43, -inf }
0x1a05   :  { %4572 = vmax.xlane.f32.xlu1 %v4571_v38 }
0x1a06   :  { %v4568_v37 = vsel %vm4567_vm4, %v4549_v41, -inf }
0x1a07   :  { %4569 = vmax.xlane.f32.xlu0 %v4568_v37 }
0x1a09   :  { %v5381_v15 = vpop.f32.mrf.mxu0 }
0x1a0a   :  { %v4564_v24 = vadd.f32 %v5381_v15, %v4778_v26 }
0x1a0b   :  { %v4558_v54 = vpop.f32.mrf.mxu0 }
0x1a0c   :  { %v4559_v3 = vadd.f32 %v4778_v26, %v4558_v54  ;;  %v4577_v44 = vsel %vm4567_vm4, %v4564_v24, -inf }
0x1a0e   :  { %v4574_v62 = vsel %vm4567_vm4, %v4559_v3, -inf }
0x1a0f   :  { %4575 = vmax.xlane.f32.xlu0 %v4574_v62 }
0x1a13   :  { %4578 = vmax.xlane.f32.xlu0 %v4577_v44 }
0x1a8e   :  { %v4573_v60 = vpop.xlane.xlu1 %4572 }
0x1a8f   :  { %v4581_v53 = vsub.f32 %v4554_v43, %v4573_v60 }
0x1a90   :  { %v4570_v9 = vpop.xlane.xlu0 %4569 }
0x1a91   :  { %v4586_v36 = vmul.f32 1.442695, %v4581_v53  ;;  %v4580_v61 = vsub.f32 %v4549_v41, %v4570_v9 }
0x1a93   :  { %5512 = vpow2.f32 %v4586_v36  ;;  %v4584_v7 = vmul.f32 1.442695, %v4580_v61 }
0x1a95   :  { %5514 = vpow2.f32 %v4584_v7 }
0x1a98   :  { %v4576_v51 = vpop.xlane.xlu0 %4575 }
0x1a99   :  { %v4582_v59 = vsub.f32 %v4559_v3, %v4576_v51 }
0x1a9b   :  { %v4588_v50 = vmul.f32 1.442695, %v4582_v59 }
0x1a9c   :  { %v4579_v31 = vpop.xlane.xlu0 %4578 }
0x1a9d   :  { %5516 = vpow2.f32 %v4588_v50  ;;  %v4583_v23 = vsub.f32 %v4564_v24, %v4579_v31 }
0x1a9f   :  { %v4590_v46 = vmul.f32 1.442695, %v4583_v23 }
0x1aa0   :  { %v5513_v1 = vpop.eup %5512 }
0x1aa1   :  { %5518 = vpow2.f32 %v4590_v46  ;;  %v4595_v17 = vsel %vm4567_vm4, %v5513_v1, 0.0 }
0x1aa2   :  { %v5515_v55 = vpop.eup %5514  ;;  %4596 = vadd.xlane.f32.xlu0 %v4595_v17 }
0x1aa3   :  { %v4592_v20 = vsel %vm4567_vm4, %v5515_v55, 0.0 }
0x1aa4   :  { %4593 = vadd.xlane.f32.xlu1 %v4592_v20 }
0x1aaa   :  { %v5517_v63 = vpop.eup %5516 }
0x1aab   :  { %v4598_v21 = vsel %vm4567_vm4, %v5517_v63, 0.0 }
0x1aac   :  { %4599 = vadd.xlane.f32.xlu1 %v4598_v21 }
0x1aae   :  { %v5519_v32 = vpop.eup %5518 }
0x1aaf   :  { %v4601_v19 = vsel %vm4567_vm4, %v5519_v32, 0.0 }
0x1ab0   :  { %4602 = vadd.xlane.f32.xlu0 %v4601_v19 }
0x1b2b   :  { %v4597_v33 = vpop.xlane.xlu0 %4596 }
0x1b2c   :  { %5520 = vlog2.f32 %v4597_v33 }
0x1b2d   :  { %v4594_v11 = vpop.xlane.xlu1 %4593 }
0x1b2e   :  { %5522 = vlog2.f32 %v4594_v11 }
0x1b35   :  { %v4600_v12 = vpop.xlane.xlu1 %4599 }
0x1b36   :  { %5524 = vlog2.f32 %v4600_v12 }
0x1b39   :  { %v5521_v0 = vpop.eup %5520  ;;  %v4603_v45 = vpop.xlane.xlu0 %4602 }
0x1b3a   :  { %v4607_v48 = vmul.f32 0.6931472, %v5521_v0  ;;  %5526 = vlog2.f32 %v4603_v45 }
0x1b3b   :  { %v5523_v6 = vpop.eup %5522 }
0x1b3c   :  { %v4613_v2 = vsub.f32 %v4581_v53, %v4607_v48  ;;  %v4605_v39 = vmul.f32 0.6931472, %v5523_v6 }
0x1b3e   :  { %4617 = vst.msk [vmem:[%s7289_s17 + $0x8] sm:$0xff] %vm4567_vm4, %v4613_v2  ;;  %v4612_v58 = vsub.f32 %v4580_v61, %v4605_v39 }
0x1b40   :  { %4616 = vst.msk [vmem:[%s7289_s17] sm:$0xff] %vm4567_vm4, %v4612_v58 }
0x1b43   :  { %v5525_v57 = vpop.eup %5524 }
0x1b44   :  { %v4609_v56 = vmul.f32 0.6931472, %v5525_v57 }
0x1b46   :  { %v4614_v4 = vsub.f32 %v4582_v59, %v4609_v56 }
0x1b47   :  { %v5527_v22 = vpop.eup %5526 }
0x1b48   :  { %4618 = vst.msk [vmem:[%s7289_s17 + $0x10] sm:$0xff] %vm4567_vm4, %v4614_v4  ;;  %v4611_v27 = vmul.f32 0.6931472, %v5527_v22 }
0x1b4a   :  { %v4615_v30 = vsub.f32 %v4583_v23, %v4611_v27 }
0x1b4c   :  { %4619 = vst.msk [vmem:[%s7289_s17 + $0x18] sm:$0xff] %vm4567_vm4, %v4615_v30 }
0x1b4d   :  { %4624 = vsyncpa [#allocation3], 1 }
0x1b4e   :  { %4625 = vsyncpa [#allocation5], 1 }
0x1b4f   :  { %4626 = vsyncpa [#allocation8], 1 }

</bundles_post_ra>
